<compile_context>
chip_gen: v6e
topology: v6e:2x2x1
jax: 0.10.0
libtpu: 0.0.40
codegen_flags: <defaults>
</compile_context>

<pallas_src>
import functools

import numpy as np
import jax
import jax.numpy as jnp
from jax.experimental import pallas as pl
from jax.experimental.pallas import tpu as pltpu


def _vmem_spec():
    return pl.BlockSpec(memory_space=pltpu.MemorySpace.VMEM)


def _smem_spec():
    return pl.BlockSpec(memory_space=pltpu.MemorySpace.SMEM)


# ---------------------------------------------------------------------------
# LSTM core: fused-gate, fused-direction recurrence over one layer.
# ---------------------------------------------------------------------------
def _lstm_core(x_ref, wih_ref, whh_ref, b_ref, seq_ref, xp_ref, *, B, T, H, D):
    """x_ref  : (T*B, In)    time-major rows (row = t*B + b)
       wih_ref: (D, In, 4H)  gates (i,f,g,o) stacked along lanes, pre-transposed
       whh_ref: (H, D*4H)    per-direction recurrent weights stacked on lanes
       b_ref  : (D, 1, 4H)   b_ih + b_hh
       seq_ref: (T*B, D*H)   output hidden sequence (fwd lanes 0:H, bwd H:2H)
       xp_ref : (T*D*B, 4H)  scratch: step-major gate pre-activations
    """
    G = 4 * H
    DB = D * B
    x2d = x_ref[...]

    # x-projection: one dot per direction (bias folded in), rows re-ordered so
    # the recurrence reads one contiguous (D*B, 4H) slab per step (bwd rows
    # already time-reversed).  All of this is outside the serial loop.
    for d in range(D):
        xp = jnp.dot(x2d, wih_ref[d], preferred_element_type=jnp.float32) + b_ref[d]
        for t in range(T):
            src = t if d == 0 else T - 1 - t
            dst = t * DB + d * B
            xp_ref[dst:dst + B, :] = xp[src * B:(src + 1) * B, :]

    whh = whh_ref[...]
    if D == 2:
        row_is_fwd = jax.lax.broadcasted_iota(jnp.int32, (DB, G), 0) < B

    def step(s, carry):
        h, c = carry                                                  # (DB, H)
        rec = jnp.dot(h, whh, preferred_element_type=jnp.float32)     # (DB, D*4H)
        if D == 2:
            rec = jnp.where(row_is_fwd, rec[:, :G], rec[:, G:])       # (DB, 4H)
        g = xp_ref[pl.ds(s * DB, DB), :] + rec
        i = jax.nn.sigmoid(g[:, 0:H])
        f = jax.nn.sigmoid(g[:, H:2 * H])
        gg = jnp.tanh(g[:, 2 * H:3 * H])
        o = jax.nn.sigmoid(g[:, 3 * H:4 * H])
        c = f * c + i * gg
        h = o * jnp.tanh(c)
        seq_ref[pl.ds(s * B, B), 0:H] = h[0:B, :]                     # fwd @ time s
        if D == 2:
            seq_ref[pl.ds((T - 1 - s) * B, B), H:2 * H] = h[B:, :]    # bwd @ time T-1-s
        return (h, c)

    h0 = jnp.zeros((DB, H), jnp.float32)
    c0 = jnp.zeros((DB, H), jnp.float32)
    jax.lax.fori_loop(0, T, step, (h0, c0), unroll=True)


# ---------------------------------------------------------------------------
# encode_query: all LSTM layers + start/end gather + average + fc_full fused
# into ONE pallas_call (intermediate sequences never leave VMEM).
# ---------------------------------------------------------------------------
def _encode_query_kernel(*refs, B, T, H, D, L):
    # refs: [wl, x, (wih, whh, b) * L, fc_w, fc_b]   inputs
    #       [q]                                       output
    #       [seq0, seq1, xp]                          scratch
    wl_ref, x_ref = refs[0], refs[1]
    fw_ref, fb_ref = refs[2 + 3 * L], refs[3 + 3 * L]
    q_ref = refs[4 + 3 * L]
    seq_scratch = (refs[5 + 3 * L], refs[6 + 3 * L])
    xp_ref = refs[7 + 3 * L]

    cur = x_ref
    for l in range(L):
        wih_ref, whh_ref, b_ref = refs[2 + 3 * l], refs[3 + 3 * l], refs[4 + 3 * l]
        out_seq = seq_scratch[l % 2]
        _lstm_core(cur, wih_ref, whh_ref, b_ref, out_seq, xp_ref,
                   B=B, T=T, H=H, D=D)
        cur = out_seq

    # Query head: q = fc_full((h[t=0] + h[t=wordlen-1]) / 2), one dot total.
    ends = []
    for bi in range(B):
        wl = jnp.clip(wl_ref[bi], 1, T)          # clamp: no silent OOB VMEM read
        ends.append(cur[pl.ds((wl - 1) * B + bi, 1), :])
    q_end = jnp.concatenate(ends, axis=0) if B > 1 else ends[0]
    full = (cur[0:B, :] + q_end) * 0.5
    q_ref[...] = (jnp.dot(full, fw_ref[...], preferred_element_type=jnp.float32)
                  + fb_ref[...]).astype(q_ref.dtype)


def encode_query(batch_queries, wordlens, params):
    B, T, In = batch_queries.shape
    layers = params["lstm"]
    L = len(layers)
    D, _, G = layers[0][0].shape
    H = G // 4
    F = params["fc_full_w"].shape[1]
    # batch-first -> time-major rows (row = t*B + b); lstm.flatten_parameters()
    # is a host-side storage no-op.
    x2d = jnp.transpose(batch_queries, (1, 0, 2)).reshape(T * B, In)
    flat = []
    for wih, whh, b in layers:
        flat += [wih, whh, b]
    return pl.pallas_call(
        functools.partial(_encode_query_kernel, B=B, T=T, H=H, D=D, L=L),
        out_shape=jax.ShapeDtypeStruct((B, F), jnp.float32),
        in_specs=[_smem_spec()] + [_vmem_spec()] * (3 * L + 3),
        out_specs=_vmem_spec(),
        scratch_shapes=[pltpu.VMEM((T * B, D * H), jnp.float32),
                        pltpu.VMEM((T * B, D * H), jnp.float32),
                        pltpu.VMEM((T * D * B, G), jnp.float32)],
    )(wordlens.astype(jnp.int32), x2d, *flat,
      params["fc_full_w"], params["fc_full_b"])


# ---------------------------------------------------------------------------
# Fused map2d path: conv5x5 -> BatchNorm(batch stats) -> tanh -> conv3x3.
# Convs are banded matmuls: per batch image and kh tap,
#   (H, Wpad*Cin) @ (Wpad*Cin, W*Cout), output lane-dense (B*H, W*Cout).
# ---------------------------------------------------------------------------
def _map2d_fused_kernel(x_ref, m1_ref, b1_ref, g_ref, bt_ref, fold_ref, tile_ref,
                        m2_ref, b2_ref, o_ref, xp1, xp2,
                        *, B, H, W, Cin, Cmid, Cout, pad1, pad2):
    KH1 = m1_ref.shape[0]
    KH2 = m2_ref.shape[0]
    Hp1 = H + 2 * pad1
    Hp2 = H + 2 * pad2

    # --- zero-padded conv-1 input (rows = b*Hp1 + hp, lanes = wp*Cin + c) ---
    xp1[...] = jnp.zeros(xp1.shape, jnp.float32)
    for b in range(B):
        xp1[b * Hp1 + pad1:b * Hp1 + pad1 + H,
            pad1 * Cin:(pad1 + W) * Cin] = x_ref[b * H:(b + 1) * H, :]

    # --- conv 5x5: KH1 banded matmuls per image ---
    b1v = b1_ref[...]
    y1_blocks = []
    for b in range(B):
        acc = jnp.zeros((H, W * Cmid), jnp.float32)
        for kh in range(KH1):
            acc = acc + jnp.dot(xp1[b * Hp1 + kh:b * Hp1 + kh + H, :], m1_ref[kh],
                                preferred_element_type=jnp.float32)
        y1_blocks.append(acc + b1v)
    y1 = jnp.concatenate(y1_blocks, axis=0)                 # (B*H, W*Cmid)

    # --- BatchNorm2d (training-mode batch statistics, two-pass variance) ---
    # TODO(synk): running_mean/running_var buffer updates are bookkeeping only
    # and are not modeled (forward normalizes with batch statistics).
    n = float(B * H * W)
    fold = fold_ref[...]                                    # (W*Cmid, Cmid)
    tile = tile_ref[...]                                    # (Cmid, W*Cmid)
    row_sum = jnp.sum(y1, axis=0, keepdims=True)
    mean_c = jnp.dot(row_sum, fold, preferred_element_type=jnp.float32) / n
    mean_t = jnp.dot(mean_c, tile, preferred_element_type=jnp.float32)
    cent = y1 - mean_t
    var_c = jnp.dot(jnp.sum(cent * cent, axis=0, keepdims=True), fold,
                    preferred_element_type=jnp.float32) / n
    scale_c = g_ref[...] * jax.lax.rsqrt(var_c + 1e-5)
    shift_c = bt_ref[...] - mean_c * scale_c
    scale_t = jnp.dot(scale_c, tile, preferred_element_type=jnp.float32)
    shift_t = jnp.dot(shift_c, tile, preferred_element_type=jnp.float32)
    t_full = jnp.tanh(y1 * scale_t + shift_t)               # (B*H, W*Cmid)

    # --- zero-padded conv-2 input ---
    xp2[...] = jnp.zeros(xp2.shape, jnp.float32)
    for b in range(B):
        xp2[b * Hp2 + pad2:b * Hp2 + pad2 + H,
            pad2 * Cmid:(pad2 + W) * Cmid] = t_full[b * H:(b + 1) * H, :]

    # --- conv 3x3, lane-dense (B*H, W*Cout) writeback ---
    b2v = b2_ref[...]
    for b in range(B):
        acc = jnp.zeros((H, W * Cout), jnp.float32)
        for kh in range(KH2):
            acc = acc + jnp.dot(xp2[b * Hp2 + kh:b * Hp2 + kh + H, :], m2_ref[kh],
                                preferred_element_type=jnp.float32)
        o_ref[b * H:(b + 1) * H, :] = (acc + b2v).astype(o_ref.dtype)


def map2d_path(x_nchw, params):
    B, Cin, H, W = x_nchw.shape
    m1, m2 = params["conv_m"], params["conv1_m"]
    Cmid = params["bn_gamma"].shape[1]
    Cout = params["conv1_b"].shape[1] // W
    pad1 = (m1.shape[1] // Cin - W) // 2
    pad2 = (m2.shape[1] // Cmid - W) // 2
    # TODO(synk): NCHW<->NHWC relayout stays at the XLA boundary; the kernel
    # consumes a lane-fused (B*H, W*Cin) image.
    x2d = jnp.transpose(x_nchw, (0, 2, 3, 1)).astype(jnp.float32).reshape(B * H, W * Cin)
    y2d = pl.pallas_call(
        functools.partial(_map2d_fused_kernel, B=B, H=H, W=W, Cin=Cin,
                          Cmid=Cmid, Cout=Cout, pad1=pad1, pad2=pad2),
        out_shape=jax.ShapeDtypeStruct((B * H, W * Cout), jnp.float32),
        in_specs=[_vmem_spec()] * 9,
        out_specs=_vmem_spec(),
        scratch_shapes=[
            pltpu.VMEM((B * (H + 2 * pad1), (W + 2 * pad1) * Cin), jnp.float32),
            pltpu.VMEM((B * (H + 2 * pad2), (W + 2 * pad2) * Cmid), jnp.float32),
        ],
    )(x2d, m1, params["conv_b"], params["bn_gamma"], params["bn_beta"],
      params["fold"], params["tile"], m2, params["conv1_b"])
    return jnp.transpose(y2d.reshape(B, H, W, Cout), (0, 3, 1, 2))


# ---------------------------------------------------------------------------
# SimPredictor forward
# ---------------------------------------------------------------------------
def sim_predictor_forward(params, batch_queries, wordlens, map2d_nchw):
    queries = encode_query(batch_queries, wordlens, params)
    map2d_out = map2d_path(map2d_nchw, params)
    return map2d_out, queries


# ---------------------------------------------------------------------------
# Deterministic parameter init (mirrors the module's layer shapes; weights are
# stored once in kernel-ready layouts: fused-gate/fused-direction LSTM weights,
# transposed fc weight, banded conv weight matrices, tiled conv biases).
# ---------------------------------------------------------------------------
def _uniform(key, shape, scale):
    return jax.random.uniform(key, shape, jnp.float32, -scale, scale)


def _banded_conv_weight(w_oihw, w_sp, pad):
    """(Cout, Cin, KH, KW) conv weight -> (KH, (W+2p)*Cin, W*Cout) banded matrix."""
    w = np.asarray(w_oihw, dtype=np.float32)
    cout, cin, kh_sz, kw_sz = w.shape
    wp = w_sp + 2 * pad
    m = np.zeros((kh_sz, wp * cin, w_sp * cout), np.float32)
    for kh in range(kh_sz):
        for wo in range(w_sp):
            for kw in range(kw_sz):
                wi = wo + kw
                m[kh, wi * cin:(wi + 1) * cin,
                  wo * cout:(wo + 1) * cout] = w[:, :, kh, kw].T
    return jnp.asarray(m)


def init_params(key, hidden_size, feat_hidden_size, query_input_size,
                query_hidden_size, bidirectional, num_layers, map_width):
    dirs = 2 if bidirectional else 1
    qh = query_hidden_size // dirs if bidirectional else query_hidden_size
    keys = iter(jax.random.split(key, 128))
    s = 1.0 / float(qh) ** 0.5

    lstm = []
    for layer in range(num_layers):
        in_sz = query_input_size if layer == 0 else qh * dirs
        wih_l, whh_l, b_l = [], [], []
        for _ in range(dirs):
            w_ih = _uniform(next(keys), (4 * qh, in_sz), s)      # PyTorch layout
            w_hh = _uniform(next(keys), (4 * qh, qh), s)
            b_ih = _uniform(next(keys), (4 * qh,), s)
            b_hh = _uniform(next(keys), (4 * qh,), s)
            wih_l.append(jnp.transpose(w_ih.reshape(4, qh, in_sz),
                                       (2, 0, 1)).reshape(in_sz, 4 * qh))
            whh_l.append(jnp.transpose(w_hh.reshape(4, qh, qh),
                                       (2, 0, 1)).reshape(qh, 4 * qh))
            b_l.append((b_ih + b_hh).reshape(1, 4 * qh))
        lstm.append((jnp.stack(wih_l),                           # (D, In, 4H)
                     jnp.concatenate(whh_l, axis=1),             # (H, D*4H)
                     jnp.stack(b_l)))                            # (D, 1, 4H)

    out_qh = qh * dirs
    fc_s = 1.0 / float(out_qh) ** 0.5
    conv_s = 1.0 / float(hidden_size * 25) ** 0.5
    conv1_s = 1.0 / float(feat_hidden_size * 9) ** 0.5

    conv_w = _uniform(next(keys), (feat_hidden_size, hidden_size, 5, 5), conv_s)
    conv_b = _uniform(next(keys), (feat_hidden_size,), conv_s)
    conv1_w = _uniform(next(keys), (feat_hidden_size, feat_hidden_size, 3, 3), conv1_s)
    conv1_b = _uniform(next(keys), (feat_hidden_size,), conv1_s)

    fold = np.tile(np.eye(feat_hidden_size, dtype=np.float32), (map_width, 1))

    return dict(
        lstm=lstm,
        fc_full_w=jnp.transpose(
            _uniform(next(keys), (feat_hidden_size, out_qh), fc_s)),     # (DH, F)
        fc_full_b=_uniform(next(keys), (feat_hidden_size,), fc_s
                           ).reshape(1, feat_hidden_size),
        conv_m=_banded_conv_weight(conv_w, map_width, pad=2),
        conv_b=jnp.tile(conv_b, map_width).reshape(1, -1),               # (1, W*Cmid)
        bn_gamma=jnp.ones((1, feat_hidden_size), jnp.float32),
        bn_beta=jnp.zeros((1, feat_hidden_size), jnp.float32),
        conv1_m=_banded_conv_weight(conv1_w, map_width, pad=1),
        conv1_b=jnp.tile(conv1_b, map_width).reshape(1, -1),             # (1, W*Cout)
        fold=jnp.asarray(fold),                                          # (W*Cmid, Cmid)
        tile=jnp.asarray(fold.T),                                        # (Cmid, W*Cmid)
    )


if __name__ == "__main__":
    B, T = 2, 8
    query_input_size = 16
    query_hidden_size = 32
    hidden_size = 4            # map2d input channels
    feat_hidden_size = 8
    num_layers = 2
    bidirectional = True
    Hs = Ws = 16

    key = jax.random.PRNGKey(0)
    kq, km, kw, kp = jax.random.split(key, 4)
    batch_queries = jax.random.normal(kq, (B, T, query_input_size), jnp.float32)
    map2d = jax.random.normal(km, (B, hidden_size, Hs, Ws), jnp.float32)
    wordlens = jax.random.randint(kw, (B,), 1, T + 1)

    params = init_params(kp, hidden_size, feat_hidden_size, query_input_size,
                         query_hidden_size, bidirectional, num_layers, Ws)

    fwd = jax.jit(sim_predictor_forward)
    map2d_out, queries = fwd(params, batch_queries, wordlens, map2d)
    jax.block_until_ready((map2d_out, queries))

    assert map2d_out.shape == (B, feat_hidden_size, Hs, Ws)
    assert queries.shape == (B, feat_hidden_size)
    print("KERNEL_OK")
</pallas_src>

<mosaic_0001>
module attributes {stable_mosaic.version = 11 : i64} {
  func.func @_map2d_fused_kernel(%arg0: memref<32x64xf32, #tpu.memory_space<vmem>>, %arg1: memref<5x80x128xf32, #tpu.memory_space<vmem>>, %arg2: memref<1x128xf32, #tpu.memory_space<vmem>>, %arg3: memref<1x8xf32, #tpu.memory_space<vmem>>, %arg4: memref<1x8xf32, #tpu.memory_space<vmem>>, %arg5: memref<128x8xf32, #tpu.memory_space<vmem>>, %arg6: memref<8x128xf32, #tpu.memory_space<vmem>>, %arg7: memref<3x144x128xf32, #tpu.memory_space<vmem>>, %arg8: memref<1x128xf32, #tpu.memory_space<vmem>>, %arg9: memref<32x128xf32, #tpu.memory_space<vmem>>, %arg10: memref<40x80xf32, #tpu.memory_space<vmem>>, %arg11: memref<36x144xf32, #tpu.memory_space<vmem>>) attributes {dimension_semantics = [], scalar_prefetch = 0 : i64, scratch_operands = 2 : i64, tpu.core_type = #tpu.core_type<tc>} {
    %cst = arith.constant 0.000000e+00 : f32
    %0 = vector.broadcast %cst : f32 to vector<40x80xf32>
    %c0 = arith.constant 0 : index
    %c0_0 = arith.constant 0 : index
    %1 = vector.load %arg10[%c0, %c0_0] : memref<40x80xf32, #tpu.memory_space<vmem>>, vector<40x80xf32>
    tpu.vector_store %arg10[%c0, %c0_0], %0 {strides = array<i32>} : memref<40x80xf32, #tpu.memory_space<vmem>>, vector<40x80xf32>,
    %c0_1 = arith.constant 0 : index
    %c0_2 = arith.constant 0 : index
    %2 = vector.load %arg0[%c0_1, %c0_2] : memref<32x64xf32, #tpu.memory_space<vmem>>, vector<16x64xf32>
    %c2 = arith.constant 2 : index
    %c8 = arith.constant 8 : index
    %3 = vector.load %arg10[%c2, %c8] : memref<40x80xf32, #tpu.memory_space<vmem>>, vector<16x64xf32>
    tpu.vector_store %arg10[%c2, %c8], %2 {strides = array<i32>} : memref<40x80xf32, #tpu.memory_space<vmem>>, vector<16x64xf32>,
    %c16 = arith.constant 16 : index
    %c0_3 = arith.constant 0 : index
    %4 = vector.load %arg0[%c16, %c0_3] : memref<32x64xf32, #tpu.memory_space<vmem>>, vector<16x64xf32>
    %c22 = arith.constant 22 : index
    %c8_4 = arith.constant 8 : index
    %5 = vector.load %arg10[%c22, %c8_4] : memref<40x80xf32, #tpu.memory_space<vmem>>, vector<16x64xf32>
    tpu.vector_store %arg10[%c22, %c8_4], %4 {strides = array<i32>} : memref<40x80xf32, #tpu.memory_space<vmem>>, vector<16x64xf32>,
    %c0_5 = arith.constant 0 : index
    %c0_6 = arith.constant 0 : index
    %6 = vector.load %arg2[%c0_5, %c0_6] : memref<1x128xf32, #tpu.memory_space<vmem>>, vector<1x128xf32>
    %cst_7 = arith.constant 0.000000e+00 : f32
    %7 = vector.broadcast %cst_7 : f32 to vector<16x128xf32>
    %c0_8 = arith.constant 0 : index
    %c0_9 = arith.constant 0 : index
    %8 = vector.load %arg10[%c0_8, %c0_9] : memref<40x80xf32, #tpu.memory_space<vmem>>, vector<16x80xf32>
    %c0_10 = arith.constant 0 : index
    %c0_11 = arith.constant 0 : index
    %c0_12 = arith.constant 0 : index
    %9 = vector.load %arg1[%c0_10, %c0_11, %c0_12] : memref<5x80x128xf32, #tpu.memory_space<vmem>>, vector<1x80x128xf32>
    %10 = vector.shape_cast %9 : vector<1x80x128xf32> to vector<80x128xf32>
    %cst_13 = arith.constant dense<0.000000e+00> : vector<16x128xf32>
    %11 = tpu.matmul %8, %10, %cst_13 {dimension_numbers = #tpu.dot_dimension_numbers<[1], [0], [0], [1], [0, 0, 1, 1], [], []>} : vector<16x80xf32>, vector<80x128xf32>, vector<16x128xf32> -> vector<16x128xf32>
    %12 = arith.addf %7, %11 : vector<16x128xf32>
    %c1 = arith.constant 1 : index
    %c0_14 = arith.constant 0 : index
    %13 = vector.load %arg10[%c1, %c0_14] : memref<40x80xf32, #tpu.memory_space<vmem>>, vector<16x80xf32>
    %c1_15 = arith.constant 1 : index
    %c0_16 = arith.constant 0 : index
    %c0_17 = arith.constant 0 : index
    %14 = vector.load %arg1[%c1_15, %c0_16, %c0_17] : memref<5x80x128xf32, #tpu.memory_space<vmem>>, vector<1x80x128xf32>
    %15 = vector.shape_cast %14 : vector<1x80x128xf32> to vector<80x128xf32>
    %cst_18 = arith.constant dense<0.000000e+00> : vector<16x128xf32>
    %16 = tpu.matmul %13, %15, %cst_18 {dimension_numbers = #tpu.dot_dimension_numbers<[1], [0], [0], [1], [0, 0, 1, 1], [], []>} : vector<16x80xf32>, vector<80x128xf32>, vector<16x128xf32> -> vector<16x128xf32>
    %17 = arith.addf %12, %16 : vector<16x128xf32>
    %c2_19 = arith.constant 2 : index
    %c0_20 = arith.constant 0 : index
    %18 = vector.load %arg10[%c2_19, %c0_20] : memref<40x80xf32, #tpu.memory_space<vmem>>, vector<16x80xf32>
    %c2_21 = arith.constant 2 : index
    %c0_22 = arith.constant 0 : index
    %c0_23 = arith.constant 0 : index
    %19 = vector.load %arg1[%c2_21, %c0_22, %c0_23] : memref<5x80x128xf32, #tpu.memory_space<vmem>>, vector<1x80x128xf32>
    %20 = vector.shape_cast %19 : vector<1x80x128xf32> to vector<80x128xf32>
    %cst_24 = arith.constant dense<0.000000e+00> : vector<16x128xf32>
    %21 = tpu.matmul %18, %20, %cst_24 {dimension_numbers = #tpu.dot_dimension_numbers<[1], [0], [0], [1], [0, 0, 1, 1], [], []>} : vector<16x80xf32>, vector<80x128xf32>, vector<16x128xf32> -> vector<16x128xf32>
    %22 = arith.addf %17, %21 : vector<16x128xf32>
    %c3 = arith.constant 3 : index
    %c0_25 = arith.constant 0 : index
    %23 = vector.load %arg10[%c3, %c0_25] : memref<40x80xf32, #tpu.memory_space<vmem>>, vector<16x80xf32>
    %c3_26 = arith.constant 3 : index
    %c0_27 = arith.constant 0 : index
    %c0_28 = arith.constant 0 : index
    %24 = vector.load %arg1[%c3_26, %c0_27, %c0_28] : memref<5x80x128xf32, #tpu.memory_space<vmem>>, vector<1x80x128xf32>
    %25 = vector.shape_cast %24 : vector<1x80x128xf32> to vector<80x128xf32>
    %cst_29 = arith.constant dense<0.000000e+00> : vector<16x128xf32>
    %26 = tpu.matmul %23, %25, %cst_29 {dimension_numbers = #tpu.dot_dimension_numbers<[1], [0], [0], [1], [0, 0, 1, 1], [], []>} : vector<16x80xf32>, vector<80x128xf32>, vector<16x128xf32> -> vector<16x128xf32>
    %27 = arith.addf %22, %26 : vector<16x128xf32>
    %c4 = arith.constant 4 : index
    %c0_30 = arith.constant 0 : index
    %28 = vector.load %arg10[%c4, %c0_30] : memref<40x80xf32, #tpu.memory_space<vmem>>, vector<16x80xf32>
    %c4_31 = arith.constant 4 : index
    %c0_32 = arith.constant 0 : index
    %c0_33 = arith.constant 0 : index
    %29 = vector.load %arg1[%c4_31, %c0_32, %c0_33] : memref<5x80x128xf32, #tpu.memory_space<vmem>>, vector<1x80x128xf32>
    %30 = vector.shape_cast %29 : vector<1x80x128xf32> to vector<80x128xf32>
    %cst_34 = arith.constant dense<0.000000e+00> : vector<16x128xf32>
    %31 = tpu.matmul %28, %30, %cst_34 {dimension_numbers = #tpu.dot_dimension_numbers<[1], [0], [0], [1], [0, 0, 1, 1], [], []>} : vector<16x80xf32>, vector<80x128xf32>, vector<16x128xf32> -> vector<16x128xf32>
    %32 = arith.addf %27, %31 : vector<16x128xf32>
    %33 = vector.broadcast %6 : vector<1x128xf32> to vector<16x128xf32>
    %34 = arith.addf %32, %33 : vector<16x128xf32>
    %cst_35 = arith.constant 0.000000e+00 : f32
    %35 = vector.broadcast %cst_35 : f32 to vector<16x128xf32>
    %c20 = arith.constant 20 : index
    %c0_36 = arith.constant 0 : index
    %36 = vector.load %arg10[%c20, %c0_36] : memref<40x80xf32, #tpu.memory_space<vmem>>, vector<16x80xf32>
    %c0_37 = arith.constant 0 : index
    %c0_38 = arith.constant 0 : index
    %c0_39 = arith.constant 0 : index
    %37 = vector.load %arg1[%c0_37, %c0_38, %c0_39] : memref<5x80x128xf32, #tpu.memory_space<vmem>>, vector<1x80x128xf32>
    %38 = vector.shape_cast %37 : vector<1x80x128xf32> to vector<80x128xf32>
    %cst_40 = arith.constant dense<0.000000e+00> : vector<16x128xf32>
    %39 = tpu.matmul %36, %38, %cst_40 {dimension_numbers = #tpu.dot_dimension_numbers<[1], [0], [0], [1], [0, 0, 1, 1], [], []>} : vector<16x80xf32>, vector<80x128xf32>, vector<16x128xf32> -> vector<16x128xf32>
    %40 = arith.addf %35, %39 : vector<16x128xf32>
    %c21 = arith.constant 21 : index
    %c0_41 = arith.constant 0 : index
    %41 = vector.load %arg10[%c21, %c0_41] : memref<40x80xf32, #tpu.memory_space<vmem>>, vector<16x80xf32>
    %c1_42 = arith.constant 1 : index
    %c0_43 = arith.constant 0 : index
    %c0_44 = arith.constant 0 : index
    %42 = vector.load %arg1[%c1_42, %c0_43, %c0_44] : memref<5x80x128xf32, #tpu.memory_space<vmem>>, vector<1x80x128xf32>
    %43 = vector.shape_cast %42 : vector<1x80x128xf32> to vector<80x128xf32>
    %cst_45 = arith.constant dense<0.000000e+00> : vector<16x128xf32>
    %44 = tpu.matmul %41, %43, %cst_45 {dimension_numbers = #tpu.dot_dimension_numbers<[1], [0], [0], [1], [0, 0, 1, 1], [], []>} : vector<16x80xf32>, vector<80x128xf32>, vector<16x128xf32> -> vector<16x128xf32>
    %45 = arith.addf %40, %44 : vector<16x128xf32>
    %c22_46 = arith.constant 22 : index
    %c0_47 = arith.constant 0 : index
    %46 = vector.load %arg10[%c22_46, %c0_47] : memref<40x80xf32, #tpu.memory_space<vmem>>, vector<16x80xf32>
    %c2_48 = arith.constant 2 : index
    %c0_49 = arith.constant 0 : index
    %c0_50 = arith.constant 0 : index
    %47 = vector.load %arg1[%c2_48, %c0_49, %c0_50] : memref<5x80x128xf32, #tpu.memory_space<vmem>>, vector<1x80x128xf32>
    %48 = vector.shape_cast %47 : vector<1x80x128xf32> to vector<80x128xf32>
    %cst_51 = arith.constant dense<0.000000e+00> : vector<16x128xf32>
    %49 = tpu.matmul %46, %48, %cst_51 {dimension_numbers = #tpu.dot_dimension_numbers<[1], [0], [0], [1], [0, 0, 1, 1], [], []>} : vector<16x80xf32>, vector<80x128xf32>, vector<16x128xf32> -> vector<16x128xf32>
    %50 = arith.addf %45, %49 : vector<16x128xf32>
    %c23 = arith.constant 23 : index
    %c0_52 = arith.constant 0 : index
    %51 = vector.load %arg10[%c23, %c0_52] : memref<40x80xf32, #tpu.memory_space<vmem>>, vector<16x80xf32>
    %c3_53 = arith.constant 3 : index
    %c0_54 = arith.constant 0 : index
    %c0_55 = arith.constant 0 : index
    %52 = vector.load %arg1[%c3_53, %c0_54, %c0_55] : memref<5x80x128xf32, #tpu.memory_space<vmem>>, vector<1x80x128xf32>
    %53 = vector.shape_cast %52 : vector<1x80x128xf32> to vector<80x128xf32>
    %cst_56 = arith.constant dense<0.000000e+00> : vector<16x128xf32>
    %54 = tpu.matmul %51, %53, %cst_56 {dimension_numbers = #tpu.dot_dimension_numbers<[1], [0], [0], [1], [0, 0, 1, 1], [], []>} : vector<16x80xf32>, vector<80x128xf32>, vector<16x128xf32> -> vector<16x128xf32>
    %55 = arith.addf %50, %54 : vector<16x128xf32>
    %c24 = arith.constant 24 : index
    %c0_57 = arith.constant 0 : index
    %56 = vector.load %arg10[%c24, %c0_57] : memref<40x80xf32, #tpu.memory_space<vmem>>, vector<16x80xf32>
    %c4_58 = arith.constant 4 : index
    %c0_59 = arith.constant 0 : index
    %c0_60 = arith.constant 0 : index
    %57 = vector.load %arg1[%c4_58, %c0_59, %c0_60] : memref<5x80x128xf32, #tpu.memory_space<vmem>>, vector<1x80x128xf32>
    %58 = vector.shape_cast %57 : vector<1x80x128xf32> to vector<80x128xf32>
    %cst_61 = arith.constant dense<0.000000e+00> : vector<16x128xf32>
    %59 = tpu.matmul %56, %58, %cst_61 {dimension_numbers = #tpu.dot_dimension_numbers<[1], [0], [0], [1], [0, 0, 1, 1], [], []>} : vector<16x80xf32>, vector<80x128xf32>, vector<16x128xf32> -> vector<16x128xf32>
    %60 = arith.addf %55, %59 : vector<16x128xf32>
    %61 = vector.broadcast %6 : vector<1x128xf32> to vector<16x128xf32>
    %62 = arith.addf %60, %61 : vector<16x128xf32>
    %63 = tpu.concatenate %34, %62 in 0 : vector<16x128xf32>, vector<16x128xf32> -> vector<32x128xf32>
    %c0_62 = arith.constant 0 : index
    %c0_63 = arith.constant 0 : index
    %64 = vector.load %arg5[%c0_62, %c0_63] : memref<128x8xf32, #tpu.memory_space<vmem>>, vector<128x8xf32>
    %c0_64 = arith.constant 0 : index
    %c0_65 = arith.constant 0 : index
    %65 = vector.load %arg6[%c0_64, %c0_65] : memref<8x128xf32, #tpu.memory_space<vmem>>, vector<8x128xf32>
    %cst_66 = arith.constant dense<0.000000e+00> : vector<128xf32>
    %66 = vector.multi_reduction <add>, %63, %cst_66 [0] : vector<32x128xf32> to vector<128xf32>
    %67 = vector.shape_cast %66 : vector<128xf32> to vector<1x128xf32>
    %cst_67 = arith.constant dense<0.000000e+00> : vector<1x8xf32>
    %68 = tpu.matmul %67, %64, %cst_67 {dimension_numbers = #tpu.dot_dimension_numbers<[1], [0], [0], [1], [0, 0, 1, 1], [], []>} : vector<1x128xf32>, vector<128x8xf32>, vector<1x8xf32> -> vector<1x8xf32>
    %cst_68 = arith.constant 5.120000e+02 : f32
    %69 = vector.broadcast %cst_68 : f32 to vector<1x8xf32>
    %70 = arith.divf %68, %69 : vector<1x8xf32>
    %cst_69 = arith.constant dense<0.000000e+00> : vector<1x128xf32>
    %71 = tpu.matmul %70, %65, %cst_69 {dimension_numbers = #tpu.dot_dimension_numbers<[1], [0], [0], [1], [0, 0, 1, 1], [], []>} : vector<1x8xf32>, vector<8x128xf32>, vector<1x128xf32> -> vector<1x128xf32>
    %72 = vector.broadcast %71 : vector<1x128xf32> to vector<32x128xf32>
    %73 = arith.subf %63, %72 : vector<32x128xf32>
    %74 = arith.mulf %73, %73 : vector<32x128xf32>
    %cst_70 = arith.constant dense<0.000000e+00> : vector<128xf32>
    %75 = vector.multi_reduction <add>, %74, %cst_70 [0] : vector<32x128xf32> to vector<128xf32>
    %76 = vector.shape_cast %75 : vector<128xf32> to vector<1x128xf32>
    %cst_71 = arith.constant dense<0.000000e+00> : vector<1x8xf32>
    %77 = tpu.matmul %76, %64, %cst_71 {dimension_numbers = #tpu.dot_dimension_numbers<[1], [0], [0], [1], [0, 0, 1, 1], [], []>} : vector<1x128xf32>, vector<128x8xf32>, vector<1x8xf32> -> vector<1x8xf32>
    %cst_72 = arith.constant 5.120000e+02 : f32
    %78 = vector.broadcast %cst_72 : f32 to vector<1x8xf32>
    %79 = arith.divf %77, %78 : vector<1x8xf32>
    %c0_73 = arith.constant 0 : index
    %c0_74 = arith.constant 0 : index
    %80 = vector.load %arg3[%c0_73, %c0_74] : memref<1x8xf32, #tpu.memory_space<vmem>>, vector<1x8xf32>
    %cst_75 = arith.constant 9.99999974E-6 : f32
    %81 = vector.broadcast %cst_75 : f32 to vector<1x8xf32>
    %82 = arith.addf %79, %81 : vector<1x8xf32>
    %83 = math.rsqrt %82 : vector<1x8xf32>
    %84 = arith.mulf %80, %83 : vector<1x8xf32>
    %c0_76 = arith.constant 0 : index
    %c0_77 = arith.constant 0 : index
    %85 = vector.load %arg4[%c0_76, %c0_77] : memref<1x8xf32, #tpu.memory_space<vmem>>, vector<1x8xf32>
    %86 = arith.mulf %70, %84 : vector<1x8xf32>
    %87 = arith.subf %85, %86 : vector<1x8xf32>
    %cst_78 = arith.constant dense<0.000000e+00> : vector<1x128xf32>
    %88 = tpu.matmul %84, %65, %cst_78 {dimension_numbers = #tpu.dot_dimension_numbers<[1], [0], [0], [1], [0, 0, 1, 1], [], []>} : vector<1x8xf32>, vector<8x128xf32>, vector<1x128xf32> -> vector<1x128xf32>
    %cst_79 = arith.constant dense<0.000000e+00> : vector<1x128xf32>
    %89 = tpu.matmul %87, %65, %cst_79 {dimension_numbers = #tpu.dot_dimension_numbers<[1], [0], [0], [1], [0, 0, 1, 1], [], []>} : vector<1x8xf32>, vector<8x128xf32>, vector<1x128xf32> -> vector<1x128xf32>
    %90 = vector.broadcast %88 : vector<1x128xf32> to vector<32x128xf32>
    %91 = arith.mulf %63, %90 : vector<32x128xf32>
    %92 = vector.broadcast %89 : vector<1x128xf32> to vector<32x128xf32>
    %93 = arith.addf %91, %92 : vector<32x128xf32>
    %94 = math.tanh %93 : vector<32x128xf32>
    %cst_80 = arith.constant 0.000000e+00 : f32
    %95 = vector.broadcast %cst_80 : f32 to vector<36x144xf32>
    %c0_81 = arith.constant 0 : index
    %c0_82 = arith.constant 0 : index
    %96 = vector.load %arg11[%c0_81, %c0_82] : memref<36x144xf32, #tpu.memory_space<vmem>>, vector<36x144xf32>
    tpu.vector_store %arg11[%c0_81, %c0_82], %95 {strides = array<i32>} : memref<36x144xf32, #tpu.memory_space<vmem>>, vector<36x144xf32>,
    %97 = vector.extract_strided_slice %94 {offsets = [0, 0], sizes = [16, 128], strides = [1, 1]} : vector<32x128xf32> to vector<16x128xf32>
    %c1_83 = arith.constant 1 : index
    %c8_84 = arith.constant 8 : index
    %98 = vector.load %arg11[%c1_83, %c8_84] : memref<36x144xf32, #tpu.memory_space<vmem>>, vector<16x128xf32>
    tpu.vector_store %arg11[%c1_83, %c8_84], %97 {strides = array<i32>} : memref<36x144xf32, #tpu.memory_space<vmem>>, vector<16x128xf32>,
    %99 = vector.extract_strided_slice %94 {offsets = [16, 0], sizes = [16, 128], strides = [1, 1]} : vector<32x128xf32> to vector<16x128xf32>
    %c19 = arith.constant 19 : index
    %c8_85 = arith.constant 8 : index
    %100 = vector.load %arg11[%c19, %c8_85] : memref<36x144xf32, #tpu.memory_space<vmem>>, vector<16x128xf32>
    tpu.vector_store %arg11[%c19, %c8_85], %99 {strides = array<i32>} : memref<36x144xf32, #tpu.memory_space<vmem>>, vector<16x128xf32>,
    %c0_86 = arith.constant 0 : index
    %c0_87 = arith.constant 0 : index
    %101 = vector.load %arg8[%c0_86, %c0_87] : memref<1x128xf32, #tpu.memory_space<vmem>>, vector<1x128xf32>
    %cst_88 = arith.constant 0.000000e+00 : f32
    %102 = vector.broadcast %cst_88 : f32 to vector<16x128xf32>
    %c0_89 = arith.constant 0 : index
    %c0_90 = arith.constant 0 : index
    %103 = vector.load %arg11[%c0_89, %c0_90] : memref<36x144xf32, #tpu.memory_space<vmem>>, vector<16x144xf32>
    %c0_91 = arith.constant 0 : index
    %c0_92 = arith.constant 0 : index
    %c0_93 = arith.constant 0 : index
    %104 = vector.load %arg7[%c0_91, %c0_92, %c0_93] : memref<3x144x128xf32, #tpu.memory_space<vmem>>, vector<1x144x128xf32>
    %105 = vector.shape_cast %104 : vector<1x144x128xf32> to vector<144x128xf32>
    %cst_94 = arith.constant dense<0.000000e+00> : vector<16x128xf32>
    %106 = tpu.matmul %103, %105, %cst_94 {dimension_numbers = #tpu.dot_dimension_numbers<[1], [0], [0], [1], [0, 0, 1, 1], [], []>} : vector<16x144xf32>, vector<144x128xf32>, vector<16x128xf32> -> vector<16x128xf32>
    %107 = arith.addf %102, %106 : vector<16x128xf32>
    %c1_95 = arith.constant 1 : index
    %c0_96 = arith.constant 0 : index
    %108 = vector.load %arg11[%c1_95, %c0_96] : memref<36x144xf32, #tpu.memory_space<vmem>>, vector<16x144xf32>
    %c1_97 = arith.constant 1 : index
    %c0_98 = arith.constant 0 : index
    %c0_99 = arith.constant 0 : index
    %109 = vector.load %arg7[%c1_97, %c0_98, %c0_99] : memref<3x144x128xf32, #tpu.memory_space<vmem>>, vector<1x144x128xf32>
    %110 = vector.shape_cast %109 : vector<1x144x128xf32> to vector<144x128xf32>
    %cst_100 = arith.constant dense<0.000000e+00> : vector<16x128xf32>
    %111 = tpu.matmul %108, %110, %cst_100 {dimension_numbers = #tpu.dot_dimension_numbers<[1], [0], [0], [1], [0, 0, 1, 1], [], []>} : vector<16x144xf32>, vector<144x128xf32>, vector<16x128xf32> -> vector<16x128xf32>
    %112 = arith.addf %107, %111 : vector<16x128xf32>
    %c2_101 = arith.constant 2 : index
    %c0_102 = arith.constant 0 : index
    %113 = vector.load %arg11[%c2_101, %c0_102] : memref<36x144xf32, #tpu.memory_space<vmem>>, vector<16x144xf32>
    %c2_103 = arith.constant 2 : index
    %c0_104 = arith.constant 0 : index
    %c0_105 = arith.constant 0 : index
    %114 = vector.load %arg7[%c2_103, %c0_104, %c0_105] : memref<3x144x128xf32, #tpu.memory_space<vmem>>, vector<1x144x128xf32>
    %115 = vector.shape_cast %114 : vector<1x144x128xf32> to vector<144x128xf32>
    %cst_106 = arith.constant dense<0.000000e+00> : vector<16x128xf32>
    %116 = tpu.matmul %113, %115, %cst_106 {dimension_numbers = #tpu.dot_dimension_numbers<[1], [0], [0], [1], [0, 0, 1, 1], [], []>} : vector<16x144xf32>, vector<144x128xf32>, vector<16x128xf32> -> vector<16x128xf32>
    %117 = arith.addf %112, %116 : vector<16x128xf32>
    %118 = vector.broadcast %101 : vector<1x128xf32> to vector<16x128xf32>
    %119 = arith.addf %117, %118 : vector<16x128xf32>
    %c0_107 = arith.constant 0 : index
    %c0_108 = arith.constant 0 : index
    %120 = vector.load %arg9[%c0_107, %c0_108] : memref<32x128xf32, #tpu.memory_space<vmem>>, vector<16x128xf32>
    tpu.vector_store %arg9[%c0_107, %c0_108], %119 {strides = array<i32>} : memref<32x128xf32, #tpu.memory_space<vmem>>, vector<16x128xf32>,
    %cst_109 = arith.constant 0.000000e+00 : f32
    %121 = vector.broadcast %cst_109 : f32 to vector<16x128xf32>
    %c18 = arith.constant 18 : index
    %c0_110 = arith.constant 0 : index
    %122 = vector.load %arg11[%c18, %c0_110] : memref<36x144xf32, #tpu.memory_space<vmem>>, vector<16x144xf32>
    %c0_111 = arith.constant 0 : index
    %c0_112 = arith.constant 0 : index
    %c0_113 = arith.constant 0 : index
    %123 = vector.load %arg7[%c0_111, %c0_112, %c0_113] : memref<3x144x128xf32, #tpu.memory_space<vmem>>, vector<1x144x128xf32>
    %124 = vector.shape_cast %123 : vector<1x144x128xf32> to vector<144x128xf32>
    %cst_114 = arith.constant dense<0.000000e+00> : vector<16x128xf32>
    %125 = tpu.matmul %122, %124, %cst_114 {dimension_numbers = #tpu.dot_dimension_numbers<[1], [0], [0], [1], [0, 0, 1, 1], [], []>} : vector<16x144xf32>, vector<144x128xf32>, vector<16x128xf32> -> vector<16x128xf32>
    %126 = arith.addf %121, %125 : vector<16x128xf32>
    %c19_115 = arith.constant 19 : index
    %c0_116 = arith.constant 0 : index
    %127 = vector.load %arg11[%c19_115, %c0_116] : memref<36x144xf32, #tpu.memory_space<vmem>>, vector<16x144xf32>
    %c1_117 = arith.constant 1 : index
    %c0_118 = arith.constant 0 : index
    %c0_119 = arith.constant 0 : index
    %128 = vector.load %arg7[%c1_117, %c0_118, %c0_119] : memref<3x144x128xf32, #tpu.memory_space<vmem>>, vector<1x144x128xf32>
    %129 = vector.shape_cast %128 : vector<1x144x128xf32> to vector<144x128xf32>
    %cst_120 = arith.constant dense<0.000000e+00> : vector<16x128xf32>
    %130 = tpu.matmul %127, %129, %cst_120 {dimension_numbers = #tpu.dot_dimension_numbers<[1], [0], [0], [1], [0, 0, 1, 1], [], []>} : vector<16x144xf32>, vector<144x128xf32>, vector<16x128xf32> -> vector<16x128xf32>
    %131 = arith.addf %126, %130 : vector<16x128xf32>
    %c20_121 = arith.constant 20 : index
    %c0_122 = arith.constant 0 : index
    %132 = vector.load %arg11[%c20_121, %c0_122] : memref<36x144xf32, #tpu.memory_space<vmem>>, vector<16x144xf32>
    %c2_123 = arith.constant 2 : index
    %c0_124 = arith.constant 0 : index
    %c0_125 = arith.constant 0 : index
    %133 = vector.load %arg7[%c2_123, %c0_124, %c0_125] : memref<3x144x128xf32, #tpu.memory_space<vmem>>, vector<1x144x128xf32>
    %134 = vector.shape_cast %133 : vector<1x144x128xf32> to vector<144x128xf32>
    %cst_126 = arith.constant dense<0.000000e+00> : vector<16x128xf32>
    %135 = tpu.matmul %132, %134, %cst_126 {dimension_numbers = #tpu.dot_dimension_numbers<[1], [0], [0], [1], [0, 0, 1, 1], [], []>} : vector<16x144xf32>, vector<144x128xf32>, vector<16x128xf32> -> vector<16x128xf32>
    %136 = arith.addf %131, %135 : vector<16x128xf32>
    %137 = vector.broadcast %101 : vector<1x128xf32> to vector<16x128xf32>
    %138 = arith.addf %136, %137 : vector<16x128xf32>
    %c16_127 = arith.constant 16 : index
    %c0_128 = arith.constant 0 : index
    %139 = vector.load %arg9[%c16_127, %c0_128] : memref<32x128xf32, #tpu.memory_space<vmem>>, vector<16x128xf32>
    tpu.vector_store %arg9[%c16_127, %c0_128], %138 {strides = array<i32>} : memref<32x128xf32, #tpu.memory_space<vmem>>, vector<16x128xf32>,
    return
  }
}

module attributes {stable_mosaic.version = 11 : i64} {
  func.func @_encode_query_kernel(%arg0: memref<2xi32, #tpu.memory_space<smem>>, %arg1: memref<16x16xf32, #tpu.memory_space<vmem>>, %arg2: memref<2x16x64xf32, #tpu.memory_space<vmem>>, %arg3: memref<16x128xf32, #tpu.memory_space<vmem>>, %arg4: memref<2x1x64xf32, #tpu.memory_space<vmem>>, %arg5: memref<2x32x64xf32, #tpu.memory_space<vmem>>, %arg6: memref<16x128xf32, #tpu.memory_space<vmem>>, %arg7: memref<2x1x64xf32, #tpu.memory_space<vmem>>, %arg8: memref<32x8xf32, #tpu.memory_space<vmem>>, %arg9: memref<1x8xf32, #tpu.memory_space<vmem>>, %arg10: memref<2x8xf32, #tpu.memory_space<vmem>>, %arg11: memref<16x32xf32, #tpu.memory_space<vmem>>, %arg12: memref<16x32xf32, #tpu.memory_space<vmem>>, %arg13: memref<32x64xf32, #tpu.memory_space<vmem>>) attributes {dimension_semantics = [], scalar_prefetch = 0 : i64, scratch_operands = 3 : i64, tpu.core_type = #tpu.core_type<tc>} {
    %c0 = arith.constant 0 : index
    %c0_0 = arith.constant 0 : index
    %0 = vector.load %arg1[%c0, %c0_0] : memref<16x16xf32, #tpu.memory_space<vmem>>, vector<16x16xf32>
    %c0_1 = arith.constant 0 : index
    %c0_2 = arith.constant 0 : index
    %c0_3 = arith.constant 0 : index
    %1 = vector.load %arg2[%c0_1, %c0_2, %c0_3] : memref<2x16x64xf32, #tpu.memory_space<vmem>>, vector<1x16x64xf32>
    %2 = vector.shape_cast %1 : vector<1x16x64xf32> to vector<16x64xf32>
    %cst = arith.constant dense<0.000000e+00> : vector<16x64xf32>
    %3 = tpu.matmul %0, %2, %cst {dimension_numbers = #tpu.dot_dimension_numbers<[1], [0], [0], [1], [0, 0, 1, 1], [], []>} : vector<16x16xf32>, vector<16x64xf32>, vector<16x64xf32> -> vector<16x64xf32>
    %c0_4 = arith.constant 0 : index
    %c0_5 = arith.constant 0 : index
    %c0_6 = arith.constant 0 : index
    %4 = vector.load %arg4[%c0_4, %c0_5, %c0_6] : memref<2x1x64xf32, #tpu.memory_space<vmem>>, vector<1x1x64xf32>
    %5 = vector.shape_cast %4 : vector<1x1x64xf32> to vector<1x64xf32>
    %6 = vector.broadcast %5 : vector<1x64xf32> to vector<16x64xf32>
    %7 = arith.addf %3, %6 : vector<16x64xf32>
    %8 = vector.extract_strided_slice %7 {offsets = [0, 0], sizes = [2, 64], strides = [1, 1]} : vector<16x64xf32> to vector<2x64xf32>
    %c0_7 = arith.constant 0 : index
    %c0_8 = arith.constant 0 : index
    %9 = vector.load %arg13[%c0_7, %c0_8] : memref<32x64xf32, #tpu.memory_space<vmem>>, vector<2x64xf32>
    tpu.vector_store %arg13[%c0_7, %c0_8], %8 {strides = array<i32>} : memref<32x64xf32, #tpu.memory_space<vmem>>, vector<2x64xf32>,
    %10 = vector.extract_strided_slice %7 {offsets = [2, 0], sizes = [2, 64], strides = [1, 1]} : vector<16x64xf32> to vector<2x64xf32>
    %c4 = arith.constant 4 : index
    %c0_9 = arith.constant 0 : index
    %11 = vector.load %arg13[%c4, %c0_9] : memref<32x64xf32, #tpu.memory_space<vmem>>, vector<2x64xf32>
    tpu.vector_store %arg13[%c4, %c0_9], %10 {strides = array<i32>} : memref<32x64xf32, #tpu.memory_space<vmem>>, vector<2x64xf32>,
    %12 = vector.extract_strided_slice %7 {offsets = [4, 0], sizes = [2, 64], strides = [1, 1]} : vector<16x64xf32> to vector<2x64xf32>
    %c8 = arith.constant 8 : index
    %c0_10 = arith.constant 0 : index
    %13 = vector.load %arg13[%c8, %c0_10] : memref<32x64xf32, #tpu.memory_space<vmem>>, vector<2x64xf32>
    tpu.vector_store %arg13[%c8, %c0_10], %12 {strides = array<i32>} : memref<32x64xf32, #tpu.memory_space<vmem>>, vector<2x64xf32>,
    %14 = vector.extract_strided_slice %7 {offsets = [6, 0], sizes = [2, 64], strides = [1, 1]} : vector<16x64xf32> to vector<2x64xf32>
    %c12 = arith.constant 12 : index
    %c0_11 = arith.constant 0 : index
    %15 = vector.load %arg13[%c12, %c0_11] : memref<32x64xf32, #tpu.memory_space<vmem>>, vector<2x64xf32>
    tpu.vector_store %arg13[%c12, %c0_11], %14 {strides = array<i32>} : memref<32x64xf32, #tpu.memory_space<vmem>>, vector<2x64xf32>,
    %16 = vector.extract_strided_slice %7 {offsets = [8, 0], sizes = [2, 64], strides = [1, 1]} : vector<16x64xf32> to vector<2x64xf32>
    %c16 = arith.constant 16 : index
    %c0_12 = arith.constant 0 : index
    %17 = vector.load %arg13[%c16, %c0_12] : memref<32x64xf32, #tpu.memory_space<vmem>>, vector<2x64xf32>
    tpu.vector_store %arg13[%c16, %c0_12], %16 {strides = array<i32>} : memref<32x64xf32, #tpu.memory_space<vmem>>, vector<2x64xf32>,
    %18 = vector.extract_strided_slice %7 {offsets = [10, 0], sizes = [2, 64], strides = [1, 1]} : vector<16x64xf32> to vector<2x64xf32>
    %c20 = arith.constant 20 : index
    %c0_13 = arith.constant 0 : index
    %19 = vector.load %arg13[%c20, %c0_13] : memref<32x64xf32, #tpu.memory_space<vmem>>, vector<2x64xf32>
    tpu.vector_store %arg13[%c20, %c0_13], %18 {strides = array<i32>} : memref<32x64xf32, #tpu.memory_space<vmem>>, vector<2x64xf32>,
    %20 = vector.extract_strided_slice %7 {offsets = [12, 0], sizes = [2, 64], strides = [1, 1]} : vector<16x64xf32> to vector<2x64xf32>
    %c24 = arith.constant 24 : index
    %c0_14 = arith.constant 0 : index
    %21 = vector.load %arg13[%c24, %c0_14] : memref<32x64xf32, #tpu.memory_space<vmem>>, vector<2x64xf32>
    tpu.vector_store %arg13[%c24, %c0_14], %20 {strides = array<i32>} : memref<32x64xf32, #tpu.memory_space<vmem>>, vector<2x64xf32>,
    %22 = vector.extract_strided_slice %7 {offsets = [14, 0], sizes = [2, 64], strides = [1, 1]} : vector<16x64xf32> to vector<2x64xf32>
    %c28 = arith.constant 28 : index
    %c0_15 = arith.constant 0 : index
    %23 = vector.load %arg13[%c28, %c0_15] : memref<32x64xf32, #tpu.memory_space<vmem>>, vector<2x64xf32>
    tpu.vector_store %arg13[%c28, %c0_15], %22 {strides = array<i32>} : memref<32x64xf32, #tpu.memory_space<vmem>>, vector<2x64xf32>,
    %c1 = arith.constant 1 : index
    %c0_16 = arith.constant 0 : index
    %c0_17 = arith.constant 0 : index
    %24 = vector.load %arg2[%c1, %c0_16, %c0_17] : memref<2x16x64xf32, #tpu.memory_space<vmem>>, vector<1x16x64xf32>
    %25 = vector.shape_cast %24 : vector<1x16x64xf32> to vector<16x64xf32>
    %cst_18 = arith.constant dense<0.000000e+00> : vector<16x64xf32>
    %26 = tpu.matmul %0, %25, %cst_18 {dimension_numbers = #tpu.dot_dimension_numbers<[1], [0], [0], [1], [0, 0, 1, 1], [], []>} : vector<16x16xf32>, vector<16x64xf32>, vector<16x64xf32> -> vector<16x64xf32>
    %c1_19 = arith.constant 1 : index
    %c0_20 = arith.constant 0 : index
    %c0_21 = arith.constant 0 : index
    %27 = vector.load %arg4[%c1_19, %c0_20, %c0_21] : memref<2x1x64xf32, #tpu.memory_space<vmem>>, vector<1x1x64xf32>
    %28 = vector.shape_cast %27 : vector<1x1x64xf32> to vector<1x64xf32>
    %29 = vector.broadcast %28 : vector<1x64xf32> to vector<16x64xf32>
    %30 = arith.addf %26, %29 : vector<16x64xf32>
    %31 = vector.extract_strided_slice %30 {offsets = [14, 0], sizes = [2, 64], strides = [1, 1]} : vector<16x64xf32> to vector<2x64xf32>
    %c2 = arith.constant 2 : index
    %c0_22 = arith.constant 0 : index
    %32 = vector.load %arg13[%c2, %c0_22] : memref<32x64xf32, #tpu.memory_space<vmem>>, vector<2x64xf32>
    tpu.vector_store %arg13[%c2, %c0_22], %31 {strides = array<i32>} : memref<32x64xf32, #tpu.memory_space<vmem>>, vector<2x64xf32>,
    %33 = vector.extract_strided_slice %30 {offsets = [12, 0], sizes = [2, 64], strides = [1, 1]} : vector<16x64xf32> to vector<2x64xf32>
    %c6 = arith.constant 6 : index
    %c0_23 = arith.constant 0 : index
    %34 = vector.load %arg13[%c6, %c0_23] : memref<32x64xf32, #tpu.memory_space<vmem>>, vector<2x64xf32>
    tpu.vector_store %arg13[%c6, %c0_23], %33 {strides = array<i32>} : memref<32x64xf32, #tpu.memory_space<vmem>>, vector<2x64xf32>,
    %35 = vector.extract_strided_slice %30 {offsets = [10, 0], sizes = [2, 64], strides = [1, 1]} : vector<16x64xf32> to vector<2x64xf32>
    %c10 = arith.constant 10 : index
    %c0_24 = arith.constant 0 : index
    %36 = vector.load %arg13[%c10, %c0_24] : memref<32x64xf32, #tpu.memory_space<vmem>>, vector<2x64xf32>
    tpu.vector_store %arg13[%c10, %c0_24], %35 {strides = array<i32>} : memref<32x64xf32, #tpu.memory_space<vmem>>, vector<2x64xf32>,
    %37 = vector.extract_strided_slice %30 {offsets = [8, 0], sizes = [2, 64], strides = [1, 1]} : vector<16x64xf32> to vector<2x64xf32>
    %c14 = arith.constant 14 : index
    %c0_25 = arith.constant 0 : index
    %38 = vector.load %arg13[%c14, %c0_25] : memref<32x64xf32, #tpu.memory_space<vmem>>, vector<2x64xf32>
    tpu.vector_store %arg13[%c14, %c0_25], %37 {strides = array<i32>} : memref<32x64xf32, #tpu.memory_space<vmem>>, vector<2x64xf32>,
    %39 = vector.extract_strided_slice %30 {offsets = [6, 0], sizes = [2, 64], strides = [1, 1]} : vector<16x64xf32> to vector<2x64xf32>
    %c18 = arith.constant 18 : index
    %c0_26 = arith.constant 0 : index
    %40 = vector.load %arg13[%c18, %c0_26] : memref<32x64xf32, #tpu.memory_space<vmem>>, vector<2x64xf32>
    tpu.vector_store %arg13[%c18, %c0_26], %39 {strides = array<i32>} : memref<32x64xf32, #tpu.memory_space<vmem>>, vector<2x64xf32>,
    %41 = vector.extract_strided_slice %30 {offsets = [4, 0], sizes = [2, 64], strides = [1, 1]} : vector<16x64xf32> to vector<2x64xf32>
    %c22 = arith.constant 22 : index
    %c0_27 = arith.constant 0 : index
    %42 = vector.load %arg13[%c22, %c0_27] : memref<32x64xf32, #tpu.memory_space<vmem>>, vector<2x64xf32>
    tpu.vector_store %arg13[%c22, %c0_27], %41 {strides = array<i32>} : memref<32x64xf32, #tpu.memory_space<vmem>>, vector<2x64xf32>,
    %43 = vector.extract_strided_slice %30 {offsets = [2, 0], sizes = [2, 64], strides = [1, 1]} : vector<16x64xf32> to vector<2x64xf32>
    %c26 = arith.constant 26 : index
    %c0_28 = arith.constant 0 : index
    %44 = vector.load %arg13[%c26, %c0_28] : memref<32x64xf32, #tpu.memory_space<vmem>>, vector<2x64xf32>
    tpu.vector_store %arg13[%c26, %c0_28], %43 {strides = array<i32>} : memref<32x64xf32, #tpu.memory_space<vmem>>, vector<2x64xf32>,
    %45 = vector.extract_strided_slice %30 {offsets = [0, 0], sizes = [2, 64], strides = [1, 1]} : vector<16x64xf32> to vector<2x64xf32>
    %c30 = arith.constant 30 : index
    %c0_29 = arith.constant 0 : index
    %46 = vector.load %arg13[%c30, %c0_29] : memref<32x64xf32, #tpu.memory_space<vmem>>, vector<2x64xf32>
    tpu.vector_store %arg13[%c30, %c0_29], %45 {strides = array<i32>} : memref<32x64xf32, #tpu.memory_space<vmem>>, vector<2x64xf32>,
    %c0_30 = arith.constant 0 : index
    %c0_31 = arith.constant 0 : index
    %47 = vector.load %arg3[%c0_30, %c0_31] : memref<16x128xf32, #tpu.memory_space<vmem>>, vector<16x128xf32>
    %48 = tpu.iota {dimensions = array<i32: 0>} : vector<4x64xi32>
    %c2_i32 = arith.constant 2 : i32
    %49 = vector.broadcast %c2_i32 : i32 to vector<4x64xi32>
    %50 = arith.cmpi slt, %48, %49 : vector<4x64xi32>
    %cst_32 = arith.constant 0.000000e+00 : f32
    %51 = vector.broadcast %cst_32 : f32 to vector<4x16xf32>
    %cst_33 = arith.constant 0.000000e+00 : f32
    %52 = vector.broadcast %cst_33 : f32 to vector<4x16xf32>
    %c0_i32 = arith.constant 0 : i32
    %cst_34 = arith.constant dense<0.000000e+00> : vector<4x128xf32>
    %53 = tpu.matmul %51, %47, %cst_34 {dimension_numbers = #tpu.dot_dimension_numbers<[1], [0], [0], [1], [0, 0, 1, 1], [], []>} : vector<4x16xf32>, vector<16x128xf32>, vector<4x128xf32> -> vector<4x128xf32>
    %54 = vector.extract_strided_slice %53 {offsets = [0, 0], sizes = [4, 64], strides = [1, 1]} : vector<4x128xf32> to vector<4x64xf32>
    %55 = vector.extract_strided_slice %53 {offsets = [0, 64], sizes = [4, 64], strides = [1, 1]} : vector<4x128xf32> to vector<4x64xf32>
    %56 = arith.select %50, %54, %55 : vector<4x64xi1>, vector<4x64xf32>
    %c4_i32 = arith.constant 4 : i32
    %57 = arith.muli %c0_i32, %c4_i32 : i32
    %58 = arith.index_cast %57 : i32 to index
    %c0_35 = arith.constant 0 : index
    %59 = vector.load %arg13[%58, %c0_35] : memref<32x64xf32, #tpu.memory_space<vmem>>, vector<4x64xf32>
    %60 = arith.addf %59, %56 : vector<4x64xf32>
    %61 = vector.extract_strided_slice %60 {offsets = [0, 0], sizes = [4, 16], strides = [1, 1]} : vector<4x64xf32> to vector<4x16xf32>
    %62 = arith.negf %61 : vector<4x16xf32>
    %63 = math.exp %62 : vector<4x16xf32>
    %cst_36 = arith.constant 1.000000e+00 : f32
    %64 = vector.broadcast %cst_36 : f32 to vector<4x16xf32>
    %65 = arith.addf %64, %63 : vector<4x16xf32>
    %66 = arith.divf %64, %65 : vector<4x16xf32>
    %67 = vector.extract_strided_slice %60 {offsets = [0, 16], sizes = [4, 16], strides = [1, 1]} : vector<4x64xf32> to vector<4x16xf32>
    %68 = arith.negf %67 : vector<4x16xf32>
    %69 = math.exp %68 : vector<4x16xf32>
    %cst_37 = arith.constant 1.000000e+00 : f32
    %70 = vector.broadcast %cst_37 : f32 to vector<4x16xf32>
    %71 = arith.addf %70, %69 : vector<4x16xf32>
    %72 = arith.divf %70, %71 : vector<4x16xf32>
    %73 = vector.extract_strided_slice %60 {offsets = [0, 32], sizes = [4, 16], strides = [1, 1]} : vector<4x64xf32> to vector<4x16xf32>
    %74 = math.tanh %73 : vector<4x16xf32>
    %75 = vector.extract_strided_slice %60 {offsets = [0, 48], sizes = [4, 16], strides = [1, 1]} : vector<4x64xf32> to vector<4x16xf32>
    %76 = arith.negf %75 : vector<4x16xf32>
    %77 = math.exp %76 : vector<4x16xf32>
    %cst_38 = arith.constant 1.000000e+00 : f32
    %78 = vector.broadcast %cst_38 : f32 to vector<4x16xf32>
    %79 = arith.addf %78, %77 : vector<4x16xf32>
    %80 = arith.divf %78, %79 : vector<4x16xf32>
    %81 = arith.mulf %72, %52 : vector<4x16xf32>
    %82 = arith.mulf %66, %74 : vector<4x16xf32>
    %83 = arith.addf %81, %82 : vector<4x16xf32>
    %84 = math.tanh %83 : vector<4x16xf32>
    %85 = arith.mulf %80, %84 : vector<4x16xf32>
    %86 = vector.extract_strided_slice %85 {offsets = [0, 0], sizes = [2, 16], strides = [1, 1]} : vector<4x16xf32> to vector<2x16xf32>
    %c2_i32_39 = arith.constant 2 : i32
    %87 = arith.muli %c0_i32, %c2_i32_39 : i32
    %88 = arith.index_cast %87 : i32 to index
    %c0_40 = arith.constant 0 : index
    %89 = vector.load %arg11[%88, %c0_40] : memref<16x32xf32, #tpu.memory_space<vmem>>, vector<2x16xf32>
    tpu.vector_store %arg11[%88, %c0_40], %86 {strides = array<i32>} : memref<16x32xf32, #tpu.memory_space<vmem>>, vector<2x16xf32>,
    %90 = vector.extract_strided_slice %85 {offsets = [2, 0], sizes = [2, 16], strides = [1, 1]} : vector<4x16xf32> to vector<2x16xf32>
    %c7_i32 = arith.constant 7 : i32
    %91 = arith.subi %c7_i32, %c0_i32 : i32
    %c2_i32_41 = arith.constant 2 : i32
    %92 = arith.muli %91, %c2_i32_41 : i32
    %93 = arith.index_cast %92 : i32 to index
    %c16_42 = arith.constant 16 : index
    %94 = vector.load %arg11[%93, %c16_42] : memref<16x32xf32, #tpu.memory_space<vmem>>, vector<2x16xf32>
    tpu.vector_store %arg11[%93, %c16_42], %90 {strides = array<i32>} : memref<16x32xf32, #tpu.memory_space<vmem>>, vector<2x16xf32>,
    %c1_i32 = arith.constant 1 : i32
    %cst_43 = arith.constant dense<0.000000e+00> : vector<4x128xf32>
    %95 = tpu.matmul %85, %47, %cst_43 {dimension_numbers = #tpu.dot_dimension_numbers<[1], [0], [0], [1], [0, 0, 1, 1], [], []>} : vector<4x16xf32>, vector<16x128xf32>, vector<4x128xf32> -> vector<4x128xf32>
    %96 = vector.extract_strided_slice %95 {offsets = [0, 0], sizes = [4, 64], strides = [1, 1]} : vector<4x128xf32> to vector<4x64xf32>
    %97 = vector.extract_strided_slice %95 {offsets = [0, 64], sizes = [4, 64], strides = [1, 1]} : vector<4x128xf32> to vector<4x64xf32>
    %98 = arith.select %50, %96, %97 : vector<4x64xi1>, vector<4x64xf32>
    %c4_i32_44 = arith.constant 4 : i32
    %99 = arith.muli %c1_i32, %c4_i32_44 : i32
    %100 = arith.index_cast %99 : i32 to index
    %c0_45 = arith.constant 0 : index
    %101 = vector.load %arg13[%100, %c0_45] : memref<32x64xf32, #tpu.memory_space<vmem>>, vector<4x64xf32>
    %102 = arith.addf %101, %98 : vector<4x64xf32>
    %103 = vector.extract_strided_slice %102 {offsets = [0, 0], sizes = [4, 16], strides = [1, 1]} : vector<4x64xf32> to vector<4x16xf32>
    %104 = arith.negf %103 : vector<4x16xf32>
    %105 = math.exp %104 : vector<4x16xf32>
    %cst_46 = arith.constant 1.000000e+00 : f32
    %106 = vector.broadcast %cst_46 : f32 to vector<4x16xf32>
    %107 = arith.addf %106, %105 : vector<4x16xf32>
    %108 = arith.divf %106, %107 : vector<4x16xf32>
    %109 = vector.extract_strided_slice %102 {offsets = [0, 16], sizes = [4, 16], strides = [1, 1]} : vector<4x64xf32> to vector<4x16xf32>
    %110 = arith.negf %109 : vector<4x16xf32>
    %111 = math.exp %110 : vector<4x16xf32>
    %cst_47 = arith.constant 1.000000e+00 : f32
    %112 = vector.broadcast %cst_47 : f32 to vector<4x16xf32>
    %113 = arith.addf %112, %111 : vector<4x16xf32>
    %114 = arith.divf %112, %113 : vector<4x16xf32>
    %115 = vector.extract_strided_slice %102 {offsets = [0, 32], sizes = [4, 16], strides = [1, 1]} : vector<4x64xf32> to vector<4x16xf32>
    %116 = math.tanh %115 : vector<4x16xf32>
    %117 = vector.extract_strided_slice %102 {offsets = [0, 48], sizes = [4, 16], strides = [1, 1]} : vector<4x64xf32> to vector<4x16xf32>
    %118 = arith.negf %117 : vector<4x16xf32>
    %119 = math.exp %118 : vector<4x16xf32>
    %cst_48 = arith.constant 1.000000e+00 : f32
    %120 = vector.broadcast %cst_48 : f32 to vector<4x16xf32>
    %121 = arith.addf %120, %119 : vector<4x16xf32>
    %122 = arith.divf %120, %121 : vector<4x16xf32>
    %123 = arith.mulf %114, %83 : vector<4x16xf32>
    %124 = arith.mulf %108, %116 : vector<4x16xf32>
    %125 = arith.addf %123, %124 : vector<4x16xf32>
    %126 = math.tanh %125 : vector<4x16xf32>
    %127 = arith.mulf %122, %126 : vector<4x16xf32>
    %128 = vector.extract_strided_slice %127 {offsets = [0, 0], sizes = [2, 16], strides = [1, 1]} : vector<4x16xf32> to vector<2x16xf32>
    %c2_i32_49 = arith.constant 2 : i32
    %129 = arith.muli %c1_i32, %c2_i32_49 : i32
    %130 = arith.index_cast %129 : i32 to index
    %c0_50 = arith.constant 0 : index
    %131 = vector.load %arg11[%130, %c0_50] : memref<16x32xf32, #tpu.memory_space<vmem>>, vector<2x16xf32>
    tpu.vector_store %arg11[%130, %c0_50], %128 {strides = array<i32>} : memref<16x32xf32, #tpu.memory_space<vmem>>, vector<2x16xf32>,
    %132 = vector.extract_strided_slice %127 {offsets = [2, 0], sizes = [2, 16], strides = [1, 1]} : vector<4x16xf32> to vector<2x16xf32>
    %c7_i32_51 = arith.constant 7 : i32
    %133 = arith.subi %c7_i32_51, %c1_i32 : i32
    %c2_i32_52 = arith.constant 2 : i32
    %134 = arith.muli %133, %c2_i32_52 : i32
    %135 = arith.index_cast %134 : i32 to index
    %c16_53 = arith.constant 16 : index
    %136 = vector.load %arg11[%135, %c16_53] : memref<16x32xf32, #tpu.memory_space<vmem>>, vector<2x16xf32>
    tpu.vector_store %arg11[%135, %c16_53], %132 {strides = array<i32>} : memref<16x32xf32, #tpu.memory_space<vmem>>, vector<2x16xf32>,
    %c2_i32_54 = arith.constant 2 : i32
    %cst_55 = arith.constant dense<0.000000e+00> : vector<4x128xf32>
    %137 = tpu.matmul %127, %47, %cst_55 {dimension_numbers = #tpu.dot_dimension_numbers<[1], [0], [0], [1], [0, 0, 1, 1], [], []>} : vector<4x16xf32>, vector<16x128xf32>, vector<4x128xf32> -> vector<4x128xf32>
    %138 = vector.extract_strided_slice %137 {offsets = [0, 0], sizes = [4, 64], strides = [1, 1]} : vector<4x128xf32> to vector<4x64xf32>
    %139 = vector.extract_strided_slice %137 {offsets = [0, 64], sizes = [4, 64], strides = [1, 1]} : vector<4x128xf32> to vector<4x64xf32>
    %140 = arith.select %50, %138, %139 : vector<4x64xi1>, vector<4x64xf32>
    %c4_i32_56 = arith.constant 4 : i32
    %141 = arith.muli %c2_i32_54, %c4_i32_56 : i32
    %142 = arith.index_cast %141 : i32 to index
    %c0_57 = arith.constant 0 : index
    %143 = vector.load %arg13[%142, %c0_57] : memref<32x64xf32, #tpu.memory_space<vmem>>, vector<4x64xf32>
    %144 = arith.addf %143, %140 : vector<4x64xf32>
    %145 = vector.extract_strided_slice %144 {offsets = [0, 0], sizes = [4, 16], strides = [1, 1]} : vector<4x64xf32> to vector<4x16xf32>
    %146 = arith.negf %145 : vector<4x16xf32>
    %147 = math.exp %146 : vector<4x16xf32>
    %cst_58 = arith.constant 1.000000e+00 : f32
    %148 = vector.broadcast %cst_58 : f32 to vector<4x16xf32>
    %149 = arith.addf %148, %147 : vector<4x16xf32>
    %150 = arith.divf %148, %149 : vector<4x16xf32>
    %151 = vector.extract_strided_slice %144 {offsets = [0, 16], sizes = [4, 16], strides = [1, 1]} : vector<4x64xf32> to vector<4x16xf32>
    %152 = arith.negf %151 : vector<4x16xf32>
    %153 = math.exp %152 : vector<4x16xf32>
    %cst_59 = arith.constant 1.000000e+00 : f32
    %154 = vector.broadcast %cst_59 : f32 to vector<4x16xf32>
    %155 = arith.addf %154, %153 : vector<4x16xf32>
    %156 = arith.divf %154, %155 : vector<4x16xf32>
    %157 = vector.extract_strided_slice %144 {offsets = [0, 32], sizes = [4, 16], strides = [1, 1]} : vector<4x64xf32> to vector<4x16xf32>
    %158 = math.tanh %157 : vector<4x16xf32>
    %159 = vector.extract_strided_slice %144 {offsets = [0, 48], sizes = [4, 16], strides = [1, 1]} : vector<4x64xf32> to vector<4x16xf32>
    %160 = arith.negf %159 : vector<4x16xf32>
    %161 = math.exp %160 : vector<4x16xf32>
    %cst_60 = arith.constant 1.000000e+00 : f32
    %162 = vector.broadcast %cst_60 : f32 to vector<4x16xf32>
    %163 = arith.addf %162, %161 : vector<4x16xf32>
    %164 = arith.divf %162, %163 : vector<4x16xf32>
    %165 = arith.mulf %156, %125 : vector<4x16xf32>
    %166 = arith.mulf %150, %158 : vector<4x16xf32>
    %167 = arith.addf %165, %166 : vector<4x16xf32>
    %168 = math.tanh %167 : vector<4x16xf32>
    %169 = arith.mulf %164, %168 : vector<4x16xf32>
    %170 = vector.extract_strided_slice %169 {offsets = [0, 0], sizes = [2, 16], strides = [1, 1]} : vector<4x16xf32> to vector<2x16xf32>
    %c2_i32_61 = arith.constant 2 : i32
    %171 = arith.muli %c2_i32_54, %c2_i32_61 : i32
    %172 = arith.index_cast %171 : i32 to index
    %c0_62 = arith.constant 0 : index
    %173 = vector.load %arg11[%172, %c0_62] : memref<16x32xf32, #tpu.memory_space<vmem>>, vector<2x16xf32>
    tpu.vector_store %arg11[%172, %c0_62], %170 {strides = array<i32>} : memref<16x32xf32, #tpu.memory_space<vmem>>, vector<2x16xf32>,
    %174 = vector.extract_strided_slice %169 {offsets = [2, 0], sizes = [2, 16], strides = [1, 1]} : vector<4x16xf32> to vector<2x16xf32>
    %c7_i32_63 = arith.constant 7 : i32
    %175 = arith.subi %c7_i32_63, %c2_i32_54 : i32
    %c2_i32_64 = arith.constant 2 : i32
    %176 = arith.muli %175, %c2_i32_64 : i32
    %177 = arith.index_cast %176 : i32 to index
    %c16_65 = arith.constant 16 : index
    %178 = vector.load %arg11[%177, %c16_65] : memref<16x32xf32, #tpu.memory_space<vmem>>, vector<2x16xf32>
    tpu.vector_store %arg11[%177, %c16_65], %174 {strides = array<i32>} : memref<16x32xf32, #tpu.memory_space<vmem>>, vector<2x16xf32>,
    %c3_i32 = arith.constant 3 : i32
    %cst_66 = arith.constant dense<0.000000e+00> : vector<4x128xf32>
    %179 = tpu.matmul %169, %47, %cst_66 {dimension_numbers = #tpu.dot_dimension_numbers<[1], [0], [0], [1], [0, 0, 1, 1], [], []>} : vector<4x16xf32>, vector<16x128xf32>, vector<4x128xf32> -> vector<4x128xf32>
    %180 = vector.extract_strided_slice %179 {offsets = [0, 0], sizes = [4, 64], strides = [1, 1]} : vector<4x128xf32> to vector<4x64xf32>
    %181 = vector.extract_strided_slice %179 {offsets = [0, 64], sizes = [4, 64], strides = [1, 1]} : vector<4x128xf32> to vector<4x64xf32>
    %182 = arith.select %50, %180, %181 : vector<4x64xi1>, vector<4x64xf32>
    %c4_i32_67 = arith.constant 4 : i32
    %183 = arith.muli %c3_i32, %c4_i32_67 : i32
    %184 = arith.index_cast %183 : i32 to index
    %c0_68 = arith.constant 0 : index
    %185 = vector.load %arg13[%184, %c0_68] : memref<32x64xf32, #tpu.memory_space<vmem>>, vector<4x64xf32>
    %186 = arith.addf %185, %182 : vector<4x64xf32>
    %187 = vector.extract_strided_slice %186 {offsets = [0, 0], sizes = [4, 16], strides = [1, 1]} : vector<4x64xf32> to vector<4x16xf32>
    %188 = arith.negf %187 : vector<4x16xf32>
    %189 = math.exp %188 : vector<4x16xf32>
    %cst_69 = arith.constant 1.000000e+00 : f32
    %190 = vector.broadcast %cst_69 : f32 to vector<4x16xf32>
    %191 = arith.addf %190, %189 : vector<4x16xf32>
    %192 = arith.divf %190, %191 : vector<4x16xf32>
    %193 = vector.extract_strided_slice %186 {offsets = [0, 16], sizes = [4, 16], strides = [1, 1]} : vector<4x64xf32> to vector<4x16xf32>
    %194 = arith.negf %193 : vector<4x16xf32>
    %195 = math.exp %194 : vector<4x16xf32>
    %cst_70 = arith.constant 1.000000e+00 : f32
    %196 = vector.broadcast %cst_70 : f32 to vector<4x16xf32>
    %197 = arith.addf %196, %195 : vector<4x16xf32>
    %198 = arith.divf %196, %197 : vector<4x16xf32>
    %199 = vector.extract_strided_slice %186 {offsets = [0, 32], sizes = [4, 16], strides = [1, 1]} : vector<4x64xf32> to vector<4x16xf32>
    %200 = math.tanh %199 : vector<4x16xf32>
    %201 = vector.extract_strided_slice %186 {offsets = [0, 48], sizes = [4, 16], strides = [1, 1]} : vector<4x64xf32> to vector<4x16xf32>
    %202 = arith.negf %201 : vector<4x16xf32>
    %203 = math.exp %202 : vector<4x16xf32>
    %cst_71 = arith.constant 1.000000e+00 : f32
    %204 = vector.broadcast %cst_71 : f32 to vector<4x16xf32>
    %205 = arith.addf %204, %203 : vector<4x16xf32>
    %206 = arith.divf %204, %205 : vector<4x16xf32>
    %207 = arith.mulf %198, %167 : vector<4x16xf32>
    %208 = arith.mulf %192, %200 : vector<4x16xf32>
    %209 = arith.addf %207, %208 : vector<4x16xf32>
    %210 = math.tanh %209 : vector<4x16xf32>
    %211 = arith.mulf %206, %210 : vector<4x16xf32>
    %212 = vector.extract_strided_slice %211 {offsets = [0, 0], sizes = [2, 16], strides = [1, 1]} : vector<4x16xf32> to vector<2x16xf32>
    %c2_i32_72 = arith.constant 2 : i32
    %213 = arith.muli %c3_i32, %c2_i32_72 : i32
    %214 = arith.index_cast %213 : i32 to index
    %c0_73 = arith.constant 0 : index
    %215 = vector.load %arg11[%214, %c0_73] : memref<16x32xf32, #tpu.memory_space<vmem>>, vector<2x16xf32>
    tpu.vector_store %arg11[%214, %c0_73], %212 {strides = array<i32>} : memref<16x32xf32, #tpu.memory_space<vmem>>, vector<2x16xf32>,
    %216 = vector.extract_strided_slice %211 {offsets = [2, 0], sizes = [2, 16], strides = [1, 1]} : vector<4x16xf32> to vector<2x16xf32>
    %c7_i32_74 = arith.constant 7 : i32
    %217 = arith.subi %c7_i32_74, %c3_i32 : i32
    %c2_i32_75 = arith.constant 2 : i32
    %218 = arith.muli %217, %c2_i32_75 : i32
    %219 = arith.index_cast %218 : i32 to index
    %c16_76 = arith.constant 16 : index
    %220 = vector.load %arg11[%219, %c16_76] : memref<16x32xf32, #tpu.memory_space<vmem>>, vector<2x16xf32>
    tpu.vector_store %arg11[%219, %c16_76], %216 {strides = array<i32>} : memref<16x32xf32, #tpu.memory_space<vmem>>, vector<2x16xf32>,
    %c4_i32_77 = arith.constant 4 : i32
    %cst_78 = arith.constant dense<0.000000e+00> : vector<4x128xf32>
    %221 = tpu.matmul %211, %47, %cst_78 {dimension_numbers = #tpu.dot_dimension_numbers<[1], [0], [0], [1], [0, 0, 1, 1], [], []>} : vector<4x16xf32>, vector<16x128xf32>, vector<4x128xf32> -> vector<4x128xf32>
    %222 = vector.extract_strided_slice %221 {offsets = [0, 0], sizes = [4, 64], strides = [1, 1]} : vector<4x128xf32> to vector<4x64xf32>
    %223 = vector.extract_strided_slice %221 {offsets = [0, 64], sizes = [4, 64], strides = [1, 1]} : vector<4x128xf32> to vector<4x64xf32>
    %224 = arith.select %50, %222, %223 : vector<4x64xi1>, vector<4x64xf32>
    %c4_i32_79 = arith.constant 4 : i32
    %225 = arith.muli %c4_i32_77, %c4_i32_79 : i32
    %226 = arith.index_cast %225 : i32 to index
    %c0_80 = arith.constant 0 : index
    %227 = vector.load %arg13[%226, %c0_80] : memref<32x64xf32, #tpu.memory_space<vmem>>, vector<4x64xf32>
    %228 = arith.addf %227, %224 : vector<4x64xf32>
    %229 = vector.extract_strided_slice %228 {offsets = [0, 0], sizes = [4, 16], strides = [1, 1]} : vector<4x64xf32> to vector<4x16xf32>
    %230 = arith.negf %229 : vector<4x16xf32>
    %231 = math.exp %230 : vector<4x16xf32>
    %cst_81 = arith.constant 1.000000e+00 : f32
    %232 = vector.broadcast %cst_81 : f32 to vector<4x16xf32>
    %233 = arith.addf %232, %231 : vector<4x16xf32>
    %234 = arith.divf %232, %233 : vector<4x16xf32>
    %235 = vector.extract_strided_slice %228 {offsets = [0, 16], sizes = [4, 16], strides = [1, 1]} : vector<4x64xf32> to vector<4x16xf32>
    %236 = arith.negf %235 : vector<4x16xf32>
    %237 = math.exp %236 : vector<4x16xf32>
    %cst_82 = arith.constant 1.000000e+00 : f32
    %238 = vector.broadcast %cst_82 : f32 to vector<4x16xf32>
    %239 = arith.addf %238, %237 : vector<4x16xf32>
    %240 = arith.divf %238, %239 : vector<4x16xf32>
    %241 = vector.extract_strided_slice %228 {offsets = [0, 32], sizes = [4, 16], strides = [1, 1]} : vector<4x64xf32> to vector<4x16xf32>
    %242 = math.tanh %241 : vector<4x16xf32>
    %243 = vector.extract_strided_slice %228 {offsets = [0, 48], sizes = [4, 16], strides = [1, 1]} : vector<4x64xf32> to vector<4x16xf32>
    %244 = arith.negf %243 : vector<4x16xf32>
    %245 = math.exp %244 : vector<4x16xf32>
    %cst_83 = arith.constant 1.000000e+00 : f32
    %246 = vector.broadcast %cst_83 : f32 to vector<4x16xf32>
    %247 = arith.addf %246, %245 : vector<4x16xf32>
    %248 = arith.divf %246, %247 : vector<4x16xf32>
    %249 = arith.mulf %240, %209 : vector<4x16xf32>
    %250 = arith.mulf %234, %242 : vector<4x16xf32>
    %251 = arith.addf %249, %250 : vector<4x16xf32>
    %252 = math.tanh %251 : vector<4x16xf32>
    %253 = arith.mulf %248, %252 : vector<4x16xf32>
    %254 = vector.extract_strided_slice %253 {offsets = [0, 0], sizes = [2, 16], strides = [1, 1]} : vector<4x16xf32> to vector<2x16xf32>
    %c2_i32_84 = arith.constant 2 : i32
    %255 = arith.muli %c4_i32_77, %c2_i32_84 : i32
    %256 = arith.index_cast %255 : i32 to index
    %c0_85 = arith.constant 0 : index
    %257 = vector.load %arg11[%256, %c0_85] : memref<16x32xf32, #tpu.memory_space<vmem>>, vector<2x16xf32>
    tpu.vector_store %arg11[%256, %c0_85], %254 {strides = array<i32>} : memref<16x32xf32, #tpu.memory_space<vmem>>, vector<2x16xf32>,
    %258 = vector.extract_strided_slice %253 {offsets = [2, 0], sizes = [2, 16], strides = [1, 1]} : vector<4x16xf32> to vector<2x16xf32>
    %c7_i32_86 = arith.constant 7 : i32
    %259 = arith.subi %c7_i32_86, %c4_i32_77 : i32
    %c2_i32_87 = arith.constant 2 : i32
    %260 = arith.muli %259, %c2_i32_87 : i32
    %261 = arith.index_cast %260 : i32 to index
    %c16_88 = arith.constant 16 : index
    %262 = vector.load %arg11[%261, %c16_88] : memref<16x32xf32, #tpu.memory_space<vmem>>, vector<2x16xf32>
    tpu.vector_store %arg11[%261, %c16_88], %258 {strides = array<i32>} : memref<16x32xf32, #tpu.memory_space<vmem>>, vector<2x16xf32>,
    %c5_i32 = arith.constant 5 : i32
    %cst_89 = arith.constant dense<0.000000e+00> : vector<4x128xf32>
    %263 = tpu.matmul %253, %47, %cst_89 {dimension_numbers = #tpu.dot_dimension_numbers<[1], [0], [0], [1], [0, 0, 1, 1], [], []>} : vector<4x16xf32>, vector<16x128xf32>, vector<4x128xf32> -> vector<4x128xf32>
    %264 = vector.extract_strided_slice %263 {offsets = [0, 0], sizes = [4, 64], strides = [1, 1]} : vector<4x128xf32> to vector<4x64xf32>
    %265 = vector.extract_strided_slice %263 {offsets = [0, 64], sizes = [4, 64], strides = [1, 1]} : vector<4x128xf32> to vector<4x64xf32>
    %266 = arith.select %50, %264, %265 : vector<4x64xi1>, vector<4x64xf32>
    %c4_i32_90 = arith.constant 4 : i32
    %267 = arith.muli %c5_i32, %c4_i32_90 : i32
    %268 = arith.index_cast %267 : i32 to index
    %c0_91 = arith.constant 0 : index
    %269 = vector.load %arg13[%268, %c0_91] : memref<32x64xf32, #tpu.memory_space<vmem>>, vector<4x64xf32>
    %270 = arith.addf %269, %266 : vector<4x64xf32>
    %271 = vector.extract_strided_slice %270 {offsets = [0, 0], sizes = [4, 16], strides = [1, 1]} : vector<4x64xf32> to vector<4x16xf32>
    %272 = arith.negf %271 : vector<4x16xf32>
    %273 = math.exp %272 : vector<4x16xf32>
    %cst_92 = arith.constant 1.000000e+00 : f32
    %274 = vector.broadcast %cst_92 : f32 to vector<4x16xf32>
    %275 = arith.addf %274, %273 : vector<4x16xf32>
    %276 = arith.divf %274, %275 : vector<4x16xf32>
    %277 = vector.extract_strided_slice %270 {offsets = [0, 16], sizes = [4, 16], strides = [1, 1]} : vector<4x64xf32> to vector<4x16xf32>
    %278 = arith.negf %277 : vector<4x16xf32>
    %279 = math.exp %278 : vector<4x16xf32>
    %cst_93 = arith.constant 1.000000e+00 : f32
    %280 = vector.broadcast %cst_93 : f32 to vector<4x16xf32>
    %281 = arith.addf %280, %279 : vector<4x16xf32>
    %282 = arith.divf %280, %281 : vector<4x16xf32>
    %283 = vector.extract_strided_slice %270 {offsets = [0, 32], sizes = [4, 16], strides = [1, 1]} : vector<4x64xf32> to vector<4x16xf32>
    %284 = math.tanh %283 : vector<4x16xf32>
    %285 = vector.extract_strided_slice %270 {offsets = [0, 48], sizes = [4, 16], strides = [1, 1]} : vector<4x64xf32> to vector<4x16xf32>
    %286 = arith.negf %285 : vector<4x16xf32>
    %287 = math.exp %286 : vector<4x16xf32>
    %cst_94 = arith.constant 1.000000e+00 : f32
    %288 = vector.broadcast %cst_94 : f32 to vector<4x16xf32>
    %289 = arith.addf %288, %287 : vector<4x16xf32>
    %290 = arith.divf %288, %289 : vector<4x16xf32>
    %291 = arith.mulf %282, %251 : vector<4x16xf32>
    %292 = arith.mulf %276, %284 : vector<4x16xf32>
    %293 = arith.addf %291, %292 : vector<4x16xf32>
    %294 = math.tanh %293 : vector<4x16xf32>
    %295 = arith.mulf %290, %294 : vector<4x16xf32>
    %296 = vector.extract_strided_slice %295 {offsets = [0, 0], sizes = [2, 16], strides = [1, 1]} : vector<4x16xf32> to vector<2x16xf32>
    %c2_i32_95 = arith.constant 2 : i32
    %297 = arith.muli %c5_i32, %c2_i32_95 : i32
    %298 = arith.index_cast %297 : i32 to index
    %c0_96 = arith.constant 0 : index
    %299 = vector.load %arg11[%298, %c0_96] : memref<16x32xf32, #tpu.memory_space<vmem>>, vector<2x16xf32>
    tpu.vector_store %arg11[%298, %c0_96], %296 {strides = array<i32>} : memref<16x32xf32, #tpu.memory_space<vmem>>, vector<2x16xf32>,
    %300 = vector.extract_strided_slice %295 {offsets = [2, 0], sizes = [2, 16], strides = [1, 1]} : vector<4x16xf32> to vector<2x16xf32>
    %c7_i32_97 = arith.constant 7 : i32
    %301 = arith.subi %c7_i32_97, %c5_i32 : i32
    %c2_i32_98 = arith.constant 2 : i32
    %302 = arith.muli %301, %c2_i32_98 : i32
    %303 = arith.index_cast %302 : i32 to index
    %c16_99 = arith.constant 16 : index
    %304 = vector.load %arg11[%303, %c16_99] : memref<16x32xf32, #tpu.memory_space<vmem>>, vector<2x16xf32>
    tpu.vector_store %arg11[%303, %c16_99], %300 {strides = array<i32>} : memref<16x32xf32, #tpu.memory_space<vmem>>, vector<2x16xf32>,
    %c6_i32 = arith.constant 6 : i32
    %cst_100 = arith.constant dense<0.000000e+00> : vector<4x128xf32>
    %305 = tpu.matmul %295, %47, %cst_100 {dimension_numbers = #tpu.dot_dimension_numbers<[1], [0], [0], [1], [0, 0, 1, 1], [], []>} : vector<4x16xf32>, vector<16x128xf32>, vector<4x128xf32> -> vector<4x128xf32>
    %306 = vector.extract_strided_slice %305 {offsets = [0, 0], sizes = [4, 64], strides = [1, 1]} : vector<4x128xf32> to vector<4x64xf32>
    %307 = vector.extract_strided_slice %305 {offsets = [0, 64], sizes = [4, 64], strides = [1, 1]} : vector<4x128xf32> to vector<4x64xf32>
    %308 = arith.select %50, %306, %307 : vector<4x64xi1>, vector<4x64xf32>
    %c4_i32_101 = arith.constant 4 : i32
    %309 = arith.muli %c6_i32, %c4_i32_101 : i32
    %310 = arith.index_cast %309 : i32 to index
    %c0_102 = arith.constant 0 : index
    %311 = vector.load %arg13[%310, %c0_102] : memref<32x64xf32, #tpu.memory_space<vmem>>, vector<4x64xf32>
    %312 = arith.addf %311, %308 : vector<4x64xf32>
    %313 = vector.extract_strided_slice %312 {offsets = [0, 0], sizes = [4, 16], strides = [1, 1]} : vector<4x64xf32> to vector<4x16xf32>
    %314 = arith.negf %313 : vector<4x16xf32>
    %315 = math.exp %314 : vector<4x16xf32>
    %cst_103 = arith.constant 1.000000e+00 : f32
    %316 = vector.broadcast %cst_103 : f32 to vector<4x16xf32>
    %317 = arith.addf %316, %315 : vector<4x16xf32>
    %318 = arith.divf %316, %317 : vector<4x16xf32>
    %319 = vector.extract_strided_slice %312 {offsets = [0, 16], sizes = [4, 16], strides = [1, 1]} : vector<4x64xf32> to vector<4x16xf32>
    %320 = arith.negf %319 : vector<4x16xf32>
    %321 = math.exp %320 : vector<4x16xf32>
    %cst_104 = arith.constant 1.000000e+00 : f32
    %322 = vector.broadcast %cst_104 : f32 to vector<4x16xf32>
    %323 = arith.addf %322, %321 : vector<4x16xf32>
    %324 = arith.divf %322, %323 : vector<4x16xf32>
    %325 = vector.extract_strided_slice %312 {offsets = [0, 32], sizes = [4, 16], strides = [1, 1]} : vector<4x64xf32> to vector<4x16xf32>
    %326 = math.tanh %325 : vector<4x16xf32>
    %327 = vector.extract_strided_slice %312 {offsets = [0, 48], sizes = [4, 16], strides = [1, 1]} : vector<4x64xf32> to vector<4x16xf32>
    %328 = arith.negf %327 : vector<4x16xf32>
    %329 = math.exp %328 : vector<4x16xf32>
    %cst_105 = arith.constant 1.000000e+00 : f32
    %330 = vector.broadcast %cst_105 : f32 to vector<4x16xf32>
    %331 = arith.addf %330, %329 : vector<4x16xf32>
    %332 = arith.divf %330, %331 : vector<4x16xf32>
    %333 = arith.mulf %324, %293 : vector<4x16xf32>
    %334 = arith.mulf %318, %326 : vector<4x16xf32>
    %335 = arith.addf %333, %334 : vector<4x16xf32>
    %336 = math.tanh %335 : vector<4x16xf32>
    %337 = arith.mulf %332, %336 : vector<4x16xf32>
    %338 = vector.extract_strided_slice %337 {offsets = [0, 0], sizes = [2, 16], strides = [1, 1]} : vector<4x16xf32> to vector<2x16xf32>
    %c2_i32_106 = arith.constant 2 : i32
    %339 = arith.muli %c6_i32, %c2_i32_106 : i32
    %340 = arith.index_cast %339 : i32 to index
    %c0_107 = arith.constant 0 : index
    %341 = vector.load %arg11[%340, %c0_107] : memref<16x32xf32, #tpu.memory_space<vmem>>, vector<2x16xf32>
    tpu.vector_store %arg11[%340, %c0_107], %338 {strides = array<i32>} : memref<16x32xf32, #tpu.memory_space<vmem>>, vector<2x16xf32>,
    %342 = vector.extract_strided_slice %337 {offsets = [2, 0], sizes = [2, 16], strides = [1, 1]} : vector<4x16xf32> to vector<2x16xf32>
    %c7_i32_108 = arith.constant 7 : i32
    %343 = arith.subi %c7_i32_108, %c6_i32 : i32
    %c2_i32_109 = arith.constant 2 : i32
    %344 = arith.muli %343, %c2_i32_109 : i32
    %345 = arith.index_cast %344 : i32 to index
    %c16_110 = arith.constant 16 : index
    %346 = vector.load %arg11[%345, %c16_110] : memref<16x32xf32, #tpu.memory_space<vmem>>, vector<2x16xf32>
    tpu.vector_store %arg11[%345, %c16_110], %342 {strides = array<i32>} : memref<16x32xf32, #tpu.memory_space<vmem>>, vector<2x16xf32>,
    %c7_i32_111 = arith.constant 7 : i32
    %cst_112 = arith.constant dense<0.000000e+00> : vector<4x128xf32>
    %347 = tpu.matmul %337, %47, %cst_112 {dimension_numbers = #tpu.dot_dimension_numbers<[1], [0], [0], [1], [0, 0, 1, 1], [], []>} : vector<4x16xf32>, vector<16x128xf32>, vector<4x128xf32> -> vector<4x128xf32>
    %348 = vector.extract_strided_slice %347 {offsets = [0, 0], sizes = [4, 64], strides = [1, 1]} : vector<4x128xf32> to vector<4x64xf32>
    %349 = vector.extract_strided_slice %347 {offsets = [0, 64], sizes = [4, 64], strides = [1, 1]} : vector<4x128xf32> to vector<4x64xf32>
    %350 = arith.select %50, %348, %349 : vector<4x64xi1>, vector<4x64xf32>
    %c4_i32_113 = arith.constant 4 : i32
    %351 = arith.muli %c7_i32_111, %c4_i32_113 : i32
    %352 = arith.index_cast %351 : i32 to index
    %c0_114 = arith.constant 0 : index
    %353 = vector.load %arg13[%352, %c0_114] : memref<32x64xf32, #tpu.memory_space<vmem>>, vector<4x64xf32>
    %354 = arith.addf %353, %350 : vector<4x64xf32>
    %355 = vector.extract_strided_slice %354 {offsets = [0, 0], sizes = [4, 16], strides = [1, 1]} : vector<4x64xf32> to vector<4x16xf32>
    %356 = arith.negf %355 : vector<4x16xf32>
    %357 = math.exp %356 : vector<4x16xf32>
    %cst_115 = arith.constant 1.000000e+00 : f32
    %358 = vector.broadcast %cst_115 : f32 to vector<4x16xf32>
    %359 = arith.addf %358, %357 : vector<4x16xf32>
    %360 = arith.divf %358, %359 : vector<4x16xf32>
    %361 = vector.extract_strided_slice %354 {offsets = [0, 16], sizes = [4, 16], strides = [1, 1]} : vector<4x64xf32> to vector<4x16xf32>
    %362 = arith.negf %361 : vector<4x16xf32>
    %363 = math.exp %362 : vector<4x16xf32>
    %cst_116 = arith.constant 1.000000e+00 : f32
    %364 = vector.broadcast %cst_116 : f32 to vector<4x16xf32>
    %365 = arith.addf %364, %363 : vector<4x16xf32>
    %366 = arith.divf %364, %365 : vector<4x16xf32>
    %367 = vector.extract_strided_slice %354 {offsets = [0, 32], sizes = [4, 16], strides = [1, 1]} : vector<4x64xf32> to vector<4x16xf32>
    %368 = math.tanh %367 : vector<4x16xf32>
    %369 = vector.extract_strided_slice %354 {offsets = [0, 48], sizes = [4, 16], strides = [1, 1]} : vector<4x64xf32> to vector<4x16xf32>
    %370 = arith.negf %369 : vector<4x16xf32>
    %371 = math.exp %370 : vector<4x16xf32>
    %cst_117 = arith.constant 1.000000e+00 : f32
    %372 = vector.broadcast %cst_117 : f32 to vector<4x16xf32>
    %373 = arith.addf %372, %371 : vector<4x16xf32>
    %374 = arith.divf %372, %373 : vector<4x16xf32>
    %375 = arith.mulf %366, %335 : vector<4x16xf32>
    %376 = arith.mulf %360, %368 : vector<4x16xf32>
    %377 = arith.addf %375, %376 : vector<4x16xf32>
    %378 = math.tanh %377 : vector<4x16xf32>
    %379 = arith.mulf %374, %378 : vector<4x16xf32>
    %380 = vector.extract_strided_slice %379 {offsets = [0, 0], sizes = [2, 16], strides = [1, 1]} : vector<4x16xf32> to vector<2x16xf32>
    %c2_i32_118 = arith.constant 2 : i32
    %381 = arith.muli %c7_i32_111, %c2_i32_118 : i32
    %382 = arith.index_cast %381 : i32 to index
    %c0_119 = arith.constant 0 : index
    %383 = vector.load %arg11[%382, %c0_119] : memref<16x32xf32, #tpu.memory_space<vmem>>, vector<2x16xf32>
    tpu.vector_store %arg11[%382, %c0_119], %380 {strides = array<i32>} : memref<16x32xf32, #tpu.memory_space<vmem>>, vector<2x16xf32>,
    %384 = vector.extract_strided_slice %379 {offsets = [2, 0], sizes = [2, 16], strides = [1, 1]} : vector<4x16xf32> to vector<2x16xf32>
    %c7_i32_120 = arith.constant 7 : i32
    %385 = arith.subi %c7_i32_120, %c7_i32_111 : i32
    %c2_i32_121 = arith.constant 2 : i32
    %386 = arith.muli %385, %c2_i32_121 : i32
    %387 = arith.index_cast %386 : i32 to index
    %c16_122 = arith.constant 16 : index
    %388 = vector.load %arg11[%387, %c16_122] : memref<16x32xf32, #tpu.memory_space<vmem>>, vector<2x16xf32>
    tpu.vector_store %arg11[%387, %c16_122], %384 {strides = array<i32>} : memref<16x32xf32, #tpu.memory_space<vmem>>, vector<2x16xf32>,
    %c8_i32 = arith.constant 8 : i32
    %c0_123 = arith.constant 0 : index
    %c0_124 = arith.constant 0 : index
    %389 = vector.load %arg11[%c0_123, %c0_124] : memref<16x32xf32, #tpu.memory_space<vmem>>, vector<16x32xf32>
    %c0_125 = arith.constant 0 : index
    %c0_126 = arith.constant 0 : index
    %c0_127 = arith.constant 0 : index
    %390 = vector.load %arg5[%c0_125, %c0_126, %c0_127] : memref<2x32x64xf32, #tpu.memory_space<vmem>>, vector<1x32x64xf32>
    %391 = vector.shape_cast %390 : vector<1x32x64xf32> to vector<32x64xf32>
    %cst_128 = arith.constant dense<0.000000e+00> : vector<16x64xf32>
    %392 = tpu.matmul %389, %391, %cst_128 {dimension_numbers = #tpu.dot_dimension_numbers<[1], [0], [0], [1], [0, 0, 1, 1], [], []>} : vector<16x32xf32>, vector<32x64xf32>, vector<16x64xf32> -> vector<16x64xf32>
    %c0_129 = arith.constant 0 : index
    %c0_130 = arith.constant 0 : index
    %c0_131 = arith.constant 0 : index
    %393 = vector.load %arg7[%c0_129, %c0_130, %c0_131] : memref<2x1x64xf32, #tpu.memory_space<vmem>>, vector<1x1x64xf32>
    %394 = vector.shape_cast %393 : vector<1x1x64xf32> to vector<1x64xf32>
    %395 = vector.broadcast %394 : vector<1x64xf32> to vector<16x64xf32>
    %396 = arith.addf %392, %395 : vector<16x64xf32>
    %397 = vector.extract_strided_slice %396 {offsets = [0, 0], sizes = [2, 64], strides = [1, 1]} : vector<16x64xf32> to vector<2x64xf32>
    %c0_132 = arith.constant 0 : index
    %c0_133 = arith.constant 0 : index
    %398 = vector.load %arg13[%c0_132, %c0_133] : memref<32x64xf32, #tpu.memory_space<vmem>>, vector<2x64xf32>
    tpu.vector_store %arg13[%c0_132, %c0_133], %397 {strides = array<i32>} : memref<32x64xf32, #tpu.memory_space<vmem>>, vector<2x64xf32>,
    %399 = vector.extract_strided_slice %396 {offsets = [2, 0], sizes = [2, 64], strides = [1, 1]} : vector<16x64xf32> to vector<2x64xf32>
    %c4_134 = arith.constant 4 : index
    %c0_135 = arith.constant 0 : index
    %400 = vector.load %arg13[%c4_134, %c0_135] : memref<32x64xf32, #tpu.memory_space<vmem>>, vector<2x64xf32>
    tpu.vector_store %arg13[%c4_134, %c0_135], %399 {strides = array<i32>} : memref<32x64xf32, #tpu.memory_space<vmem>>, vector<2x64xf32>,
    %401 = vector.extract_strided_slice %396 {offsets = [4, 0], sizes = [2, 64], strides = [1, 1]} : vector<16x64xf32> to vector<2x64xf32>
    %c8_136 = arith.constant 8 : index
    %c0_137 = arith.constant 0 : index
    %402 = vector.load %arg13[%c8_136, %c0_137] : memref<32x64xf32, #tpu.memory_space<vmem>>, vector<2x64xf32>
    tpu.vector_store %arg13[%c8_136, %c0_137], %401 {strides = array<i32>} : memref<32x64xf32, #tpu.memory_space<vmem>>, vector<2x64xf32>,
    %403 = vector.extract_strided_slice %396 {offsets = [6, 0], sizes = [2, 64], strides = [1, 1]} : vector<16x64xf32> to vector<2x64xf32>
    %c12_138 = arith.constant 12 : index
    %c0_139 = arith.constant 0 : index
    %404 = vector.load %arg13[%c12_138, %c0_139] : memref<32x64xf32, #tpu.memory_space<vmem>>, vector<2x64xf32>
    tpu.vector_store %arg13[%c12_138, %c0_139], %403 {strides = array<i32>} : memref<32x64xf32, #tpu.memory_space<vmem>>, vector<2x64xf32>,
    %405 = vector.extract_strided_slice %396 {offsets = [8, 0], sizes = [2, 64], strides = [1, 1]} : vector<16x64xf32> to vector<2x64xf32>
    %c16_140 = arith.constant 16 : index
    %c0_141 = arith.constant 0 : index
    %406 = vector.load %arg13[%c16_140, %c0_141] : memref<32x64xf32, #tpu.memory_space<vmem>>, vector<2x64xf32>
    tpu.vector_store %arg13[%c16_140, %c0_141], %405 {strides = array<i32>} : memref<32x64xf32, #tpu.memory_space<vmem>>, vector<2x64xf32>,
    %407 = vector.extract_strided_slice %396 {offsets = [10, 0], sizes = [2, 64], strides = [1, 1]} : vector<16x64xf32> to vector<2x64xf32>
    %c20_142 = arith.constant 20 : index
    %c0_143 = arith.constant 0 : index
    %408 = vector.load %arg13[%c20_142, %c0_143] : memref<32x64xf32, #tpu.memory_space<vmem>>, vector<2x64xf32>
    tpu.vector_store %arg13[%c20_142, %c0_143], %407 {strides = array<i32>} : memref<32x64xf32, #tpu.memory_space<vmem>>, vector<2x64xf32>,
    %409 = vector.extract_strided_slice %396 {offsets = [12, 0], sizes = [2, 64], strides = [1, 1]} : vector<16x64xf32> to vector<2x64xf32>
    %c24_144 = arith.constant 24 : index
    %c0_145 = arith.constant 0 : index
    %410 = vector.load %arg13[%c24_144, %c0_145] : memref<32x64xf32, #tpu.memory_space<vmem>>, vector<2x64xf32>
    tpu.vector_store %arg13[%c24_144, %c0_145], %409 {strides = array<i32>} : memref<32x64xf32, #tpu.memory_space<vmem>>, vector<2x64xf32>,
    %411 = vector.extract_strided_slice %396 {offsets = [14, 0], sizes = [2, 64], strides = [1, 1]} : vector<16x64xf32> to vector<2x64xf32>
    %c28_146 = arith.constant 28 : index
    %c0_147 = arith.constant 0 : index
    %412 = vector.load %arg13[%c28_146, %c0_147] : memref<32x64xf32, #tpu.memory_space<vmem>>, vector<2x64xf32>
    tpu.vector_store %arg13[%c28_146, %c0_147], %411 {strides = array<i32>} : memref<32x64xf32, #tpu.memory_space<vmem>>, vector<2x64xf32>,
    %c1_148 = arith.constant 1 : index
    %c0_149 = arith.constant 0 : index
    %c0_150 = arith.constant 0 : index
    %413 = vector.load %arg5[%c1_148, %c0_149, %c0_150] : memref<2x32x64xf32, #tpu.memory_space<vmem>>, vector<1x32x64xf32>
    %414 = vector.shape_cast %413 : vector<1x32x64xf32> to vector<32x64xf32>
    %cst_151 = arith.constant dense<0.000000e+00> : vector<16x64xf32>
    %415 = tpu.matmul %389, %414, %cst_151 {dimension_numbers = #tpu.dot_dimension_numbers<[1], [0], [0], [1], [0, 0, 1, 1], [], []>} : vector<16x32xf32>, vector<32x64xf32>, vector<16x64xf32> -> vector<16x64xf32>
    %c1_152 = arith.constant 1 : index
    %c0_153 = arith.constant 0 : index
    %c0_154 = arith.constant 0 : index
    %416 = vector.load %arg7[%c1_152, %c0_153, %c0_154] : memref<2x1x64xf32, #tpu.memory_space<vmem>>, vector<1x1x64xf32>
    %417 = vector.shape_cast %416 : vector<1x1x64xf32> to vector<1x64xf32>
    %418 = vector.broadcast %417 : vector<1x64xf32> to vector<16x64xf32>
    %419 = arith.addf %415, %418 : vector<16x64xf32>
    %420 = vector.extract_strided_slice %419 {offsets = [14, 0], sizes = [2, 64], strides = [1, 1]} : vector<16x64xf32> to vector<2x64xf32>
    %c2_155 = arith.constant 2 : index
    %c0_156 = arith.constant 0 : index
    %421 = vector.load %arg13[%c2_155, %c0_156] : memref<32x64xf32, #tpu.memory_space<vmem>>, vector<2x64xf32>
    tpu.vector_store %arg13[%c2_155, %c0_156], %420 {strides = array<i32>} : memref<32x64xf32, #tpu.memory_space<vmem>>, vector<2x64xf32>,
    %422 = vector.extract_strided_slice %419 {offsets = [12, 0], sizes = [2, 64], strides = [1, 1]} : vector<16x64xf32> to vector<2x64xf32>
    %c6_157 = arith.constant 6 : index
    %c0_158 = arith.constant 0 : index
    %423 = vector.load %arg13[%c6_157, %c0_158] : memref<32x64xf32, #tpu.memory_space<vmem>>, vector<2x64xf32>
    tpu.vector_store %arg13[%c6_157, %c0_158], %422 {strides = array<i32>} : memref<32x64xf32, #tpu.memory_space<vmem>>, vector<2x64xf32>,
    %424 = vector.extract_strided_slice %419 {offsets = [10, 0], sizes = [2, 64], strides = [1, 1]} : vector<16x64xf32> to vector<2x64xf32>
    %c10_159 = arith.constant 10 : index
    %c0_160 = arith.constant 0 : index
    %425 = vector.load %arg13[%c10_159, %c0_160] : memref<32x64xf32, #tpu.memory_space<vmem>>, vector<2x64xf32>
    tpu.vector_store %arg13[%c10_159, %c0_160], %424 {strides = array<i32>} : memref<32x64xf32, #tpu.memory_space<vmem>>, vector<2x64xf32>,
    %426 = vector.extract_strided_slice %419 {offsets = [8, 0], sizes = [2, 64], strides = [1, 1]} : vector<16x64xf32> to vector<2x64xf32>
    %c14_161 = arith.constant 14 : index
    %c0_162 = arith.constant 0 : index
    %427 = vector.load %arg13[%c14_161, %c0_162] : memref<32x64xf32, #tpu.memory_space<vmem>>, vector<2x64xf32>
    tpu.vector_store %arg13[%c14_161, %c0_162], %426 {strides = array<i32>} : memref<32x64xf32, #tpu.memory_space<vmem>>, vector<2x64xf32>,
    %428 = vector.extract_strided_slice %419 {offsets = [6, 0], sizes = [2, 64], strides = [1, 1]} : vector<16x64xf32> to vector<2x64xf32>
    %c18_163 = arith.constant 18 : index
    %c0_164 = arith.constant 0 : index
    %429 = vector.load %arg13[%c18_163, %c0_164] : memref<32x64xf32, #tpu.memory_space<vmem>>, vector<2x64xf32>
    tpu.vector_store %arg13[%c18_163, %c0_164], %428 {strides = array<i32>} : memref<32x64xf32, #tpu.memory_space<vmem>>, vector<2x64xf32>,
    %430 = vector.extract_strided_slice %419 {offsets = [4, 0], sizes = [2, 64], strides = [1, 1]} : vector<16x64xf32> to vector<2x64xf32>
    %c22_165 = arith.constant 22 : index
    %c0_166 = arith.constant 0 : index
    %431 = vector.load %arg13[%c22_165, %c0_166] : memref<32x64xf32, #tpu.memory_space<vmem>>, vector<2x64xf32>
    tpu.vector_store %arg13[%c22_165, %c0_166], %430 {strides = array<i32>} : memref<32x64xf32, #tpu.memory_space<vmem>>, vector<2x64xf32>,
    %432 = vector.extract_strided_slice %419 {offsets = [2, 0], sizes = [2, 64], strides = [1, 1]} : vector<16x64xf32> to vector<2x64xf32>
    %c26_167 = arith.constant 26 : index
    %c0_168 = arith.constant 0 : index
    %433 = vector.load %arg13[%c26_167, %c0_168] : memref<32x64xf32, #tpu.memory_space<vmem>>, vector<2x64xf32>
    tpu.vector_store %arg13[%c26_167, %c0_168], %432 {strides = array<i32>} : memref<32x64xf32, #tpu.memory_space<vmem>>, vector<2x64xf32>,
    %434 = vector.extract_strided_slice %419 {offsets = [0, 0], sizes = [2, 64], strides = [1, 1]} : vector<16x64xf32> to vector<2x64xf32>
    %c30_169 = arith.constant 30 : index
    %c0_170 = arith.constant 0 : index
    %435 = vector.load %arg13[%c30_169, %c0_170] : memref<32x64xf32, #tpu.memory_space<vmem>>, vector<2x64xf32>
    tpu.vector_store %arg13[%c30_169, %c0_170], %434 {strides = array<i32>} : memref<32x64xf32, #tpu.memory_space<vmem>>, vector<2x64xf32>,
    %c0_171 = arith.constant 0 : index
    %c0_172 = arith.constant 0 : index
    %436 = vector.load %arg6[%c0_171, %c0_172] : memref<16x128xf32, #tpu.memory_space<vmem>>, vector<16x128xf32>
    %437 = tpu.iota {dimensions = array<i32: 0>} : vector<4x64xi32>
    %c2_i32_173 = arith.constant 2 : i32
    %438 = vector.broadcast %c2_i32_173 : i32 to vector<4x64xi32>
    %439 = arith.cmpi slt, %437, %438 : vector<4x64xi32>
    %cst_174 = arith.constant 0.000000e+00 : f32
    %440 = vector.broadcast %cst_174 : f32 to vector<4x16xf32>
    %cst_175 = arith.constant 0.000000e+00 : f32
    %441 = vector.broadcast %cst_175 : f32 to vector<4x16xf32>
    %c0_i32_176 = arith.constant 0 : i32
    %cst_177 = arith.constant dense<0.000000e+00> : vector<4x128xf32>
    %442 = tpu.matmul %440, %436, %cst_177 {dimension_numbers = #tpu.dot_dimension_numbers<[1], [0], [0], [1], [0, 0, 1, 1], [], []>} : vector<4x16xf32>, vector<16x128xf32>, vector<4x128xf32> -> vector<4x128xf32>
    %443 = vector.extract_strided_slice %442 {offsets = [0, 0], sizes = [4, 64], strides = [1, 1]} : vector<4x128xf32> to vector<4x64xf32>
    %444 = vector.extract_strided_slice %442 {offsets = [0, 64], sizes = [4, 64], strides = [1, 1]} : vector<4x128xf32> to vector<4x64xf32>
    %445 = arith.select %439, %443, %444 : vector<4x64xi1>, vector<4x64xf32>
    %c4_i32_178 = arith.constant 4 : i32
    %446 = arith.muli %c0_i32_176, %c4_i32_178 : i32
    %447 = arith.index_cast %446 : i32 to index
    %c0_179 = arith.constant 0 : index
    %448 = vector.load %arg13[%447, %c0_179] : memref<32x64xf32, #tpu.memory_space<vmem>>, vector<4x64xf32>
    %449 = arith.addf %448, %445 : vector<4x64xf32>
    %450 = vector.extract_strided_slice %449 {offsets = [0, 0], sizes = [4, 16], strides = [1, 1]} : vector<4x64xf32> to vector<4x16xf32>
    %451 = arith.negf %450 : vector<4x16xf32>
    %452 = math.exp %451 : vector<4x16xf32>
    %cst_180 = arith.constant 1.000000e+00 : f32
    %453 = vector.broadcast %cst_180 : f32 to vector<4x16xf32>
    %454 = arith.addf %453, %452 : vector<4x16xf32>
    %455 = arith.divf %453, %454 : vector<4x16xf32>
    %456 = vector.extract_strided_slice %449 {offsets = [0, 16], sizes = [4, 16], strides = [1, 1]} : vector<4x64xf32> to vector<4x16xf32>
    %457 = arith.negf %456 : vector<4x16xf32>
    %458 = math.exp %457 : vector<4x16xf32>
    %cst_181 = arith.constant 1.000000e+00 : f32
    %459 = vector.broadcast %cst_181 : f32 to vector<4x16xf32>
    %460 = arith.addf %459, %458 : vector<4x16xf32>
    %461 = arith.divf %459, %460 : vector<4x16xf32>
    %462 = vector.extract_strided_slice %449 {offsets = [0, 32], sizes = [4, 16], strides = [1, 1]} : vector<4x64xf32> to vector<4x16xf32>
    %463 = math.tanh %462 : vector<4x16xf32>
    %464 = vector.extract_strided_slice %449 {offsets = [0, 48], sizes = [4, 16], strides = [1, 1]} : vector<4x64xf32> to vector<4x16xf32>
    %465 = arith.negf %464 : vector<4x16xf32>
    %466 = math.exp %465 : vector<4x16xf32>
    %cst_182 = arith.constant 1.000000e+00 : f32
    %467 = vector.broadcast %cst_182 : f32 to vector<4x16xf32>
    %468 = arith.addf %467, %466 : vector<4x16xf32>
    %469 = arith.divf %467, %468 : vector<4x16xf32>
    %470 = arith.mulf %461, %441 : vector<4x16xf32>
    %471 = arith.mulf %455, %463 : vector<4x16xf32>
    %472 = arith.addf %470, %471 : vector<4x16xf32>
    %473 = math.tanh %472 : vector<4x16xf32>
    %474 = arith.mulf %469, %473 : vector<4x16xf32>
    %475 = vector.extract_strided_slice %474 {offsets = [0, 0], sizes = [2, 16], strides = [1, 1]} : vector<4x16xf32> to vector<2x16xf32>
    %c2_i32_183 = arith.constant 2 : i32
    %476 = arith.muli %c0_i32_176, %c2_i32_183 : i32
    %477 = arith.index_cast %476 : i32 to index
    %c0_184 = arith.constant 0 : index
    %478 = vector.load %arg12[%477, %c0_184] : memref<16x32xf32, #tpu.memory_space<vmem>>, vector<2x16xf32>
    tpu.vector_store %arg12[%477, %c0_184], %475 {strides = array<i32>} : memref<16x32xf32, #tpu.memory_space<vmem>>, vector<2x16xf32>,
    %479 = vector.extract_strided_slice %474 {offsets = [2, 0], sizes = [2, 16], strides = [1, 1]} : vector<4x16xf32> to vector<2x16xf32>
    %c7_i32_185 = arith.constant 7 : i32
    %480 = arith.subi %c7_i32_185, %c0_i32_176 : i32
    %c2_i32_186 = arith.constant 2 : i32
    %481 = arith.muli %480, %c2_i32_186 : i32
    %482 = arith.index_cast %481 : i32 to index
    %c16_187 = arith.constant 16 : index
    %483 = vector.load %arg12[%482, %c16_187] : memref<16x32xf32, #tpu.memory_space<vmem>>, vector<2x16xf32>
    tpu.vector_store %arg12[%482, %c16_187], %479 {strides = array<i32>} : memref<16x32xf32, #tpu.memory_space<vmem>>, vector<2x16xf32>,
    %c1_i32_188 = arith.constant 1 : i32
    %cst_189 = arith.constant dense<0.000000e+00> : vector<4x128xf32>
    %484 = tpu.matmul %474, %436, %cst_189 {dimension_numbers = #tpu.dot_dimension_numbers<[1], [0], [0], [1], [0, 0, 1, 1], [], []>} : vector<4x16xf32>, vector<16x128xf32>, vector<4x128xf32> -> vector<4x128xf32>
    %485 = vector.extract_strided_slice %484 {offsets = [0, 0], sizes = [4, 64], strides = [1, 1]} : vector<4x128xf32> to vector<4x64xf32>
    %486 = vector.extract_strided_slice %484 {offsets = [0, 64], sizes = [4, 64], strides = [1, 1]} : vector<4x128xf32> to vector<4x64xf32>
    %487 = arith.select %439, %485, %486 : vector<4x64xi1>, vector<4x64xf32>
    %c4_i32_190 = arith.constant 4 : i32
    %488 = arith.muli %c1_i32_188, %c4_i32_190 : i32
    %489 = arith.index_cast %488 : i32 to index
    %c0_191 = arith.constant 0 : index
    %490 = vector.load %arg13[%489, %c0_191] : memref<32x64xf32, #tpu.memory_space<vmem>>, vector<4x64xf32>
    %491 = arith.addf %490, %487 : vector<4x64xf32>
    %492 = vector.extract_strided_slice %491 {offsets = [0, 0], sizes = [4, 16], strides = [1, 1]} : vector<4x64xf32> to vector<4x16xf32>
    %493 = arith.negf %492 : vector<4x16xf32>
    %494 = math.exp %493 : vector<4x16xf32>
    %cst_192 = arith.constant 1.000000e+00 : f32
    %495 = vector.broadcast %cst_192 : f32 to vector<4x16xf32>
    %496 = arith.addf %495, %494 : vector<4x16xf32>
    %497 = arith.divf %495, %496 : vector<4x16xf32>
    %498 = vector.extract_strided_slice %491 {offsets = [0, 16], sizes = [4, 16], strides = [1, 1]} : vector<4x64xf32> to vector<4x16xf32>
    %499 = arith.negf %498 : vector<4x16xf32>
    %500 = math.exp %499 : vector<4x16xf32>
    %cst_193 = arith.constant 1.000000e+00 : f32
    %501 = vector.broadcast %cst_193 : f32 to vector<4x16xf32>
    %502 = arith.addf %501, %500 : vector<4x16xf32>
    %503 = arith.divf %501, %502 : vector<4x16xf32>
    %504 = vector.extract_strided_slice %491 {offsets = [0, 32], sizes = [4, 16], strides = [1, 1]} : vector<4x64xf32> to vector<4x16xf32>
    %505 = math.tanh %504 : vector<4x16xf32>
    %506 = vector.extract_strided_slice %491 {offsets = [0, 48], sizes = [4, 16], strides = [1, 1]} : vector<4x64xf32> to vector<4x16xf32>
    %507 = arith.negf %506 : vector<4x16xf32>
    %508 = math.exp %507 : vector<4x16xf32>
    %cst_194 = arith.constant 1.000000e+00 : f32
    %509 = vector.broadcast %cst_194 : f32 to vector<4x16xf32>
    %510 = arith.addf %509, %508 : vector<4x16xf32>
    %511 = arith.divf %509, %510 : vector<4x16xf32>
    %512 = arith.mulf %503, %472 : vector<4x16xf32>
    %513 = arith.mulf %497, %505 : vector<4x16xf32>
    %514 = arith.addf %512, %513 : vector<4x16xf32>
    %515 = math.tanh %514 : vector<4x16xf32>
    %516 = arith.mulf %511, %515 : vector<4x16xf32>
    %517 = vector.extract_strided_slice %516 {offsets = [0, 0], sizes = [2, 16], strides = [1, 1]} : vector<4x16xf32> to vector<2x16xf32>
    %c2_i32_195 = arith.constant 2 : i32
    %518 = arith.muli %c1_i32_188, %c2_i32_195 : i32
    %519 = arith.index_cast %518 : i32 to index
    %c0_196 = arith.constant 0 : index
    %520 = vector.load %arg12[%519, %c0_196] : memref<16x32xf32, #tpu.memory_space<vmem>>, vector<2x16xf32>
    tpu.vector_store %arg12[%519, %c0_196], %517 {strides = array<i32>} : memref<16x32xf32, #tpu.memory_space<vmem>>, vector<2x16xf32>,
    %521 = vector.extract_strided_slice %516 {offsets = [2, 0], sizes = [2, 16], strides = [1, 1]} : vector<4x16xf32> to vector<2x16xf32>
    %c7_i32_197 = arith.constant 7 : i32
    %522 = arith.subi %c7_i32_197, %c1_i32_188 : i32
    %c2_i32_198 = arith.constant 2 : i32
    %523 = arith.muli %522, %c2_i32_198 : i32
    %524 = arith.index_cast %523 : i32 to index
    %c16_199 = arith.constant 16 : index
    %525 = vector.load %arg12[%524, %c16_199] : memref<16x32xf32, #tpu.memory_space<vmem>>, vector<2x16xf32>
    tpu.vector_store %arg12[%524, %c16_199], %521 {strides = array<i32>} : memref<16x32xf32, #tpu.memory_space<vmem>>, vector<2x16xf32>,
    %c2_i32_200 = arith.constant 2 : i32
    %cst_201 = arith.constant dense<0.000000e+00> : vector<4x128xf32>
    %526 = tpu.matmul %516, %436, %cst_201 {dimension_numbers = #tpu.dot_dimension_numbers<[1], [0], [0], [1], [0, 0, 1, 1], [], []>} : vector<4x16xf32>, vector<16x128xf32>, vector<4x128xf32> -> vector<4x128xf32>
    %527 = vector.extract_strided_slice %526 {offsets = [0, 0], sizes = [4, 64], strides = [1, 1]} : vector<4x128xf32> to vector<4x64xf32>
    %528 = vector.extract_strided_slice %526 {offsets = [0, 64], sizes = [4, 64], strides = [1, 1]} : vector<4x128xf32> to vector<4x64xf32>
    %529 = arith.select %439, %527, %528 : vector<4x64xi1>, vector<4x64xf32>
    %c4_i32_202 = arith.constant 4 : i32
    %530 = arith.muli %c2_i32_200, %c4_i32_202 : i32
    %531 = arith.index_cast %530 : i32 to index
    %c0_203 = arith.constant 0 : index
    %532 = vector.load %arg13[%531, %c0_203] : memref<32x64xf32, #tpu.memory_space<vmem>>, vector<4x64xf32>
    %533 = arith.addf %532, %529 : vector<4x64xf32>
    %534 = vector.extract_strided_slice %533 {offsets = [0, 0], sizes = [4, 16], strides = [1, 1]} : vector<4x64xf32> to vector<4x16xf32>
    %535 = arith.negf %534 : vector<4x16xf32>
    %536 = math.exp %535 : vector<4x16xf32>
    %cst_204 = arith.constant 1.000000e+00 : f32
    %537 = vector.broadcast %cst_204 : f32 to vector<4x16xf32>
    %538 = arith.addf %537, %536 : vector<4x16xf32>
    %539 = arith.divf %537, %538 : vector<4x16xf32>
    %540 = vector.extract_strided_slice %533 {offsets = [0, 16], sizes = [4, 16], strides = [1, 1]} : vector<4x64xf32> to vector<4x16xf32>
    %541 = arith.negf %540 : vector<4x16xf32>
    %542 = math.exp %541 : vector<4x16xf32>
    %cst_205 = arith.constant 1.000000e+00 : f32
    %543 = vector.broadcast %cst_205 : f32 to vector<4x16xf32>
    %544 = arith.addf %543, %542 : vector<4x16xf32>
    %545 = arith.divf %543, %544 : vector<4x16xf32>
    %546 = vector.extract_strided_slice %533 {offsets = [0, 32], sizes = [4, 16], strides = [1, 1]} : vector<4x64xf32> to vector<4x16xf32>
    %547 = math.tanh %546 : vector<4x16xf32>
    %548 = vector.extract_strided_slice %533 {offsets = [0, 48], sizes = [4, 16], strides = [1, 1]} : vector<4x64xf32> to vector<4x16xf32>
    %549 = arith.negf %548 : vector<4x16xf32>
    %550 = math.exp %549 : vector<4x16xf32>
    %cst_206 = arith.constant 1.000000e+00 : f32
    %551 = vector.broadcast %cst_206 : f32 to vector<4x16xf32>
    %552 = arith.addf %551, %550 : vector<4x16xf32>
    %553 = arith.divf %551, %552 : vector<4x16xf32>
    %554 = arith.mulf %545, %514 : vector<4x16xf32>
    %555 = arith.mulf %539, %547 : vector<4x16xf32>
    %556 = arith.addf %554, %555 : vector<4x16xf32>
    %557 = math.tanh %556 : vector<4x16xf32>
    %558 = arith.mulf %553, %557 : vector<4x16xf32>
    %559 = vector.extract_strided_slice %558 {offsets = [0, 0], sizes = [2, 16], strides = [1, 1]} : vector<4x16xf32> to vector<2x16xf32>
    %c2_i32_207 = arith.constant 2 : i32
    %560 = arith.muli %c2_i32_200, %c2_i32_207 : i32
    %561 = arith.index_cast %560 : i32 to index
    %c0_208 = arith.constant 0 : index
    %562 = vector.load %arg12[%561, %c0_208] : memref<16x32xf32, #tpu.memory_space<vmem>>, vector<2x16xf32>
    tpu.vector_store %arg12[%561, %c0_208], %559 {strides = array<i32>} : memref<16x32xf32, #tpu.memory_space<vmem>>, vector<2x16xf32>,
    %563 = vector.extract_strided_slice %558 {offsets = [2, 0], sizes = [2, 16], strides = [1, 1]} : vector<4x16xf32> to vector<2x16xf32>
    %c7_i32_209 = arith.constant 7 : i32
    %564 = arith.subi %c7_i32_209, %c2_i32_200 : i32
    %c2_i32_210 = arith.constant 2 : i32
    %565 = arith.muli %564, %c2_i32_210 : i32
    %566 = arith.index_cast %565 : i32 to index
    %c16_211 = arith.constant 16 : index
    %567 = vector.load %arg12[%566, %c16_211] : memref<16x32xf32, #tpu.memory_space<vmem>>, vector<2x16xf32>
    tpu.vector_store %arg12[%566, %c16_211], %563 {strides = array<i32>} : memref<16x32xf32, #tpu.memory_space<vmem>>, vector<2x16xf32>,
    %c3_i32_212 = arith.constant 3 : i32
    %cst_213 = arith.constant dense<0.000000e+00> : vector<4x128xf32>
    %568 = tpu.matmul %558, %436, %cst_213 {dimension_numbers = #tpu.dot_dimension_numbers<[1], [0], [0], [1], [0, 0, 1, 1], [], []>} : vector<4x16xf32>, vector<16x128xf32>, vector<4x128xf32> -> vector<4x128xf32>
    %569 = vector.extract_strided_slice %568 {offsets = [0, 0], sizes = [4, 64], strides = [1, 1]} : vector<4x128xf32> to vector<4x64xf32>
    %570 = vector.extract_strided_slice %568 {offsets = [0, 64], sizes = [4, 64], strides = [1, 1]} : vector<4x128xf32> to vector<4x64xf32>
    %571 = arith.select %439, %569, %570 : vector<4x64xi1>, vector<4x64xf32>
    %c4_i32_214 = arith.constant 4 : i32
    %572 = arith.muli %c3_i32_212, %c4_i32_214 : i32
    %573 = arith.index_cast %572 : i32 to index
    %c0_215 = arith.constant 0 : index
    %574 = vector.load %arg13[%573, %c0_215] : memref<32x64xf32, #tpu.memory_space<vmem>>, vector<4x64xf32>
    %575 = arith.addf %574, %571 : vector<4x64xf32>
    %576 = vector.extract_strided_slice %575 {offsets = [0, 0], sizes = [4, 16], strides = [1, 1]} : vector<4x64xf32> to vector<4x16xf32>
    %577 = arith.negf %576 : vector<4x16xf32>
    %578 = math.exp %577 : vector<4x16xf32>
    %cst_216 = arith.constant 1.000000e+00 : f32
    %579 = vector.broadcast %cst_216 : f32 to vector<4x16xf32>
    %580 = arith.addf %579, %578 : vector<4x16xf32>
    %581 = arith.divf %579, %580 : vector<4x16xf32>
    %582 = vector.extract_strided_slice %575 {offsets = [0, 16], sizes = [4, 16], strides = [1, 1]} : vector<4x64xf32> to vector<4x16xf32>
    %583 = arith.negf %582 : vector<4x16xf32>
    %584 = math.exp %583 : vector<4x16xf32>
    %cst_217 = arith.constant 1.000000e+00 : f32
    %585 = vector.broadcast %cst_217 : f32 to vector<4x16xf32>
    %586 = arith.addf %585, %584 : vector<4x16xf32>
    %587 = arith.divf %585, %586 : vector<4x16xf32>
    %588 = vector.extract_strided_slice %575 {offsets = [0, 32], sizes = [4, 16], strides = [1, 1]} : vector<4x64xf32> to vector<4x16xf32>
    %589 = math.tanh %588 : vector<4x16xf32>
    %590 = vector.extract_strided_slice %575 {offsets = [0, 48], sizes = [4, 16], strides = [1, 1]} : vector<4x64xf32> to vector<4x16xf32>
    %591 = arith.negf %590 : vector<4x16xf32>
    %592 = math.exp %591 : vector<4x16xf32>
    %cst_218 = arith.constant 1.000000e+00 : f32
    %593 = vector.broadcast %cst_218 : f32 to vector<4x16xf32>
    %594 = arith.addf %593, %592 : vector<4x16xf32>
    %595 = arith.divf %593, %594 : vector<4x16xf32>
    %596 = arith.mulf %587, %556 : vector<4x16xf32>
    %597 = arith.mulf %581, %589 : vector<4x16xf32>
    %598 = arith.addf %596, %597 : vector<4x16xf32>
    %599 = math.tanh %598 : vector<4x16xf32>
    %600 = arith.mulf %595, %599 : vector<4x16xf32>
    %601 = vector.extract_strided_slice %600 {offsets = [0, 0], sizes = [2, 16], strides = [1, 1]} : vector<4x16xf32> to vector<2x16xf32>
    %c2_i32_219 = arith.constant 2 : i32
    %602 = arith.muli %c3_i32_212, %c2_i32_219 : i32
    %603 = arith.index_cast %602 : i32 to index
    %c0_220 = arith.constant 0 : index
    %604 = vector.load %arg12[%603, %c0_220] : memref<16x32xf32, #tpu.memory_space<vmem>>, vector<2x16xf32>
    tpu.vector_store %arg12[%603, %c0_220], %601 {strides = array<i32>} : memref<16x32xf32, #tpu.memory_space<vmem>>, vector<2x16xf32>,
    %605 = vector.extract_strided_slice %600 {offsets = [2, 0], sizes = [2, 16], strides = [1, 1]} : vector<4x16xf32> to vector<2x16xf32>
    %c7_i32_221 = arith.constant 7 : i32
    %606 = arith.subi %c7_i32_221, %c3_i32_212 : i32
    %c2_i32_222 = arith.constant 2 : i32
    %607 = arith.muli %606, %c2_i32_222 : i32
    %608 = arith.index_cast %607 : i32 to index
    %c16_223 = arith.constant 16 : index
    %609 = vector.load %arg12[%608, %c16_223] : memref<16x32xf32, #tpu.memory_space<vmem>>, vector<2x16xf32>
    tpu.vector_store %arg12[%608, %c16_223], %605 {strides = array<i32>} : memref<16x32xf32, #tpu.memory_space<vmem>>, vector<2x16xf32>,
    %c4_i32_224 = arith.constant 4 : i32
    %cst_225 = arith.constant dense<0.000000e+00> : vector<4x128xf32>
    %610 = tpu.matmul %600, %436, %cst_225 {dimension_numbers = #tpu.dot_dimension_numbers<[1], [0], [0], [1], [0, 0, 1, 1], [], []>} : vector<4x16xf32>, vector<16x128xf32>, vector<4x128xf32> -> vector<4x128xf32>
    %611 = vector.extract_strided_slice %610 {offsets = [0, 0], sizes = [4, 64], strides = [1, 1]} : vector<4x128xf32> to vector<4x64xf32>
    %612 = vector.extract_strided_slice %610 {offsets = [0, 64], sizes = [4, 64], strides = [1, 1]} : vector<4x128xf32> to vector<4x64xf32>
    %613 = arith.select %439, %611, %612 : vector<4x64xi1>, vector<4x64xf32>
    %c4_i32_226 = arith.constant 4 : i32
    %614 = arith.muli %c4_i32_224, %c4_i32_226 : i32
    %615 = arith.index_cast %614 : i32 to index
    %c0_227 = arith.constant 0 : index
    %616 = vector.load %arg13[%615, %c0_227] : memref<32x64xf32, #tpu.memory_space<vmem>>, vector<4x64xf32>
    %617 = arith.addf %616, %613 : vector<4x64xf32>
    %618 = vector.extract_strided_slice %617 {offsets = [0, 0], sizes = [4, 16], strides = [1, 1]} : vector<4x64xf32> to vector<4x16xf32>
    %619 = arith.negf %618 : vector<4x16xf32>
    %620 = math.exp %619 : vector<4x16xf32>
    %cst_228 = arith.constant 1.000000e+00 : f32
    %621 = vector.broadcast %cst_228 : f32 to vector<4x16xf32>
    %622 = arith.addf %621, %620 : vector<4x16xf32>
    %623 = arith.divf %621, %622 : vector<4x16xf32>
    %624 = vector.extract_strided_slice %617 {offsets = [0, 16], sizes = [4, 16], strides = [1, 1]} : vector<4x64xf32> to vector<4x16xf32>
    %625 = arith.negf %624 : vector<4x16xf32>
    %626 = math.exp %625 : vector<4x16xf32>
    %cst_229 = arith.constant 1.000000e+00 : f32
    %627 = vector.broadcast %cst_229 : f32 to vector<4x16xf32>
    %628 = arith.addf %627, %626 : vector<4x16xf32>
    %629 = arith.divf %627, %628 : vector<4x16xf32>
    %630 = vector.extract_strided_slice %617 {offsets = [0, 32], sizes = [4, 16], strides = [1, 1]} : vector<4x64xf32> to vector<4x16xf32>
    %631 = math.tanh %630 : vector<4x16xf32>
    %632 = vector.extract_strided_slice %617 {offsets = [0, 48], sizes = [4, 16], strides = [1, 1]} : vector<4x64xf32> to vector<4x16xf32>
    %633 = arith.negf %632 : vector<4x16xf32>
    %634 = math.exp %633 : vector<4x16xf32>
    %cst_230 = arith.constant 1.000000e+00 : f32
    %635 = vector.broadcast %cst_230 : f32 to vector<4x16xf32>
    %636 = arith.addf %635, %634 : vector<4x16xf32>
    %637 = arith.divf %635, %636 : vector<4x16xf32>
    %638 = arith.mulf %629, %598 : vector<4x16xf32>
    %639 = arith.mulf %623, %631 : vector<4x16xf32>
    %640 = arith.addf %638, %639 : vector<4x16xf32>
    %641 = math.tanh %640 : vector<4x16xf32>
    %642 = arith.mulf %637, %641 : vector<4x16xf32>
    %643 = vector.extract_strided_slice %642 {offsets = [0, 0], sizes = [2, 16], strides = [1, 1]} : vector<4x16xf32> to vector<2x16xf32>
    %c2_i32_231 = arith.constant 2 : i32
    %644 = arith.muli %c4_i32_224, %c2_i32_231 : i32
    %645 = arith.index_cast %644 : i32 to index
    %c0_232 = arith.constant 0 : index
    %646 = vector.load %arg12[%645, %c0_232] : memref<16x32xf32, #tpu.memory_space<vmem>>, vector<2x16xf32>
    tpu.vector_store %arg12[%645, %c0_232], %643 {strides = array<i32>} : memref<16x32xf32, #tpu.memory_space<vmem>>, vector<2x16xf32>,
    %647 = vector.extract_strided_slice %642 {offsets = [2, 0], sizes = [2, 16], strides = [1, 1]} : vector<4x16xf32> to vector<2x16xf32>
    %c7_i32_233 = arith.constant 7 : i32
    %648 = arith.subi %c7_i32_233, %c4_i32_224 : i32
    %c2_i32_234 = arith.constant 2 : i32
    %649 = arith.muli %648, %c2_i32_234 : i32
    %650 = arith.index_cast %649 : i32 to index
    %c16_235 = arith.constant 16 : index
    %651 = vector.load %arg12[%650, %c16_235] : memref<16x32xf32, #tpu.memory_space<vmem>>, vector<2x16xf32>
    tpu.vector_store %arg12[%650, %c16_235], %647 {strides = array<i32>} : memref<16x32xf32, #tpu.memory_space<vmem>>, vector<2x16xf32>,
    %c5_i32_236 = arith.constant 5 : i32
    %cst_237 = arith.constant dense<0.000000e+00> : vector<4x128xf32>
    %652 = tpu.matmul %642, %436, %cst_237 {dimension_numbers = #tpu.dot_dimension_numbers<[1], [0], [0], [1], [0, 0, 1, 1], [], []>} : vector<4x16xf32>, vector<16x128xf32>, vector<4x128xf32> -> vector<4x128xf32>
    %653 = vector.extract_strided_slice %652 {offsets = [0, 0], sizes = [4, 64], strides = [1, 1]} : vector<4x128xf32> to vector<4x64xf32>
    %654 = vector.extract_strided_slice %652 {offsets = [0, 64], sizes = [4, 64], strides = [1, 1]} : vector<4x128xf32> to vector<4x64xf32>
    %655 = arith.select %439, %653, %654 : vector<4x64xi1>, vector<4x64xf32>
    %c4_i32_238 = arith.constant 4 : i32
    %656 = arith.muli %c5_i32_236, %c4_i32_238 : i32
    %657 = arith.index_cast %656 : i32 to index
    %c0_239 = arith.constant 0 : index
    %658 = vector.load %arg13[%657, %c0_239] : memref<32x64xf32, #tpu.memory_space<vmem>>, vector<4x64xf32>
    %659 = arith.addf %658, %655 : vector<4x64xf32>
    %660 = vector.extract_strided_slice %659 {offsets = [0, 0], sizes = [4, 16], strides = [1, 1]} : vector<4x64xf32> to vector<4x16xf32>
    %661 = arith.negf %660 : vector<4x16xf32>
    %662 = math.exp %661 : vector<4x16xf32>
    %cst_240 = arith.constant 1.000000e+00 : f32
    %663 = vector.broadcast %cst_240 : f32 to vector<4x16xf32>
    %664 = arith.addf %663, %662 : vector<4x16xf32>
    %665 = arith.divf %663, %664 : vector<4x16xf32>
    %666 = vector.extract_strided_slice %659 {offsets = [0, 16], sizes = [4, 16], strides = [1, 1]} : vector<4x64xf32> to vector<4x16xf32>
    %667 = arith.negf %666 : vector<4x16xf32>
    %668 = math.exp %667 : vector<4x16xf32>
    %cst_241 = arith.constant 1.000000e+00 : f32
    %669 = vector.broadcast %cst_241 : f32 to vector<4x16xf32>
    %670 = arith.addf %669, %668 : vector<4x16xf32>
    %671 = arith.divf %669, %670 : vector<4x16xf32>
    %672 = vector.extract_strided_slice %659 {offsets = [0, 32], sizes = [4, 16], strides = [1, 1]} : vector<4x64xf32> to vector<4x16xf32>
    %673 = math.tanh %672 : vector<4x16xf32>
    %674 = vector.extract_strided_slice %659 {offsets = [0, 48], sizes = [4, 16], strides = [1, 1]} : vector<4x64xf32> to vector<4x16xf32>
    %675 = arith.negf %674 : vector<4x16xf32>
    %676 = math.exp %675 : vector<4x16xf32>
    %cst_242 = arith.constant 1.000000e+00 : f32
    %677 = vector.broadcast %cst_242 : f32 to vector<4x16xf32>
    %678 = arith.addf %677, %676 : vector<4x16xf32>
    %679 = arith.divf %677, %678 : vector<4x16xf32>
    %680 = arith.mulf %671, %640 : vector<4x16xf32>
    %681 = arith.mulf %665, %673 : vector<4x16xf32>
    %682 = arith.addf %680, %681 : vector<4x16xf32>
    %683 = math.tanh %682 : vector<4x16xf32>
    %684 = arith.mulf %679, %683 : vector<4x16xf32>
    %685 = vector.extract_strided_slice %684 {offsets = [0, 0], sizes = [2, 16], strides = [1, 1]} : vector<4x16xf32> to vector<2x16xf32>
    %c2_i32_243 = arith.constant 2 : i32
    %686 = arith.muli %c5_i32_236, %c2_i32_243 : i32
    %687 = arith.index_cast %686 : i32 to index
    %c0_244 = arith.constant 0 : index
    %688 = vector.load %arg12[%687, %c0_244] : memref<16x32xf32, #tpu.memory_space<vmem>>, vector<2x16xf32>
    tpu.vector_store %arg12[%687, %c0_244], %685 {strides = array<i32>} : memref<16x32xf32, #tpu.memory_space<vmem>>, vector<2x16xf32>,
    %689 = vector.extract_strided_slice %684 {offsets = [2, 0], sizes = [2, 16], strides = [1, 1]} : vector<4x16xf32> to vector<2x16xf32>
    %c7_i32_245 = arith.constant 7 : i32
    %690 = arith.subi %c7_i32_245, %c5_i32_236 : i32
    %c2_i32_246 = arith.constant 2 : i32
    %691 = arith.muli %690, %c2_i32_246 : i32
    %692 = arith.index_cast %691 : i32 to index
    %c16_247 = arith.constant 16 : index
    %693 = vector.load %arg12[%692, %c16_247] : memref<16x32xf32, #tpu.memory_space<vmem>>, vector<2x16xf32>
    tpu.vector_store %arg12[%692, %c16_247], %689 {strides = array<i32>} : memref<16x32xf32, #tpu.memory_space<vmem>>, vector<2x16xf32>,
    %c6_i32_248 = arith.constant 6 : i32
    %cst_249 = arith.constant dense<0.000000e+00> : vector<4x128xf32>
    %694 = tpu.matmul %684, %436, %cst_249 {dimension_numbers = #tpu.dot_dimension_numbers<[1], [0], [0], [1], [0, 0, 1, 1], [], []>} : vector<4x16xf32>, vector<16x128xf32>, vector<4x128xf32> -> vector<4x128xf32>
    %695 = vector.extract_strided_slice %694 {offsets = [0, 0], sizes = [4, 64], strides = [1, 1]} : vector<4x128xf32> to vector<4x64xf32>
    %696 = vector.extract_strided_slice %694 {offsets = [0, 64], sizes = [4, 64], strides = [1, 1]} : vector<4x128xf32> to vector<4x64xf32>
    %697 = arith.select %439, %695, %696 : vector<4x64xi1>, vector<4x64xf32>
    %c4_i32_250 = arith.constant 4 : i32
    %698 = arith.muli %c6_i32_248, %c4_i32_250 : i32
    %699 = arith.index_cast %698 : i32 to index
    %c0_251 = arith.constant 0 : index
    %700 = vector.load %arg13[%699, %c0_251] : memref<32x64xf32, #tpu.memory_space<vmem>>, vector<4x64xf32>
    %701 = arith.addf %700, %697 : vector<4x64xf32>
    %702 = vector.extract_strided_slice %701 {offsets = [0, 0], sizes = [4, 16], strides = [1, 1]} : vector<4x64xf32> to vector<4x16xf32>
    %703 = arith.negf %702 : vector<4x16xf32>
    %704 = math.exp %703 : vector<4x16xf32>
    %cst_252 = arith.constant 1.000000e+00 : f32
    %705 = vector.broadcast %cst_252 : f32 to vector<4x16xf32>
    %706 = arith.addf %705, %704 : vector<4x16xf32>
    %707 = arith.divf %705, %706 : vector<4x16xf32>
    %708 = vector.extract_strided_slice %701 {offsets = [0, 16], sizes = [4, 16], strides = [1, 1]} : vector<4x64xf32> to vector<4x16xf32>
    %709 = arith.negf %708 : vector<4x16xf32>
    %710 = math.exp %709 : vector<4x16xf32>
    %cst_253 = arith.constant 1.000000e+00 : f32
    %711 = vector.broadcast %cst_253 : f32 to vector<4x16xf32>
    %712 = arith.addf %711, %710 : vector<4x16xf32>
    %713 = arith.divf %711, %712 : vector<4x16xf32>
    %714 = vector.extract_strided_slice %701 {offsets = [0, 32], sizes = [4, 16], strides = [1, 1]} : vector<4x64xf32> to vector<4x16xf32>
    %715 = math.tanh %714 : vector<4x16xf32>
    %716 = vector.extract_strided_slice %701 {offsets = [0, 48], sizes = [4, 16], strides = [1, 1]} : vector<4x64xf32> to vector<4x16xf32>
    %717 = arith.negf %716 : vector<4x16xf32>
    %718 = math.exp %717 : vector<4x16xf32>
    %cst_254 = arith.constant 1.000000e+00 : f32
    %719 = vector.broadcast %cst_254 : f32 to vector<4x16xf32>
    %720 = arith.addf %719, %718 : vector<4x16xf32>
    %721 = arith.divf %719, %720 : vector<4x16xf32>
    %722 = arith.mulf %713, %682 : vector<4x16xf32>
    %723 = arith.mulf %707, %715 : vector<4x16xf32>
    %724 = arith.addf %722, %723 : vector<4x16xf32>
    %725 = math.tanh %724 : vector<4x16xf32>
    %726 = arith.mulf %721, %725 : vector<4x16xf32>
    %727 = vector.extract_strided_slice %726 {offsets = [0, 0], sizes = [2, 16], strides = [1, 1]} : vector<4x16xf32> to vector<2x16xf32>
    %c2_i32_255 = arith.constant 2 : i32
    %728 = arith.muli %c6_i32_248, %c2_i32_255 : i32
    %729 = arith.index_cast %728 : i32 to index
    %c0_256 = arith.constant 0 : index
    %730 = vector.load %arg12[%729, %c0_256] : memref<16x32xf32, #tpu.memory_space<vmem>>, vector<2x16xf32>
    tpu.vector_store %arg12[%729, %c0_256], %727 {strides = array<i32>} : memref<16x32xf32, #tpu.memory_space<vmem>>, vector<2x16xf32>,
    %731 = vector.extract_strided_slice %726 {offsets = [2, 0], sizes = [2, 16], strides = [1, 1]} : vector<4x16xf32> to vector<2x16xf32>
    %c7_i32_257 = arith.constant 7 : i32
    %732 = arith.subi %c7_i32_257, %c6_i32_248 : i32
    %c2_i32_258 = arith.constant 2 : i32
    %733 = arith.muli %732, %c2_i32_258 : i32
    %734 = arith.index_cast %733 : i32 to index
    %c16_259 = arith.constant 16 : index
    %735 = vector.load %arg12[%734, %c16_259] : memref<16x32xf32, #tpu.memory_space<vmem>>, vector<2x16xf32>
    tpu.vector_store %arg12[%734, %c16_259], %731 {strides = array<i32>} : memref<16x32xf32, #tpu.memory_space<vmem>>, vector<2x16xf32>,
    %c7_i32_260 = arith.constant 7 : i32
    %cst_261 = arith.constant dense<0.000000e+00> : vector<4x128xf32>
    %736 = tpu.matmul %726, %436, %cst_261 {dimension_numbers = #tpu.dot_dimension_numbers<[1], [0], [0], [1], [0, 0, 1, 1], [], []>} : vector<4x16xf32>, vector<16x128xf32>, vector<4x128xf32> -> vector<4x128xf32>
    %737 = vector.extract_strided_slice %736 {offsets = [0, 0], sizes = [4, 64], strides = [1, 1]} : vector<4x128xf32> to vector<4x64xf32>
    %738 = vector.extract_strided_slice %736 {offsets = [0, 64], sizes = [4, 64], strides = [1, 1]} : vector<4x128xf32> to vector<4x64xf32>
    %739 = arith.select %439, %737, %738 : vector<4x64xi1>, vector<4x64xf32>
    %c4_i32_262 = arith.constant 4 : i32
    %740 = arith.muli %c7_i32_260, %c4_i32_262 : i32
    %741 = arith.index_cast %740 : i32 to index
    %c0_263 = arith.constant 0 : index
    %742 = vector.load %arg13[%741, %c0_263] : memref<32x64xf32, #tpu.memory_space<vmem>>, vector<4x64xf32>
    %743 = arith.addf %742, %739 : vector<4x64xf32>
    %744 = vector.extract_strided_slice %743 {offsets = [0, 0], sizes = [4, 16], strides = [1, 1]} : vector<4x64xf32> to vector<4x16xf32>
    %745 = arith.negf %744 : vector<4x16xf32>
    %746 = math.exp %745 : vector<4x16xf32>
    %cst_264 = arith.constant 1.000000e+00 : f32
    %747 = vector.broadcast %cst_264 : f32 to vector<4x16xf32>
    %748 = arith.addf %747, %746 : vector<4x16xf32>
    %749 = arith.divf %747, %748 : vector<4x16xf32>
    %750 = vector.extract_strided_slice %743 {offsets = [0, 16], sizes = [4, 16], strides = [1, 1]} : vector<4x64xf32> to vector<4x16xf32>
    %751 = arith.negf %750 : vector<4x16xf32>
    %752 = math.exp %751 : vector<4x16xf32>
    %cst_265 = arith.constant 1.000000e+00 : f32
    %753 = vector.broadcast %cst_265 : f32 to vector<4x16xf32>
    %754 = arith.addf %753, %752 : vector<4x16xf32>
    %755 = arith.divf %753, %754 : vector<4x16xf32>
    %756 = vector.extract_strided_slice %743 {offsets = [0, 32], sizes = [4, 16], strides = [1, 1]} : vector<4x64xf32> to vector<4x16xf32>
    %757 = math.tanh %756 : vector<4x16xf32>
    %758 = vector.extract_strided_slice %743 {offsets = [0, 48], sizes = [4, 16], strides = [1, 1]} : vector<4x64xf32> to vector<4x16xf32>
    %759 = arith.negf %758 : vector<4x16xf32>
    %760 = math.exp %759 : vector<4x16xf32>
    %cst_266 = arith.constant 1.000000e+00 : f32
    %761 = vector.broadcast %cst_266 : f32 to vector<4x16xf32>
    %762 = arith.addf %761, %760 : vector<4x16xf32>
    %763 = arith.divf %761, %762 : vector<4x16xf32>
    %764 = arith.mulf %755, %724 : vector<4x16xf32>
    %765 = arith.mulf %749, %757 : vector<4x16xf32>
    %766 = arith.addf %764, %765 : vector<4x16xf32>
    %767 = math.tanh %766 : vector<4x16xf32>
    %768 = arith.mulf %763, %767 : vector<4x16xf32>
    %769 = vector.extract_strided_slice %768 {offsets = [0, 0], sizes = [2, 16], strides = [1, 1]} : vector<4x16xf32> to vector<2x16xf32>
    %c2_i32_267 = arith.constant 2 : i32
    %770 = arith.muli %c7_i32_260, %c2_i32_267 : i32
    %771 = arith.index_cast %770 : i32 to index
    %c0_268 = arith.constant 0 : index
    %772 = vector.load %arg12[%771, %c0_268] : memref<16x32xf32, #tpu.memory_space<vmem>>, vector<2x16xf32>
    tpu.vector_store %arg12[%771, %c0_268], %769 {strides = array<i32>} : memref<16x32xf32, #tpu.memory_space<vmem>>, vector<2x16xf32>,
    %773 = vector.extract_strided_slice %768 {offsets = [2, 0], sizes = [2, 16], strides = [1, 1]} : vector<4x16xf32> to vector<2x16xf32>
    %c7_i32_269 = arith.constant 7 : i32
    %774 = arith.subi %c7_i32_269, %c7_i32_260 : i32
    %c2_i32_270 = arith.constant 2 : i32
    %775 = arith.muli %774, %c2_i32_270 : i32
    %776 = arith.index_cast %775 : i32 to index
    %c16_271 = arith.constant 16 : index
    %777 = vector.load %arg12[%776, %c16_271] : memref<16x32xf32, #tpu.memory_space<vmem>>, vector<2x16xf32>
    tpu.vector_store %arg12[%776, %c16_271], %773 {strides = array<i32>} : memref<16x32xf32, #tpu.memory_space<vmem>>, vector<2x16xf32>,
    %c8_i32_272 = arith.constant 8 : i32
    %c0_273 = arith.constant 0 : index
    %778 = memref.load %arg0[%c0_273] : memref<2xi32, #tpu.memory_space<smem>>
    %c1_i32_274 = arith.constant 1 : i32
    %c8_i32_275 = arith.constant 8 : i32
    %779 = arith.maxsi %c1_i32_274, %778 : i32
    %780 = arith.minsi %c8_i32_275, %779 : i32
    %c1_i32_276 = arith.constant 1 : i32
    %781 = arith.subi %780, %c1_i32_276 : i32
    %c2_i32_277 = arith.constant 2 : i32
    %782 = arith.muli %781, %c2_i32_277 : i32
    %c0_i32_278 = arith.constant 0 : i32
    %783 = arith.addi %782, %c0_i32_278 : i32
    %784 = arith.index_cast %783 : i32 to index
    %c0_279 = arith.constant 0 : index
    %785 = vector.load %arg12[%784, %c0_279] : memref<16x32xf32, #tpu.memory_space<vmem>>, vector<1x32xf32>
    %c1_280 = arith.constant 1 : index
    %786 = memref.load %arg0[%c1_280] : memref<2xi32, #tpu.memory_space<smem>>
    %c1_i32_281 = arith.constant 1 : i32
    %c8_i32_282 = arith.constant 8 : i32
    %787 = arith.maxsi %c1_i32_281, %786 : i32
    %788 = arith.minsi %c8_i32_282, %787 : i32
    %c1_i32_283 = arith.constant 1 : i32
    %789 = arith.subi %788, %c1_i32_283 : i32
    %c2_i32_284 = arith.constant 2 : i32
    %790 = arith.muli %789, %c2_i32_284 : i32
    %c1_i32_285 = arith.constant 1 : i32
    %791 = arith.addi %790, %c1_i32_285 : i32
    %792 = arith.index_cast %791 : i32 to index
    %c0_286 = arith.constant 0 : index
    %793 = vector.load %arg12[%792, %c0_286] : memref<16x32xf32, #tpu.memory_space<vmem>>, vector<1x32xf32>
    %794 = tpu.concatenate %785, %793 in 0 : vector<1x32xf32>, vector<1x32xf32> -> vector<2x32xf32>
    %c0_287 = arith.constant 0 : index
    %c0_288 = arith.constant 0 : index
    %795 = vector.load %arg12[%c0_287, %c0_288] : memref<16x32xf32, #tpu.memory_space<vmem>>, vector<2x32xf32>
    %796 = arith.addf %795, %794 : vector<2x32xf32>
    %cst_289 = arith.constant 5.000000e-01 : f32
    %797 = vector.broadcast %cst_289 : f32 to vector<2x32xf32>
    %798 = arith.mulf %796, %797 : vector<2x32xf32>
    %c0_290 = arith.constant 0 : index
    %c0_291 = arith.constant 0 : index
    %799 = vector.load %arg8[%c0_290, %c0_291] : memref<32x8xf32, #tpu.memory_space<vmem>>, vector<32x8xf32>
    %cst_292 = arith.constant dense<0.000000e+00> : vector<2x8xf32>
    %800 = tpu.matmul %798, %799, %cst_292 {dimension_numbers = #tpu.dot_dimension_numbers<[1], [0], [0], [1], [0, 0, 1, 1], [], []>} : vector<2x32xf32>, vector<32x8xf32>, vector<2x8xf32> -> vector<2x8xf32>
    %c0_293 = arith.constant 0 : index
    %c0_294 = arith.constant 0 : index
    %801 = vector.load %arg9[%c0_293, %c0_294] : memref<1x8xf32, #tpu.memory_space<vmem>>, vector<1x8xf32>
    %802 = vector.broadcast %801 : vector<1x8xf32> to vector<2x8xf32>
    %803 = arith.addf %800, %802 : vector<2x8xf32>
    %c0_295 = arith.constant 0 : index
    %c0_296 = arith.constant 0 : index
    %804 = vector.load %arg10[%c0_295, %c0_296] : memref<2x8xf32, #tpu.memory_space<vmem>>, vector<2x8xf32>
    tpu.vector_store %arg10[%c0_295, %c0_296], %803 {strides = array<i32>} : memref<2x8xf32, #tpu.memory_space<vmem>>, vector<2x8xf32>,
    return
  }
}

</mosaic_0001>

<bundles_post_ra>
// kernel: sim_predictor_forward.3
= control target key start
LH: loop header
LB: loop body
LE: loop exit
PB: predicated region body
PF: predicated region fallthrough
CT: control target
= control target key end

     0   :  { %14 = vsyncpa [#allocation5], 0  ;;  %s2829_s30 = smov [#allocation4]   ;;  %s4035_s0 = inlined_call_operand.vmem [shape: f32[32,64], index: 0, kind: input, shape index: {}]   ;;  %s4036_s1 = inlined_call_operand.hbm [shape: f32[5,80,128], index: 1, kind: input, shape index: {}]   ;;  %s4037_s2 = inlined_call_operand.vmem [shape: f32[1,128], index: 2, kind: input, shape index: {}]   ;;  %s4038_s3 = inlined_call_operand.vmem [shape: f32[1,8], index: 3, kind: input, shape index: {}]   ;;  %s4039_s4 = inlined_call_operand.vmem [shape: f32[1,8], index: 4, kind: input, shape index: {}]   ;;  %s4040_s5 = inlined_call_operand.vmem [shape: f32[128,8], index: 5, kind: input, shape index: {}]   ;;  %s4041_s6 = inlined_call_operand.vmem [shape: f32[8,128], index: 6, kind: input, shape index: {}]   ;;  %s4042_s7 = inlined_call_operand.vmem [shape: f32[3,144,128], index: 7, kind: input, shape index: {}]   ;;  %s4043_s8 = inlined_call_operand.vmem [shape: f32[1,128], index: 8, kind: input, shape index: {}]   ;;  %s4044_s9 = inlined_call_operand.vmem [shape: f32[32,128], index: 9, kind: output, shape index: {}]  }
   0x1   :  { %s22_s10 = sshll.u32 %s2829_s30, 4  ;;  %s23_s10 = int_to_ptr.vmem [resolvable:$true] %s22_s10 }
   0x2   :  { %s2815_s11 = scalar_lea.vmem %s23_s10, 6400  ;;  %p2820_p1 = scmp.lt.s32.totalorder %s23_s10, %s23_s10 }
   0x3   :  { %p2816_p0 = scmp.ne.s32.totalorder %s23_s10, %s2815_s11  ;;  %p2821_p2 = scmp.lt.s32.totalorder %s2815_s11, %s2815_s11 }
   0x5   :  { %p2822_p3 = por %p2821_p2, %p2820_p1 }
   0x7   :  { %p2823_p4 = pnand %p2822_p3, %p2816_p0 }
   0x9   :  { %2826 = shalt.err (!%p2823_p4)
}
   0xa   :  { %s2830_s12 = smov 128   ;;  %s2831_s13 = smov 8  }
   0xb   :  { %28 = dma.hbm_to_vmem [thread:$0]  %s4036_s1, 6400, %s23_s10, [#allocation5], %s2830_s12, %s2830_s12, %s2831_s13  }
   0xc   :  { %2827 = dma.done.wait [#allocation5], 6400  }
   0xd   :  { %2828 = vsyncadd [#allocation5], 4294960896  ;;  %vm46_vm0 = vcmask 654336   ;;  %v2832_v0 = vmov 0.0   ;;  %v52_v1 = vld [vmem:[%s4035_s0] sm:$0xff]  ;;  %v65_v2 = vld [vmem:[%s4035_s0 + $0x10] sm:$0xff] }
   0xe   :  { %47 = vst.msk [vmem:[#allocation2] sm:$0xff] %vm46_vm0, %v2832_v0  ;;  %48 = vst.msk [vmem:[#allocation2 + $0x8] sm:$0xff] %vm46_vm0, %v2832_v0  ;;  %56 = vrot.lane.b32.xlu0 %v52_v1, %s2831_s13  ;;  %v53_v3 = vld [vmem:[%s4035_s0 + $0x8] sm:$0xff]  ;;  %69 = vrot.lane.b32.xlu1 %v65_v2, %s2831_s13  ;;  %v2914_v4 = vld [vmem:[#allocation4 + $0x98] sm:$0xff]  ;;  %vm62_vm1 = vcmask 588864   ;;  %vm2833_vm2 = vmmov 0  }
   0xf   :  { %49 = vst.msk [vmem:[#allocation2 + $0x10] sm:$0xff] %vm46_vm0, %v2832_v0  ;;  %50 = vst.msk [vmem:[#allocation2 + $0x18] sm:$0xff] %vm46_vm0, %v2832_v0  ;;  %v2916_v5 = vld [vmem:[#allocation4 + $0x48] sm:$0xff]  ;;  %v66_v6 = vld [vmem:[%s4035_s0 + $0x18] sm:$0xff]  ;;  %2476 = vmatprep.subr.mxu0 %v2914_v4  ;;  %vm1082_vm3 = vcmask 64512   ;;  %vm1422_vm4 = vcmask 130048  }
  0x10   :  { %51 = vst.msk [vmem:[#allocation2 + $0x20] sm:$0xff] %vm46_vm0, %v2832_v0  ;;  %1421 = vst [vmem:[#allocation3] sm:$0xff] %v2832_v0  ;;  %2499 = vmatprep.subr.mxu1 %v2916_v5  ;;  %v2923_v7 = vld [vmem:[#allocation4 + $0x90] sm:$0xff]  ;;  %v2925_v8 = vld [vmem:[#allocation4 + $0x40] sm:$0xff]  ;;  %2477 = vmatpush3.msra.mxu0 %v2914_v4  ;;  %vm1431_vm5 = vcmask 125952   ;;  %vm1435_vm6 = vcmask 1040384  }
  0x11   :  { %1424 = vst [vmem:[#allocation3 + $0x10] sm:$0xff] %v2832_v0  ;;  %1426 = vst [vmem:[#allocation3 + $0x20] sm:$0xff] %v2832_v0  ;;  %2500 = vmatpush3.msra.mxu1 %v2916_v5  ;;  %2478 = vmatprep.subr.mxu0 %v2923_v7  ;;  %v2931_v9 = vld [vmem:[#allocation4 + $0x88] sm:$0xff]  ;;  %v2933_v10 = vld [vmem:[#allocation4 + $0x38] sm:$0xff]  ;;  %vm1461_vm7 = vcmask 1042432   ;;  %vm1448_vm8 = vcmask 1047617  }
  0x12   :  { %1428 = vst [vmem:[#allocation3 + $0x30] sm:$0xff] %v2832_v0  ;;  %1430 = vst [vmem:[#allocation3 + $0x40] sm:$0xf] %v2832_v0  ;;  %2501 = vmatprep.subr.mxu1 %v2925_v8  ;;  %58 = vrot.lane.b32.xlu0 %v53_v3, %s2831_s13  ;;  %v2939_v11 = vld [vmem:[#allocation4 + $0x80] sm:$0xff]  ;;  %v2941_v12 = vld [vmem:[#allocation4 + $0x30] sm:$0xff]  ;;  %vm1450_vm9 = vcmask 64513  }
  0x13   :  { %71 = vrot.lane.b32.xlu1 %v66_v6, %s2831_s13  ;;  %2479 = vmatpush3.msra.mxu0 %v2923_v7  ;;  %v2947_v13 = vld [vmem:[#allocation4 + $0x78] sm:$0xff]  ;;  %v2949_v14 = vld [vmem:[#allocation4 + $0x28] sm:$0xff]  ;;  %v2955_v15 = vld [vmem:[#allocation4 + $0x70] sm:$0xff]  ;;  %1423 = vst.msk [vmem:[#allocation3 + $0x8] sm:$0xff] %vm1422_vm4, %v2832_v0  ;;  %vm1452_vm10 = vcmask 1047616   ;;  %vm1455_vm11 = vcmask 1040448  }
  0x14   :  { %2502 = vmatpush3.msra.mxu1 %v2925_v8  ;;  %2480 = vmatprep.subr.mxu0 %v2931_v9  ;;  %v2957_v16 = vld [vmem:[#allocation4 + $0x20] sm:$0xff]  ;;  %v2963_v17 = vld [vmem:[#allocation4 + $0x68] sm:$0xff]  ;;  %v2965_v18 = vld [vmem:[#allocation4 + $0x18] sm:$0xff]  ;;  %1425 = vst.msk [vmem:[#allocation3 + $0x18] sm:$0xff] %vm1422_vm4, %v2832_v0  ;;  %vm1457_vm12 = vcmask 57344   ;;  %vm1474_vm13 = vcmask 1047619  }
  0x15   :  { %2503 = vmatprep.subr.mxu1 %v2933_v10  ;;  %2481 = vmatpush3.msra.mxu0 %v2931_v9  ;;  %v2971_v19 = vld [vmem:[#allocation4 + $0x60] sm:$0xff]  ;;  %v2973_v20 = vld [vmem:[#allocation4 + $0x10] sm:$0xff]  ;;  %v2979_v21 = vld [vmem:[#allocation4 + $0x58] sm:$0xff]  ;;  %1427 = vst.msk [vmem:[#allocation3 + $0x28] sm:$0xff] %vm1422_vm4, %v2832_v0  ;;  %vm1476_vm14 = vcmask 64515   ;;  %vm1480_vm15 = vcmask 1042496  }
  0x16   :  { %2504 = vmatpush3.msra.mxu1 %v2933_v10  ;;  %2482 = vmatprep.subr.mxu0 %v2939_v11  ;;  %v2981_v22 = vld [vmem:[#allocation4 + $0x8] sm:$0xff]  ;;  %v2987_v23 = vld [vmem:[#allocation4 + $0x50] sm:$0xff]  ;;  %v2989_v24 = vld [vmem:[#allocation4] sm:$0xff]  ;;  %1429 = vst.msk [vmem:[#allocation3 + $0x38] sm:$0xff] %vm1422_vm4, %v2832_v0 }
  0x17   :  { %2505 = vmatprep.subr.mxu1 %v2941_v12  ;;  %2483 = vmatpush3.msra.mxu0 %v2939_v11  ;;  %v2995_v25 = vld [vmem:[#allocation4 + $0xe8] sm:$0xff]  ;;  %v2997_v26 = vld [vmem:[#allocation4 + $0x138] sm:$0xff]  ;;  %v3007_v35 = vld [vmem:[#allocation4 + $0xe0] sm:$0xff] }
  0x18   :  { %2506 = vmatpush3.msra.mxu1 %v2941_v12  ;;  %2484 = vmatprep.subr.mxu0 %v2947_v13  ;;  %v3011_v36 = vld [vmem:[#allocation4 + $0x130] sm:$0xff]  ;;  %v3017_v39 = vld [vmem:[#allocation4 + $0xd8] sm:$0xff]  ;;  %v3019_v40 = vld [vmem:[#allocation4 + $0x128] sm:$0xff] }
  0x19   :  { %2507 = vmatprep.subr.mxu1 %v2949_v14  ;;  %2485 = vmatpush3.msra.mxu0 %v2947_v13  ;;  %v3025_v41 = vld [vmem:[#allocation4 + $0xd0] sm:$0xff]  ;;  %v3027_v42 = vld [vmem:[#allocation4 + $0x120] sm:$0xff]  ;;  %v3033_v43 = vld [vmem:[#allocation4 + $0xc8] sm:$0xff] }
  0x1a   :  { %2508 = vmatpush3.msra.mxu1 %v2949_v14  ;;  %2486 = vmatprep.subr.mxu0 %v2955_v15  ;;  %v3035_v44 = vld [vmem:[#allocation4 + $0x118] sm:$0xff]  ;;  %v3041_v45 = vld [vmem:[#allocation4 + $0xc0] sm:$0xff]  ;;  %v3043_v46 = vld [vmem:[#allocation4 + $0x110] sm:$0xff] }
  0x1b   :  { %2509 = vmatprep.subr.mxu1 %v2957_v16  ;;  %2487 = vmatpush3.msra.mxu0 %v2955_v15  ;;  %v3049_v47 = vld [vmem:[#allocation4 + $0xb8] sm:$0xff]  ;;  %v3051_v48 = vld [vmem:[#allocation4 + $0x108] sm:$0xff]  ;;  %v3057_v49 = vld [vmem:[#allocation4 + $0xb0] sm:$0xff] }
  0x1c   :  { %2510 = vmatpush3.msra.mxu1 %v2957_v16  ;;  %2488 = vmatprep.subr.mxu0 %v2963_v17  ;;  %v3059_v50 = vld [vmem:[#allocation4 + $0x100] sm:$0xff]  ;;  %v3065_v51 = vld [vmem:[#allocation4 + $0xa8] sm:$0xff]  ;;  %v3067_v52 = vld [vmem:[#allocation4 + $0xf8] sm:$0xff] }
  0x1d   :  { %2511 = vmatprep.subr.mxu1 %v2965_v18  ;;  %2489 = vmatpush3.msra.mxu0 %v2963_v17  ;;  %v3073_v53 = vld [vmem:[#allocation4 + $0xa0] sm:$0xff]  ;;  %v3075_v54 = vld [vmem:[#allocation4 + $0xf0] sm:$0xff]  ;;  %v3083_v55 = vld [vmem:[#allocation4 + $0x188] sm:$0xff] }
  0x1e   :  { %2512 = vmatpush3.msra.mxu1 %v2965_v18  ;;  %2490 = vmatprep.subr.mxu0 %v2971_v19  ;;  %v3089_v58 = vld [vmem:[#allocation4 + $0x180] sm:$0xff]  ;;  %v3095_v60 = vld [vmem:[#allocation4 + $0x178] sm:$0xff]  ;;  %v3101_v61 = vld [vmem:[#allocation4 + $0x170] sm:$0xff] }
  0x1f   :  { %2513 = vmatprep.subr.mxu1 %v2973_v20  ;;  %2491 = vmatpush3.msra.mxu0 %v2971_v19  ;;  %v3107_v62 = vld [vmem:[#allocation4 + $0x168] sm:$0xff]  ;;  %v3113_v63 = vld [vmem:[#allocation4 + $0x160] sm:$0xff]  ;;  %v3119_v1 = vld [vmem:[#allocation4 + $0x158] sm:$0xff] }
  0x20   :  { %2514 = vmatpush3.msra.mxu1 %v2973_v20  ;;  %2492 = vmatprep.subr.mxu0 %v2979_v21  ;;  %v3125_v2 = vld [vmem:[#allocation4 + $0x150] sm:$0xff]  ;;  %v3131_v3 = vld [vmem:[#allocation4 + $0x148] sm:$0xff] }
  0x21   :  { %2515 = vmatprep.subr.mxu1 %v2981_v22  ;;  %2493 = vmatpush3.msra.mxu0 %v2979_v21 }
  0x22   :  { %2516 = vmatpush3.msra.mxu1 %v2981_v22  ;;  %2494 = vmatprep.subr.mxu0 %v2987_v23 }
  0x23   :  { %2517 = vmatprep.subr.mxu1 %v2989_v24  ;;  %2495 = vmatpush3.msra.mxu0 %v2987_v23 }
  0x24   :  { %2518 = vmatpush3.msra.mxu1 %v2989_v24  ;;  %2522 = vmatprep.subr.mxu0 %v2995_v25 }
  0x25   :  { %2545 = vmatprep.subr.mxu1 %v2997_v26 }
  0x80   :  { %v57_v27 = vpop.permute.xlu0 %56  ;;  %v70_v28 = vpop.permute.xlu1 %69 }
  0x81   :  { %63 = vst.msk [vmem:[#allocation2 + $0x2] sm:$0xff] %vm62_vm1, %v57_v27  ;;  %75 = vst.msk [vmem:[#allocation2 + $0x16] sm:$0xff] %vm62_vm1, %v70_v28  ;;  %v3321_v27 = vld [vmem:[%s4040_s5 + $0x20] sm:$0xff]  ;;  %v3326_v28 = vld [vmem:[%s4040_s5 + $0x18] sm:$0xff] }
  0x84   :  { %v59_v29 = vpop.permute.xlu0 %58 }
  0x85   :  { %v72_v30 = vpop.permute.xlu1 %71  ;;  %64 = vst.msk [vmem:[#allocation2 + $0xa] sm:$0xff] %vm62_vm1, %v59_v29  ;;  %v3335_v29 = vld [vmem:[%s4040_s5 + $0x10] sm:$0xff] }
  0x86   :  { %76 = vst.msk [vmem:[#allocation2 + $0x1e] sm:$0xff] %vm62_vm1, %v72_v30  ;;  %v3344_v30 = vld [vmem:[%s4040_s5 + $0x8] sm:$0xff]  ;;  %vm1536_vm1 = vcmask 1046528  }
  0x88   :  { %v90_v31 = vld [vmem:[#allocation2 + $0x1] sm:$0xff]  ;;  %v563_v6 = vld [vmem:[#allocation2 + $0x15] sm:$0xff] }
  0x89   :  { %v78_v32 = vld [vmem:[#allocation2] sm:$0xff]  ;;  %2496 = vmatprep.mubr.msk.f32.mxu0 %vm46_vm0, %v90_v31 }
  0x8a   :  { %2519 = vmatprep.mubr.msk.f32.mxu1 %vm46_vm0, %v78_v32  ;;  %v265_v38 = vld [vmem:[#allocation2 + $0x2] sm:$0xff] }
  0x8b   :  { %v3351_v31 = vld [vmem:[%s4040_s5] sm:$0xff] }
  0x8c   :  { %v91_v33 = vld [vmem:[#allocation2 + $0x9] sm:$0xff]  ;;  %v3359_v32 = vld [vmem:[%s4041_s6] sm:$0xff] }
  0x8d   :  { %v79_v34 = vld [vmem:[#allocation2 + $0x8] sm:$0xff]  ;;  %2497 = vmatmul.mubr.msk.f32.vlgmr.msra.gmra.mxu0 %vm46_vm0, %v91_v33 }
  0x8e   :  { %2520 = vmatmul.mubr.msk.f32.vlgmr.msra.gmra.mxu1 %vm46_vm0, %v79_v34  ;;  %v361_v37 = vld [vmem:[#allocation2 + $0x3] sm:$0xff]  ;;  %2523 = vmatpush3.msra.mxu0 %v2995_v25  ;;  %v362_v57 = vld [vmem:[#allocation2 + $0xb] sm:$0xff] }
  0x8f   :  { %2546 = vmatpush3.msra.mxu1 %v2997_v26  ;;  %2524 = vmatprep.subr.mxu0 %v3007_v35  ;;  %v266_v56 = vld [vmem:[#allocation2 + $0xa] sm:$0xff] }
  0x90   :  { %2542 = vmatprep.mubr.msk.f32.mxu0 %vm46_vm0, %v265_v38  ;;  %2547 = vmatprep.subr.mxu1 %v3011_v36  ;;  %v457_v59 = vld [vmem:[#allocation2 + $0x4] sm:$0xff] }
  0x91   :  { %2565 = vmatprep.mubr.msk.f32.mxu1 %vm46_vm0, %v361_v37  ;;  %2525 = vmatpush3.msra.mxu0 %v3007_v35 }
  0x92   :  { %2548 = vmatpush3.msra.mxu1 %v3011_v36  ;;  %2526 = vmatprep.subr.mxu0 %v3017_v39 }
  0x93   :  { %2549 = vmatprep.subr.mxu1 %v3019_v40  ;;  %2527 = vmatpush3.msra.mxu0 %v3017_v39 }
  0x94   :  { %2550 = vmatpush3.msra.mxu1 %v3019_v40  ;;  %2528 = vmatprep.subr.mxu0 %v3025_v41 }
  0x95   :  { %2551 = vmatprep.subr.mxu1 %v3027_v42  ;;  %2529 = vmatpush3.msra.mxu0 %v3025_v41 }
  0x96   :  { %2552 = vmatpush3.msra.mxu1 %v3027_v42  ;;  %2530 = vmatprep.subr.mxu0 %v3033_v43 }
  0x97   :  { %2553 = vmatprep.subr.mxu1 %v3035_v44  ;;  %2531 = vmatpush3.msra.mxu0 %v3033_v43 }
  0x98   :  { %2554 = vmatpush3.msra.mxu1 %v3035_v44  ;;  %2532 = vmatprep.subr.mxu0 %v3041_v45 }
  0x99   :  { %2555 = vmatprep.subr.mxu1 %v3043_v46  ;;  %2533 = vmatpush3.msra.mxu0 %v3041_v45 }
  0x9a   :  { %2556 = vmatpush3.msra.mxu1 %v3043_v46  ;;  %2534 = vmatprep.subr.mxu0 %v3049_v47 }
  0x9b   :  { %2557 = vmatprep.subr.mxu1 %v3051_v48  ;;  %2535 = vmatpush3.msra.mxu0 %v3049_v47 }
  0x9c   :  { %2558 = vmatpush3.msra.mxu1 %v3051_v48  ;;  %2536 = vmatprep.subr.mxu0 %v3057_v49 }
  0x9d   :  { %2559 = vmatprep.subr.mxu1 %v3059_v50  ;;  %2537 = vmatpush3.msra.mxu0 %v3057_v49 }
  0x9e   :  { %2560 = vmatpush3.msra.mxu1 %v3059_v50  ;;  %2538 = vmatprep.subr.mxu0 %v3065_v51 }
  0x9f   :  { %2561 = vmatprep.subr.mxu1 %v3067_v52  ;;  %2539 = vmatpush3.msra.mxu0 %v3065_v51 }
  0xa0   :  { %2562 = vmatpush3.msra.mxu1 %v3067_v52  ;;  %2540 = vmatprep.subr.mxu0 %v3073_v53 }
  0xa1   :  { %2563 = vmatprep.subr.mxu1 %v3075_v54  ;;  %2541 = vmatpush3.msra.mxu0 %v3073_v53 }
  0xa2   :  { %2564 = vmatpush3.msra.mxu1 %v3075_v54  ;;  %2543 = vmatmul.mubr.msk.f32.vlgmr.msra.gmra.mxu0 %vm46_vm0, %v266_v56 }
  0xa3   :  { %2566 = vmatmul.mubr.msk.f32.vlgmr.msra.gmra.mxu1 %vm46_vm0, %v362_v57  ;;  %2568 = vmatprep.subr.mxu0 %v3083_v55 }
  0xa4   :  { %2591 = vmatprep.subr.mxu1 %v2914_v4  ;;  %2569 = vmatpush3.msra.mxu0 %v3083_v55 }
  0xa5   :  { %2588 = vmatprep.mubr.msk.f32.mxu0 %vm46_vm0, %v457_v59  ;;  %2592 = vmatpush3.msra.mxu1 %v2914_v4  ;;  %v3137_v4 = vld [vmem:[#allocation4 + $0x140] sm:$0xff] }
  0xa6   :  { %2570 = vmatprep.subr.mxu0 %v3089_v58  ;;  %2593 = vmatprep.subr.mxu1 %v2923_v7 }
  0xa7   :  { %2571 = vmatpush3.msra.mxu0 %v3089_v58  ;;  %2594 = vmatpush3.msra.mxu1 %v2923_v7  ;;  %v564_v7 = vld [vmem:[#allocation2 + $0x1d] sm:$0xff] }
  0xa8   :  { %2572 = vmatprep.subr.mxu0 %v3095_v60  ;;  %2595 = vmatprep.subr.mxu1 %v2931_v9 }
  0xa9   :  { %2573 = vmatpush3.msra.mxu0 %v3095_v60  ;;  %2596 = vmatpush3.msra.mxu1 %v2931_v9  ;;  %v458_v9 = vld [vmem:[#allocation2 + $0xc] sm:$0xff] }
  0xaa   :  { %2574 = vmatprep.subr.mxu0 %v3101_v61  ;;  %2597 = vmatprep.subr.mxu1 %v2939_v11 }
  0xab   :  { %2575 = vmatpush3.msra.mxu0 %v3101_v61  ;;  %2598 = vmatpush3.msra.mxu1 %v2939_v11  ;;  %v561_v11 = vld [vmem:[#allocation2 + $0x14] sm:$0xff] }
  0xac   :  { %2576 = vmatprep.subr.mxu0 %v3107_v62  ;;  %2599 = vmatprep.subr.mxu1 %v2947_v13 }
  0xad   :  { %2577 = vmatpush3.msra.mxu0 %v3107_v62  ;;  %2600 = vmatpush3.msra.mxu1 %v2947_v13  ;;  %v727_v13 = vld [vmem:[#allocation2 + $0x16] sm:$0xff] }
  0xae   :  { %2578 = vmatprep.subr.mxu0 %v3113_v63  ;;  %2601 = vmatprep.subr.mxu1 %v2955_v15 }
  0xaf   :  { %2579 = vmatpush3.msra.mxu0 %v3113_v63  ;;  %2602 = vmatpush3.msra.mxu1 %v2955_v15  ;;  %v898_v15 = vld [vmem:[#allocation2 + $0x20] sm:$0xff] }
  0xb0   :  { %2580 = vmatprep.subr.mxu0 %v3119_v1  ;;  %2603 = vmatprep.subr.mxu1 %v2963_v17 }
  0xb1   :  { %2581 = vmatpush3.msra.mxu0 %v3119_v1  ;;  %2604 = vmatpush3.msra.mxu1 %v2963_v17  ;;  %v3249_v17 = vld [vmem:[%s4040_s5 + $0x70] sm:$0xff] }
  0xb2   :  { %2582 = vmatprep.subr.mxu0 %v3125_v2  ;;  %2605 = vmatprep.subr.mxu1 %v2971_v19 }
  0xb3   :  { %2583 = vmatpush3.msra.mxu0 %v3125_v2  ;;  %2606 = vmatpush3.msra.mxu1 %v2971_v19  ;;  %v3265_v19 = vld [vmem:[%s4040_s5 + $0x60] sm:$0xff] }
  0xb4   :  { %2584 = vmatprep.subr.mxu0 %v3131_v3  ;;  %2607 = vmatprep.subr.mxu1 %v2979_v21 }
  0xb5   :  { %2585 = vmatpush3.msra.mxu0 %v3131_v3  ;;  %2608 = vmatpush3.msra.mxu1 %v2979_v21  ;;  %v3279_v21 = vld [vmem:[%s4040_s5 + $0x50] sm:$0xff] }
  0xb6   :  { %2586 = vmatprep.subr.mxu0 %v3137_v4  ;;  %2609 = vmatprep.subr.mxu1 %v2987_v23 }
  0xb7   :  { %2587 = vmatpush3.msra.mxu0 %v3137_v4  ;;  %2610 = vmatpush3.msra.mxu1 %v2987_v23  ;;  %v3293_v23 = vld [vmem:[%s4040_s5 + $0x40] sm:$0xff] }
  0xb8   :  { %2611 = vmatprep.mubr.msk.f32.mxu1 %vm46_vm0, %v563_v6  ;;  %2589 = vmatmul.mubr.msk.f32.vlgmr.msra.gmra.mxu0 %vm46_vm0, %v458_v9 }
  0xb9   :  { %2612 = vmatmul.mubr.msk.f32.vlgmr.msra.gmra.mxu1 %vm46_vm0, %v564_v7  ;;  %2614 = vmatprep.subr.mxu0 %v2916_v5 }
  0xba   :  { %2637 = vmatprep.subr.mxu1 %v2995_v25  ;;  %2615 = vmatpush3.msra.mxu0 %v2916_v5  ;;  %v562_v5 = vld [vmem:[#allocation2 + $0x1c] sm:$0xff] }
  0xbb   :  { %2634 = vmatprep.mubr.msk.f32.mxu0 %vm46_vm0, %v561_v11  ;;  %2638 = vmatpush3.msra.mxu1 %v2995_v25  ;;  %v3307_v25 = vld [vmem:[%s4040_s5 + $0x30] sm:$0xff] }
  0xbc   :  { %2657 = vmatprep.mubr.msk.f32.mxu1 %vm46_vm0, %v727_v13  ;;  %2616 = vmatprep.subr.mxu0 %v2925_v8 }
  0xbd   :  { %2639 = vmatprep.subr.mxu1 %v3007_v35  ;;  %2617 = vmatpush3.msra.mxu0 %v2925_v8  ;;  %v728_v8 = vld [vmem:[#allocation2 + $0x1e] sm:$0xff] }
  0xbe   :  { %2640 = vmatpush3.msra.mxu1 %v3007_v35  ;;  %2618 = vmatprep.subr.mxu0 %v2933_v10 }
  0xbf   :  { %2641 = vmatprep.subr.mxu1 %v3017_v39  ;;  %2619 = vmatpush3.msra.mxu0 %v2933_v10  ;;  %v812_v10 = vld [vmem:[#allocation2 + $0x17] sm:$0xff] }
  0xc0   :  { %2642 = vmatpush3.msra.mxu1 %v3017_v39  ;;  %2620 = vmatprep.subr.mxu0 %v2941_v12 }
  0xc1   :  { %2643 = vmatprep.subr.mxu1 %v3025_v41  ;;  %2621 = vmatpush3.msra.mxu0 %v2941_v12  ;;  %v897_v12 = vld [vmem:[#allocation2 + $0x18] sm:$0xff] }
  0xc2   :  { %2644 = vmatpush3.msra.mxu1 %v3025_v41  ;;  %2622 = vmatprep.subr.mxu0 %v2949_v14 }
  0xc3   :  { %2645 = vmatprep.subr.mxu1 %v3033_v43  ;;  %2623 = vmatpush3.msra.mxu0 %v2949_v14  ;;  %v813_v14 = vld [vmem:[#allocation2 + $0x1f] sm:$0xff] }
  0xc4   :  { %2646 = vmatpush3.msra.mxu1 %v3033_v43  ;;  %2624 = vmatprep.subr.mxu0 %v2957_v16 }
  0xc5   :  { %2647 = vmatprep.subr.mxu1 %v3041_v45  ;;  %2625 = vmatpush3.msra.mxu0 %v2957_v16  ;;  %v3244_v16 = vld [vmem:[%s4040_s5 + $0x78] sm:$0xff] }
  0xc6   :  { %2648 = vmatpush3.msra.mxu1 %v3041_v45  ;;  %2626 = vmatprep.subr.mxu0 %v2965_v18 }
  0xc7   :  { %2649 = vmatprep.subr.mxu1 %v3049_v47  ;;  %2627 = vmatpush3.msra.mxu0 %v2965_v18  ;;  %v3256_v18 = vld [vmem:[%s4040_s5 + $0x68] sm:$0xff] }
  0xc8   :  { %2650 = vmatpush3.msra.mxu1 %v3049_v47  ;;  %2628 = vmatprep.subr.mxu0 %v2973_v20 }
  0xc9   :  { %2651 = vmatprep.subr.mxu1 %v3057_v49  ;;  %2629 = vmatpush3.msra.mxu0 %v2973_v20  ;;  %v3272_v20 = vld [vmem:[%s4040_s5 + $0x58] sm:$0xff] }
  0xca   :  { %2652 = vmatpush3.msra.mxu1 %v3057_v49  ;;  %2630 = vmatprep.subr.mxu0 %v2981_v22 }
  0xcb   :  { %2653 = vmatprep.subr.mxu1 %v3065_v51  ;;  %2631 = vmatpush3.msra.mxu0 %v2981_v22  ;;  %v3286_v22 = vld [vmem:[%s4040_s5 + $0x48] sm:$0xff] }
  0xcc   :  { %2654 = vmatpush3.msra.mxu1 %v3065_v51  ;;  %2632 = vmatprep.subr.mxu0 %v2989_v24 }
  0xcd   :  { %2655 = vmatprep.subr.mxu1 %v3073_v53  ;;  %2633 = vmatpush3.msra.mxu0 %v2989_v24  ;;  %v3300_v24 = vld [vmem:[%s4040_s5 + $0x38] sm:$0xff] }
  0xce   :  { %2656 = vmatpush3.msra.mxu1 %v3073_v53  ;;  %2635 = vmatmul.mubr.msk.f32.vlgmr.msra.gmra.mxu0 %vm46_vm0, %v562_v5 }
  0xcf   :  { %2658 = vmatmul.mubr.msk.f32.vlgmr.msra.gmra.mxu1 %vm46_vm0, %v728_v8  ;;  %2660 = vmatprep.subr.mxu0 %v2997_v26 }
  0xd0   :  { %2683 = vmatprep.subr.mxu1 %v3083_v55  ;;  %2661 = vmatpush3.msra.mxu0 %v2997_v26  ;;  %v3314_v26 = vld [vmem:[%s4040_s5 + $0x28] sm:$0xff] }
  0xd1   :  { %2680 = vmatprep.mubr.msk.f32.mxu0 %vm46_vm0, %v812_v10  ;;  %2684 = vmatpush3.msra.mxu1 %v3083_v55 }
  0xd2   :  { %2703 = vmatprep.mubr.msk.f32.mxu1 %vm46_vm0, %v897_v12  ;;  %2662 = vmatprep.subr.mxu0 %v3011_v36 }
  0xd3   :  { %2685 = vmatprep.subr.mxu1 %v3089_v58  ;;  %2663 = vmatpush3.msra.mxu0 %v3011_v36 }
  0xd4   :  { %2686 = vmatpush3.msra.mxu1 %v3089_v58  ;;  %2664 = vmatprep.subr.mxu0 %v3019_v40 }
  0xd5   :  { %2687 = vmatprep.subr.mxu1 %v3095_v60  ;;  %2665 = vmatpush3.msra.mxu0 %v3019_v40 }
  0xd6   :  { %2688 = vmatpush3.msra.mxu1 %v3095_v60  ;;  %2666 = vmatprep.subr.mxu0 %v3027_v42 }
  0xd7   :  { %2689 = vmatprep.subr.mxu1 %v3101_v61  ;;  %2667 = vmatpush3.msra.mxu0 %v3027_v42 }
  0xd8   :  { %2690 = vmatpush3.msra.mxu1 %v3101_v61  ;;  %2668 = vmatprep.subr.mxu0 %v3035_v44 }
  0xd9   :  { %2691 = vmatprep.subr.mxu1 %v3107_v62  ;;  %2669 = vmatpush3.msra.mxu0 %v3035_v44 }
  0xda   :  { %2692 = vmatpush3.msra.mxu1 %v3107_v62  ;;  %2670 = vmatprep.subr.mxu0 %v3043_v46 }
  0xdb   :  { %2693 = vmatprep.subr.mxu1 %v3113_v63  ;;  %2671 = vmatpush3.msra.mxu0 %v3043_v46 }
  0xdc   :  { %2694 = vmatpush3.msra.mxu1 %v3113_v63  ;;  %2672 = vmatprep.subr.mxu0 %v3051_v48 }
  0xdd   :  { %2695 = vmatprep.subr.mxu1 %v3119_v1  ;;  %2673 = vmatpush3.msra.mxu0 %v3051_v48 }
  0xde   :  { %2696 = vmatpush3.msra.mxu1 %v3119_v1  ;;  %2674 = vmatprep.subr.mxu0 %v3059_v50  ;;  %v2217_v1 = vld [vmem:[%s4037_s2] ss:$0 sm:$0xff] }
  0xdf   :  { %2697 = vmatprep.subr.mxu1 %v3125_v2  ;;  %2675 = vmatpush3.msra.mxu0 %v3059_v50 }
  0xe0   :  { %2698 = vmatpush3.msra.mxu1 %v3125_v2  ;;  %2676 = vmatprep.subr.mxu0 %v3067_v52 }
  0xe1   :  { %2699 = vmatprep.subr.mxu1 %v3131_v3  ;;  %2677 = vmatpush3.msra.mxu0 %v3067_v52 }
  0xe2   :  { %2700 = vmatpush3.msra.mxu1 %v3131_v3  ;;  %2678 = vmatprep.subr.mxu0 %v3075_v54 }
  0xe3   :  { %2701 = vmatprep.subr.mxu1 %v3137_v4  ;;  %2679 = vmatpush3.msra.mxu0 %v3075_v54 }
  0xe4   :  { %2702 = vmatpush3.msra.mxu1 %v3137_v4  ;;  %2681 = vmatmul.mubr.msk.f32.vlgmr.msra.gmra.mxu0 %vm46_vm0, %v813_v14 }
  0xe5   :  { %2704 = vmatmul.mubr.msk.f32.vlgmr.msra.gmra.mxu1 %vm46_vm0, %v898_v15  ;;  %2706 = vmatprep.subr.mxu0 %v2832_v0  ;;  %vm1482_vm0 = vcmask 59392  }
  0xe6   :  { %2741 = vmatprep.subr.mxu1 %v2832_v0  ;;  %2707 = vmatpush3.msra.mxu0 %v3244_v16 }
  0xe7   :  { %2708 = vmatprep.subr.mxu0 %v2832_v0  ;;  %2738 = vmatprep.mubr.msk.f32.mxu0 %vm2833_vm2, %v2832_v0 }
  0xe8   :  { %2709 = vmatpush3.msra.mxu0 %v3249_v17  ;;  %2743 = vmatprep.mubr.msk.f32.mxu1 %vm2833_vm2, %v2832_v0 }
  0xe9   :  { %2710 = vmatprep.subr.mxu0 %v2832_v0  ;;  %2742 = vmatpush3.msra.mxu1 %v3359_v32 }
  0xea   :  { %2711 = vmatpush3.msra.mxu0 %v3256_v18  ;;  %2746 = vmatprep.subr.mxu1 %v2832_v0 }
  0xeb   :  { %2712 = vmatprep.subr.mxu0 %v2832_v0 }
  0xec   :  { %2713 = vmatpush3.msra.mxu0 %v3265_v19 }
  0xed   :  { %2714 = vmatprep.subr.mxu0 %v2832_v0 }
  0xee   :  { %2715 = vmatpush3.msra.mxu0 %v3272_v20 }
  0xef   :  { %2716 = vmatprep.subr.mxu0 %v2832_v0 }
  0xf0   :  { %2717 = vmatpush3.msra.mxu0 %v3279_v21 }
  0xf1   :  { %2718 = vmatprep.subr.mxu0 %v2832_v0 }
  0xf2   :  { %2719 = vmatpush3.msra.mxu0 %v3286_v22 }
  0xf3   :  { %2720 = vmatprep.subr.mxu0 %v2832_v0 }
  0xf4   :  { %2721 = vmatpush3.msra.mxu0 %v3293_v23 }
  0xf5   :  { %2722 = vmatprep.subr.mxu0 %v2832_v0 }
  0xf6   :  { %2723 = vmatpush3.msra.mxu0 %v3300_v24 }
  0xf7   :  { %2724 = vmatprep.subr.mxu0 %v2832_v0 }
  0xf8   :  { %2725 = vmatpush3.msra.mxu0 %v3307_v25 }
  0xf9   :  { %2726 = vmatprep.subr.mxu0 %v2832_v0 }
  0xfa   :  { %2727 = vmatpush3.msra.mxu0 %v3314_v26 }
  0xfb   :  { %2728 = vmatprep.subr.mxu0 %v2832_v0 }
  0xfc   :  { %2729 = vmatpush3.msra.mxu0 %v3321_v27 }
  0xfd   :  { %2730 = vmatprep.subr.mxu0 %v2832_v0 }
  0xfe   :  { %2731 = vmatpush3.msra.mxu0 %v3326_v28 }
  0xff   :  { %2732 = vmatprep.subr.mxu0 %v2832_v0 }
 0x100   :  { %2733 = vmatpush3.msra.mxu0 %v3335_v29 }
 0x101   :  { %2734 = vmatprep.subr.mxu0 %v2832_v0 }
 0x102   :  { %2735 = vmatpush3.msra.mxu0 %v3344_v30 }
 0x103   :  { %2736 = vmatprep.subr.mxu0 %v2832_v0 }
 0x104   :  { %2737 = vmatpush3.msra.mxu0 %v3351_v31 }
 0x105   :  { %2781 = vmatprep.subr.mxu0 %v2832_v0 }
 0x14d   :  { %v2498_v33 = vpop.f32.mrf.mxu0 }
 0x14e   :  { %v2521_v34 = vpop.f32.mrf.mxu1 }
 0x14f   :  { %v175_v35 = vpop.f32.mrf.mxu0  ;;  %v262_v47 = vadd.f32 %v2521_v34, %v2498_v33 }
 0x150   :  { %v256_v37 = vpop.f32.mrf.mxu1 }
 0x151   :  { %v257_v45 = vadd.f32 %v256_v37, %v175_v35 }
 0x162   :  { %v2544_v36 = vpop.f32.mrf.mxu0 }
 0x163   :  { %v2567_v38 = vpop.f32.mrf.mxu1  ;;  %v360_v51 = vadd.f32 %v2544_v36, %v262_v47 }
 0x164   :  { %v350_v39 = vpop.f32.mrf.mxu0 }
 0x165   :  { %v446_v41 = vpop.f32.mrf.mxu1  ;;  %v359_v48 = vadd.f32 %v350_v39, %v257_v45  ;;  %v456_v56 = vadd.f32 %v2567_v38, %v360_v51  ;;  %v1248_v51 = vld [vmem:[%s4038_s3] sm:$0x1] }
 0x167   :  { %v455_v53 = vadd.f32 %v446_v41, %v359_v48 }
 0x178   :  { %v2590_v40 = vpop.f32.mrf.mxu0 }
 0x179   :  { %v2613_v42 = vpop.f32.mrf.mxu1  ;;  %v552_v61 = vadd.f32 %v2590_v40, %v456_v56 }
 0x17a   :  { %v542_v43 = vpop.f32.mrf.mxu0 }
 0x17b   :  { %v637_v46 = vpop.f32.mrf.mxu1  ;;  %v551_v57 = vadd.f32 %v542_v43, %v455_v53  ;;  %v3369_v7 = vadd.f32 %v2217_v1, %v552_v61  ;;  %v3477_v61 = vld [vmem:[#allocation3] sm:$0xff] }
 0x17c   :  { %1432 = vst.msk [vmem:[#allocation3 + $0x48] sm:$0xf] %vm1431_vm5, %v3477_v61  ;;  %vm2104_vm5 = vcmask 1043456  }
 0x17d   :  { %v3367_v3 = vadd.f32 %v2217_v1, %v551_v57  ;;  %v3444_v57 = vld [vmem:[%s4042_s7 + $0x78] sm:$0xff] }
 0x17f   :  { %v1001_v13 = vadd.f32 %v3369_v7, %v3367_v3 }
 0x18e   :  { %v2636_v44 = vpop.f32.mrf.mxu0 }
 0x18f   :  { %v2659_v49 = vpop.f32.mrf.mxu1  ;;  %v724_v52 = vadd.f32 %v2636_v44, %v2613_v42 }
 0x190   :  { %v718_v50 = vpop.f32.mrf.mxu0 }
 0x191   :  { %v719_v54 = vadd.f32 %v718_v50, %v637_v46  ;;  %v801_v55 = vpop.f32.mrf.mxu1  ;;  %v811_v58 = vadd.f32 %v2659_v49, %v724_v52 }
 0x193   :  { %v810_v62 = vadd.f32 %v801_v55, %v719_v54  ;;  %v1252_v54 = vld [vmem:[%s4039_s4] sm:$0x1] }
 0x1a4   :  { %v2682_v59 = vpop.f32.mrf.mxu0 }
 0x1a5   :  { %v2705_v60 = vpop.f32.mrf.mxu1  ;;  %v896_v63 = vadd.f32 %v2682_v59, %v811_v58  ;;  %v3449_v58 = vld [vmem:[%s4042_s7 + $0x70] sm:$0xff]  ;;  %v3461_v59 = vld [vmem:[%s4042_s7 + $0x100] sm:$0xff] }
 0x1a6   :  { %v886_v2 = vpop.f32.mrf.mxu0 }
 0x1a7   :  { %v895_v4 = vadd.f32 %v886_v2, %v810_v62  ;;  %v971_v6 = vpop.f32.mrf.mxu1  ;;  %v981_v9 = vadd.f32 %v2705_v60, %v896_v63  ;;  %v3475_v60 = vld [vmem:[%s4042_s7 + $0x68] sm:$0xff]  ;;  %v3483_v62 = vld [vmem:[%s4042_s7 + $0xf8] sm:$0xff]  ;;  %v3497_v63 = vld [vmem:[%s4042_s7 + $0xf0] sm:$0xff] }
 0x1a8   :  { %v3511_v2 = vld [vmem:[%s4042_s7 + $0xe8] sm:$0xff] }
 0x1a9   :  { %v980_v11 = vadd.f32 %v971_v6, %v895_v4  ;;  %v3375_v8 = vadd.f32 %v2217_v1, %v981_v9  ;;  %v3519_v4 = vld [vmem:[%s4042_s7 + $0x50] sm:$0xff]  ;;  %v3525_v6 = vld [vmem:[%s4042_s7 + $0xe0] sm:$0xff]  ;;  %v3533_v9 = vld [vmem:[%s4042_s7 + $0x48] sm:$0xff] }
 0x1ab   :  { %v3373_v5 = vadd.f32 %v2217_v1, %v980_v11  ;;  %v3505_v1 = vld [vmem:[%s4042_s7 + $0x58] sm:$0xff] }
 0x1ac   :  { %v3539_v11 = vld [vmem:[%s4042_s7 + $0xd8] sm:$0xff] }
 0x1ad   :  { %v1002_v10 = vadd.f32 %v1001_v13, %v3373_v5  ;;  %v3547_v13 = vld [vmem:[%s4042_s7 + $0x40] sm:$0xff] }
 0x1af   :  { %v1003_v12 = vadd.f32 %v1002_v10, %v3375_v8  ;;  %v3553_v10 = vld [vmem:[%s4042_s7 + $0xd0] sm:$0xff] }
 0x1b1   :  { %v1004_v14 = vrot.slane %v1003_v12, 4 }
 0x1b3   :  { %v1005_v15 = vadd.f32 %v1004_v14, %v1003_v12  ;;  %v3561_v12 = vld [vmem:[%s4042_s7 + $0x38] sm:$0xff]  ;;  %v3567_v14 = vld [vmem:[%s4042_s7 + $0xc8] sm:$0xff] }
 0x1b5   :  { %v1006_v33 = vrot.slane %v1005_v15, 2 }
 0x1b7   :  { %v1007_v34 = vadd.f32 %v1006_v33, %v1005_v15  ;;  %v3575_v15 = vld [vmem:[%s4042_s7 + $0x30] sm:$0xff]  ;;  %v3581_v33 = vld [vmem:[%s4042_s7 + $0xc0] sm:$0xff] }
 0x1b9   :  { %v1008_v35 = vrot.slane %v1007_v34, 1 }
 0x1bb   :  { %v1009_v36 = vadd.f32 %v1008_v35, %v1007_v34  ;;  %v3589_v34 = vld [vmem:[%s4042_s7 + $0x28] sm:$0xff]  ;;  %v3595_v35 = vld [vmem:[%s4042_s7 + $0xb8] sm:$0xff] }
 0x1bd   :  { %2739 = vmatmul.mubr.f32.vlgmr.msra.gmra.mxu0 %v1009_v36  ;;  %v3603_v36 = vld [vmem:[%s4042_s7 + $0x20] sm:$0xff] }
 0x1be   :  { %2782 = vmatpush3.msra.mxu0 %v3359_v32  ;;  %2783 = vmatprep.mubr.msk.f32.mxu0 %vm2833_vm2, %v2832_v0 }
 0x1bf   :  { %2786 = vmatprep.subr.mxu0 %v2832_v0 }
 0x27d   :  { %v1076_v37 = vpop.f32.mrf.mxu0 }
 0x27e   :  { %v3383_v38 = vmul.f32 0.001953125, %v1076_v37  ;;  %v3609_v37 = vld [vmem:[%s4042_s7 + $0xb0] sm:$0xff] }
 0x27f   :  { %v2740_v39 = vpop.f32.mrf.mxu0 }
 0x280   :  { %2744 = vmatmul.mubr.msk.f32.vlgmr.msra.gmra.mxu1 %vm1082_vm3, %v3383_v38  ;;  %v3626_v39 = vld [vmem:[%s4042_s7 + $0x10] sm:$0xff] }
 0x281   :  { %2747 = vmatpush3.msra.mxu1 %v3244_v16  ;;  %2778 = vmatprep.mubr.msk.f32.mxu1 %vm2833_vm2, %v2832_v0  ;;  %v1156_v16 = vlaneseq }
 0x282   :  { %2748 = vmatprep.subr.mxu1 %v2832_v0 }
 0x283   :  { %2749 = vmatpush3.msra.mxu1 %v3249_v17  ;;  %v1157_v17 = vshrl.u32 %v1156_v16, 7 }
 0x284   :  { %2750 = vmatprep.subr.mxu1 %v2832_v0 }
 0x285   :  { %2751 = vmatpush3.msra.mxu1 %v3256_v18  ;;  %v3421_v18 = vsub.s32 0, %v1157_v17 }
 0x286   :  { %2752 = vmatprep.subr.mxu1 %v2832_v0 }
 0x287   :  { %2753 = vmatpush3.msra.mxu1 %v3265_v19 }
 0x288   :  { %2754 = vmatprep.subr.mxu1 %v2832_v0 }
 0x289   :  { %2755 = vmatpush3.msra.mxu1 %v3272_v20 }
 0x28a   :  { %2756 = vmatprep.subr.mxu1 %v2832_v0 }
 0x28b   :  { %2757 = vmatpush3.msra.mxu1 %v3279_v21 }
 0x28c   :  { %2758 = vmatprep.subr.mxu1 %v2832_v0 }
 0x28d   :  { %2759 = vmatpush3.msra.mxu1 %v3286_v22 }
 0x28e   :  { %2760 = vmatprep.subr.mxu1 %v2832_v0 }
 0x28f   :  { %2761 = vmatpush3.msra.mxu1 %v3293_v23 }
 0x290   :  { %2762 = vmatprep.subr.mxu1 %v2832_v0 }
 0x291   :  { %2763 = vmatpush3.msra.mxu1 %v3300_v24 }
 0x292   :  { %2764 = vmatprep.subr.mxu1 %v2832_v0 }
 0x293   :  { %2765 = vmatpush3.msra.mxu1 %v3307_v25 }
 0x294   :  { %2766 = vmatprep.subr.mxu1 %v2832_v0 }
 0x295   :  { %2767 = vmatpush3.msra.mxu1 %v3314_v26 }
 0x296   :  { %2768 = vmatprep.subr.mxu1 %v2832_v0 }
 0x297   :  { %2769 = vmatpush3.msra.mxu1 %v3321_v27 }
 0x298   :  { %2770 = vmatprep.subr.mxu1 %v2832_v0 }
 0x299   :  { %2771 = vmatpush3.msra.mxu1 %v3326_v28 }
 0x29a   :  { %2772 = vmatprep.subr.mxu1 %v2832_v0 }
 0x29b   :  { %2773 = vmatpush3.msra.mxu1 %v3335_v29 }
 0x29c   :  { %2774 = vmatprep.subr.mxu1 %v2832_v0 }
 0x29d   :  { %2775 = vmatpush3.msra.mxu1 %v3344_v30 }
 0x29e   :  { %2776 = vmatprep.subr.mxu1 %v2832_v0 }
 0x29f   :  { %2777 = vmatpush3.msra.mxu1 %v3351_v31 }
 0x2a0   :  { %1553 = vmatprep.subr.mxu1 %v2832_v0 }
 0x340   :  { %v1152_v19 = vpop.f32.mrf.mxu1 }
 0x341   :  { %v1159_v20 = vrot.slane %v1152_v19, %v3421_v18 }
 0x342   :  { %v2745_v21 = vpop.f32.mrf.mxu1 }
 0x343   :  { %v1160_v22 = vsub.f32 %v3367_v3, %v1159_v20  ;;  %v1161_v23 = vsub.f32 %v3369_v7, %v1159_v20  ;;  %v1162_v24 = vsub.f32 %v3373_v5, %v1159_v20  ;;  %v1163_v25 = vsub.f32 %v3375_v8, %v1159_v20 }
 0x345   :  { %v1164_v26 = vmul.f32 %v1160_v22, %v1160_v22  ;;  %v1165_v27 = vmul.f32 %v1161_v23, %v1161_v23  ;;  %v1166_v28 = vmul.f32 %v1162_v24, %v1162_v24  ;;  %v1167_v30 = vmul.f32 %v1163_v25, %v1163_v25 }
 0x347   :  { %v1168_v29 = vadd.f32 %v1165_v27, %v1164_v26 }
 0x349   :  { %v1169_v31 = vadd.f32 %v1168_v29, %v1166_v28 }
 0x34b   :  { %v1170_v40 = vadd.f32 %v1169_v31, %v1167_v30  ;;  %v3675_v31 = vld [vmem:[%s4042_s7 + $0x88] sm:$0xff] }
 0x34d   :  { %v1171_v41 = vrot.slane %v1170_v40, 4 }
 0x34f   :  { %v1172_v42 = vadd.f32 %v1171_v41, %v1170_v40  ;;  %v3680_v40 = vld [vmem:[%s4042_s7 + $0x90] sm:$0xff]  ;;  %v3687_v41 = vld [vmem:[%s4042_s7 + $0x80] sm:$0xff] }
 0x351   :  { %v1173_v43 = vrot.slane %v1172_v42, 2 }
 0x353   :  { %v1174_v44 = vadd.f32 %v1173_v43, %v1172_v42  ;;  %v3699_v43 = vld [vmem:[%s4042_s7 + $0x118] sm:$0xff] }
 0x355   :  { %v1175_v45 = vrot.slane %v1174_v44, 1 }
 0x357   :  { %v1176_v46 = vadd.f32 %v1175_v45, %v1174_v44 }
 0x359   :  { %2779 = vmatmul.mubr.f32.vlgmr.msra.gmra.mxu1 %v1176_v46  ;;  %v3705_v46 = vld [vmem:[%s4042_s7 + $0x110] sm:$0xff] }
 0x419   :  { %v1243_v47 = vpop.f32.mrf.mxu1 }
 0x41a   :  { %v1247_v48 = vmul.f32 0.001953125, %v1243_v47 }
 0x41b   :  { %v2780_v49 = vpop.f32.mrf.mxu1 }
 0x41c   :  { %v1249_v50 = vadd.f32 1e-05, %v1247_v48 }
 0x41e   :  { %2796 = vrsqrt.f32 %v1249_v50 }
 0x42b   :  { %v2797_v52 = vpop.eup %2796 }
 0x42c   :  { %v1251_v53 = vmul.f32 %v2797_v52, %v1248_v51 }
 0x42e   :  { %2784 = vmatmul.mubr.msk.f32.vlgmr.msra.gmra.mxu0 %vm1082_vm3, %v1251_v53  ;;  %v1253_v55 = vmul.f32 %v1251_v53, %v3383_v38  ;;  %v3617_v38 = vld [vmem:[%s4042_s7 + $0x18] sm:$0xff] }
 0x42f   :  { %2787 = vmatpush3.msra.mxu0 %v3359_v32  ;;  %2788 = vmatprep.mubr.msk.f32.mxu0 %vm2833_vm2, %v2832_v0  ;;  %v3454_v32 = vld [vmem:[%s4042_s7 + $0x108] sm:$0xff]  ;;  %vm1735_vm2 = vcmask 1045504  }
 0x430   :  { %v1254_v56 = vsub.f32 %v1252_v54, %v1253_v55  ;;  %1633 = vmatprep.subr.mxu0 %v2832_v0  ;;  %1554 = vmatpush1.msra.mxu1 %v3454_v32 }
 0x431   :  { %1555 = vmatprep.subr.mxu1 %v3477_v61 }
 0x432   :  { %2789 = vmatmul.mubr.msk.f32.vlgmr.msra.gmra.mxu0 %vm1082_vm3, %v1254_v56  ;;  %1556 = vmatpush1.msra.mxu1 %v3461_v59 }
 0x433   :  { %1634 = vmatpush1.msra.mxu0 %v3444_v57  ;;  %1557 = vmatprep.subr.mxu1 %v3477_v61 }
 0x434   :  { %1635 = vmatprep.subr.mxu0 %v2832_v0  ;;  %v3491_v0 = vld [vmem:[%s4042_s7 + $0x60] sm:$0xff]  ;;  %1558 = vmatpush1.msra.mxu1 %v3483_v62 }
 0x435   :  { %1636 = vmatpush1.msra.mxu0 %v3449_v58  ;;  %1559 = vmatprep.subr.mxu1 %v3477_v61 }
 0x436   :  { %1637 = vmatprep.subr.mxu0 %v3477_v61  ;;  %1560 = vmatpush1.msra.mxu1 %v3497_v63 }
 0x437   :  { %1638 = vmatpush1.msra.mxu0 %v3475_v60  ;;  %1561 = vmatprep.subr.mxu1 %v3477_v61 }
 0x438   :  { %1639 = vmatprep.subr.mxu0 %v3477_v61  ;;  %1562 = vmatpush1.msra.mxu1 %v3511_v2 }
 0x439   :  { %1640 = vmatpush1.msra.mxu0 %v3491_v0  ;;  %1563 = vmatprep.subr.mxu1 %v3477_v61 }
 0x43a   :  { %1641 = vmatprep.subr.mxu0 %v3477_v61  ;;  %1564 = vmatpush1.msra.mxu1 %v3525_v6 }
 0x43b   :  { %1642 = vmatpush1.msra.mxu0 %v3505_v1  ;;  %1565 = vmatprep.subr.mxu1 %v3477_v61 }
 0x43c   :  { %1643 = vmatprep.subr.mxu0 %v3477_v61  ;;  %1566 = vmatpush1.msra.mxu1 %v3539_v11 }
 0x43d   :  { %1644 = vmatpush1.msra.mxu0 %v3519_v4  ;;  %1567 = vmatprep.subr.mxu1 %v3477_v61 }
 0x43e   :  { %1645 = vmatprep.subr.mxu0 %v3477_v61  ;;  %1568 = vmatpush1.msra.mxu1 %v3553_v10 }
 0x43f   :  { %1646 = vmatpush1.msra.mxu0 %v3533_v9  ;;  %1569 = vmatprep.subr.mxu1 %v3477_v61 }
 0x440   :  { %1647 = vmatprep.subr.mxu0 %v3477_v61  ;;  %1570 = vmatpush1.msra.mxu1 %v3567_v14 }
 0x441   :  { %1648 = vmatpush1.msra.mxu0 %v3547_v13  ;;  %1571 = vmatprep.subr.mxu1 %v3477_v61 }
 0x442   :  { %1649 = vmatprep.subr.mxu0 %v3477_v61  ;;  %1572 = vmatpush1.msra.mxu1 %v3581_v33 }
 0x443   :  { %1650 = vmatpush1.msra.mxu0 %v3561_v12  ;;  %1573 = vmatprep.subr.mxu1 %v3477_v61 }
 0x444   :  { %1651 = vmatprep.subr.mxu0 %v3477_v61  ;;  %1574 = vmatpush1.msra.mxu1 %v3595_v35 }
 0x445   :  { %1652 = vmatpush1.msra.mxu0 %v3575_v15  ;;  %1575 = vmatprep.subr.mxu1 %v3477_v61 }
 0x446   :  { %1653 = vmatprep.subr.mxu0 %v3477_v61  ;;  %1576 = vmatpush1.msra.mxu1 %v3609_v37 }
 0x447   :  { %1654 = vmatpush1.msra.mxu0 %v3589_v34  ;;  %1577 = vmatprep.subr.mxu1 %v3477_v61 }
 0x448   :  { %1655 = vmatprep.subr.mxu0 %v3477_v61 }
 0x449   :  { %1656 = vmatpush1.msra.mxu0 %v3603_v36 }
 0x44a   :  { %1657 = vmatprep.subr.mxu0 %v3477_v61 }
 0x44b   :  { %1658 = vmatpush1.msra.mxu0 %v3617_v38 }
 0x44c   :  { %1659 = vmatprep.subr.mxu0 %v3477_v61 }
 0x44d   :  { %1660 = vmatpush1.msra.mxu0 %v3626_v39 }
 0x44e   :  { %1661 = vmatprep.subr.mxu0 %v3477_v61 }
 0x4ee   :  { %v1324_v16 = vpop.f32.mrf.mxu0 }
 0x4ef   :  { %v1404_v17 = vrot.slane %v1324_v16, %v3421_v18 }
 0x4f0   :  { %v2785_v19 = vpop.f32.mrf.mxu0 }
 0x4f1   :  { %v1406_v21 = vmul.f32 %v1404_v17, %v3369_v7  ;;  %v1405_v23 = vmul.f32 %v1404_v17, %v3367_v3  ;;  %v1407_v24 = vmul.f32 %v1404_v17, %v3373_v5  ;;  %v1408_v25 = vmul.f32 %v1404_v17, %v3375_v8  ;;  %v3642_v7 = vld [vmem:[%s4042_s7 + $0xa8] sm:$0xff]  ;;  %v3652_v5 = vld [vmem:[%s4042_s7 + $0xa0] sm:$0xff] }
 0x4f2   :  { %v1397_v20 = vpop.f32.mrf.mxu0  ;;  %v3647_v3 = vld [vmem:[%s4042_s7 + $0x8] sm:$0xff]  ;;  %1578 = vmatpush1.msra.mxu1 %v3642_v7  ;;  %v3659_v8 = vld [vmem:[%s4042_s7] sm:$0xff] }
 0x4f3   :  { %v1412_v22 = vrot.slane %v1397_v20, %v3421_v18  ;;  %1662 = vmatpush1.msra.mxu0 %v3647_v3  ;;  %1579 = vmatprep.subr.mxu1 %v3477_v61  ;;  %v3670_v18 = vld [vmem:[%s4042_s7 + $0x98] sm:$0xff] }
 0x4f4   :  { %v2790_v26 = vpop.f32.mrf.mxu0  ;;  %1663 = vmatprep.subr.mxu0 %v3477_v61  ;;  %1580 = vmatpush1.msra.mxu1 %v3652_v5 }
 0x4f5   :  { %v1414_v27 = vadd.f32 %v1412_v22, %v1406_v21  ;;  %v1413_v28 = vadd.f32 %v1412_v22, %v1405_v23  ;;  %v1415_v29 = vadd.f32 %v1412_v22, %v1407_v24  ;;  %v1416_v30 = vadd.f32 %v1412_v22, %v1408_v25  ;;  %1664 = vmatpush1.msra.mxu0 %v3659_v8 }
 0x4f6   :  { %1581 = vmatprep.subr.mxu1 %v3477_v61  ;;  %1693 = vmatprep.subr.mxu0 %v3477_v61 }
 0x4f7   :  { %2798 = vtanh.f32 %v1413_v28  ;;  %1582 = vmatpush1.msra.mxu1 %v3670_v18  ;;  %1694 = vmatpush2.msra.mxu0 %v3675_v31 }
 0x4f8   :  { %2800 = vtanh.f32 %v1414_v27  ;;  %1583 = vmatprep.subr.mxu1 %v3477_v61  ;;  %1695 = vmatprep.subr.mxu0 %v3477_v61 }
 0x4f9   :  { %2802 = vtanh.f32 %v1415_v29  ;;  %1584 = vmatpush1.msra.mxu1 %v3680_v40  ;;  %1696 = vmatpush2.msra.mxu0 %v3687_v41 }
 0x4fa   :  { %2804 = vtanh.f32 %v1416_v30  ;;  %1613 = vmatprep.subr.mxu1 %v3477_v61  ;;  %1908 = vmatprep.subr.mxu0 %v3477_v61 }
 0x4fb   :  { %1614 = vmatpush2.msra.mxu1 %v3699_v43 }
 0x4fc   :  { %1615 = vmatprep.subr.mxu1 %v3477_v61 }
 0x4fd   :  { %1616 = vmatpush2.msra.mxu1 %v3705_v46 }
 0x4fe   :  { %1752 = vmatprep.subr.mxu1 %v3477_v61 }
 0x504   :  { %v2799_v42 = vpop.eup %2798 }
 0x505   :  { %v2801_v44 = vpop.eup %2800  ;;  %v1436_v45 = vrot.slane %v2799_v42, 7 }
 0x506   :  { %v2803_v47 = vpop.eup %2802  ;;  %v1437_v48 = vrot.slane %v2801_v44, 7 }
 0x507   :  { %v2805_v49 = vpop.eup %2804  ;;  %1439 = vrot.lane.b32.xlu0 %v1436_v45, %s2831_s13  ;;  %v1462_v51 = vrot.slane %v2803_v47, 5 }
 0x508   :  { %v1438_v50 = vsel %vm1435_vm6, %v1436_v45, %v1437_v48  ;;  %v1463_v52 = vrot.slane %v2805_v49, 5  ;;  %v3746_v49 = vld [vmem:[%s4042_s7 + $0x190] sm:$0xff] }
 0x509   :  { %1441 = vrot.lane.b32.xlu1 %v1438_v50, %s2831_s13 }
 0x50a   :  { %v1464_v53 = vsel %vm1461_vm7, %v1462_v51, %v1463_v52 }
 0x50b   :  { %1443 = vrot.lane.b32.xlu0 %v1437_v48, %s2831_s13 }
 0x50d   :  { %1465 = vrot.lane.b32.xlu1 %v1462_v51, %s2831_s13 }
 0x50f   :  { %1467 = vrot.lane.b32.xlu0 %v1464_v53, %s2831_s13 }
 0x511   :  { %1469 = vrot.lane.b32.xlu1 %v1463_v52, %s2831_s13 }
 0x579   :  { %v1440_v54 = vpop.permute.xlu0 %1439 }
 0x57a   :  { %1449 = vst.msk [vmem:[#allocation3] sm:$0xfe] %vm1448_vm8, %v1440_v54 }
 0x57b   :  { %1451 = vst.msk [vmem:[#allocation3 + $0x8] sm:$0xfe] %vm1450_vm9, %v1440_v54  ;;  %v1442_v55 = vpop.permute.xlu1 %1441 }
 0x57c   :  { %1453 = vst.msk [vmem:[#allocation3 + $0x10] sm:$0xff] %vm1452_vm10, %v1442_v55 }
 0x57d   :  { %1454 = vst.msk [vmem:[#allocation3 + $0x18] sm:$0xff] %vm1082_vm3, %v1442_v55  ;;  %v1444_v56 = vpop.permute.xlu0 %1443 }
 0x57e   :  { %1456 = vst.msk [vmem:[#allocation3 + $0x20] sm:$0x1] %vm1455_vm11, %v1444_v56 }
 0x57f   :  { %1458 = vst.msk [vmem:[#allocation3 + $0x28] sm:$0x1] %vm1457_vm12, %v1444_v56  ;;  %v1466_v16 = vpop.permute.xlu1 %1465 }
 0x580   :  { %1475 = vst.msk [vmem:[#allocation3 + $0x20] sm:$0xf8] %vm1474_vm13, %v1466_v16 }
 0x581   :  { %1477 = vst.msk [vmem:[#allocation3 + $0x28] sm:$0xf8] %vm1476_vm14, %v1466_v16  ;;  %v1468_v17 = vpop.permute.xlu0 %1467  ;;  %v1485_v20 = vld [vmem:[#allocation3] sm:$0xff] }
 0x582   :  { %v1486_v19 = vld [vmem:[#allocation3 + $0x8] sm:$0xff]  ;;  %1478 = vst.msk [vmem:[#allocation3 + $0x30] sm:$0xff] %vm1452_vm10, %v1468_v17  ;;  %v1507_v23 = vld [vmem:[#allocation3] sm:$0xfe] }
 0x583   :  { %v1508_v21 = vld [vmem:[#allocation3 + $0x8] sm:$0xfe]  ;;  %1479 = vst.msk [vmem:[#allocation3 + $0x38] sm:$0xff] %vm1082_vm3, %v1468_v17  ;;  %2251 = vmatprep.mubr.msk.f32.mxu0 %vm1422_vm4, %v1486_v19  ;;  %v1470_v24 = vpop.permute.xlu1 %1469  ;;  %v3723_v26 = vld [vmem:[#allocation3 + $0x10] sm:$0xff]  ;;  %v1537_v27 = vrot.slane %v1507_v23, 1  ;;  %vm1891_vm3 = vcmask 1044480  }
 0x584   :  { %v1540_v22 = vrot.slane %v1508_v21, 1  ;;  %1698 = vmatmul.mubr.f32.vlgmr.msra.gmra.mxu0 %v1485_v20  ;;  %v3721_v25 = vld [vmem:[#allocation3 + $0x18] sm:$0xff]  ;;  %1481 = vst.msk [vmem:[#allocation3 + $0x40] sm:$0x7] %vm1480_vm15, %v1470_v24  ;;  %v1538_v29 = vrot.slane %v3723_v26, 1  ;;  %v3796_v20 = vld [vmem:[%s4042_s7 + $0x170] sm:$0xff] }
 0x585   :  { %1483 = vst.msk [vmem:[#allocation3 + $0x48] sm:$0x7] %vm1482_vm0, %v1470_v24  ;;  %1909 = vmatpush1.msra.mxu0 %v3454_v32  ;;  %v1541_v28 = vrot.slane %v3721_v25, 1  ;;  %2252 = vmatprep.mubr.msk.f32.mxu0 %vm1422_vm4, %v3721_v25  ;;  %v1509_v42 = vld [vmem:[#allocation3 + $0x20] sm:$0x1]  ;;  %v3737_v32 = vld [vmem:[%s4042_s7 + $0x198] sm:$0xff] }
 0x586   :  { %1910 = vmatprep.subr.mxu0 %v3477_v61  ;;  %v1510_v30 = vld [vmem:[#allocation3 + $0x28] sm:$0x1]  ;;  %v1539_v45 = vsel %vm1536_vm1, %v1537_v27, %v1538_v29  ;;  %v1709_v48 = vld [vmem:[#allocation3 + $0x8] sm:$0xfc]  ;;  %v1543_v50 = vrot.slane %v1509_v42, 1  ;;  %v1740_v53 = vrot.slane %v3721_v25, 2 }
 0x587   :  { %1911 = vmatpush1.msra.mxu0 %v3461_v59  ;;  %v1542_v44 = vsel %vm1536_vm1, %v1540_v22, %v1541_v28  ;;  %v1545_v47 = vrot.slane %v1510_v30, 1  ;;  %v1739_v54 = vrot.slane %v1709_v48, 2  ;;  %v3770_v17 = vld [vmem:[%s4042_s7 + $0x180] sm:$0xff]  ;;  %v1863_v22 = vld [vmem:[#allocation3 + $0x20] sm:$0xf8] }
 0x588   :  { %2249 = vmatprep.mubr.msk.f32.mxu1 %vm1422_vm4, %v1542_v44  ;;  %1912 = vmatprep.subr.mxu0 %v3477_v61  ;;  %v1864_v52 = vld [vmem:[#allocation3 + $0x28] sm:$0xf8]  ;;  %v1544_v56 = vsel %vm1536_vm1, %v1538_v29, %v1543_v50  ;;  %v1892_v27 = vrot.slane %v1863_v22, 3  ;;  %v1708_v29 = vld [vmem:[#allocation3] sm:$0xfc] }
 0x589   :  { %1618 = vmatmul.mubr.f32.vlgmr.msra.gmra.mxu1 %v1539_v45  ;;  %1703 = vmatmul.mubr.f32.gmra.mxu0 %v3723_v26  ;;  %v1546_v59 = vsel %vm1536_vm1, %v1541_v28, %v1545_v47  ;;  %v1895_v16 = vrot.slane %v1864_v52, 3  ;;  %v3870_v21 = vld [vmem:[#allocation3 + $0x30] sm:$0xff]  ;;  %v1736_v44 = vrot.slane %v1708_v29, 2  ;;  %v1737_v45 = vrot.slane %v3723_v26, 2  ;;  %v2079_v26 = vld [vmem:[#allocation3 + $0x28] sm:$0xf0] }
 0x58a   :  { %1753 = vmatpush1.msra.mxu1 %v3737_v32  ;;  %1913 = vmatpush1.msra.mxu0 %v3483_v62  ;;  %v3750_v51 = vld [vmem:[#allocation3 + $0x38] sm:$0xff]  ;;  %v3761_v62 = vld [vmem:[%s4042_s7 + $0x188] sm:$0xff]  ;;  %v1893_v24 = vrot.slane %v3870_v21, 3 }
 0x58b   :  { %1754 = vmatprep.subr.mxu1 %v3477_v61  ;;  %1914 = vmatprep.subr.mxu0 %v3477_v61  ;;  %v1896_v55 = vrot.slane %v3750_v51, 3  ;;  %v1865_v30 = vld [vmem:[#allocation3 + $0x40] sm:$0x7]  ;;  %v2109_v50 = vrot.slane %v3750_v51, 4 }
 0x58c   :  { %2250 = vmatprep.mubr.msk.f32.mxu1 %vm1422_vm4, %v1546_v59  ;;  %1755 = vmatpush1.msra.mxu1 %v3746_v49  ;;  %v1866_v23 = vld [vmem:[#allocation3 + $0x48] sm:$0x7]  ;;  %v1894_v42 = vsel %vm1891_vm3, %v1892_v27, %v1893_v24  ;;  %v1898_v47 = vrot.slane %v1865_v30, 3  ;;  %v1710_v52 = vld [vmem:[#allocation3 + $0x20] sm:$0x3] }
 0x58d   :  { %1915 = vmatpush1.msra.mxu0 %v3497_v63  ;;  %1756 = vmatprep.subr.mxu1 %v3477_v61  ;;  %v1741_v63 = vsel %vm1735_vm2, %v1739_v54, %v1740_v53  ;;  %v1897_v19 = vsel %vm1891_vm3, %v1895_v16, %v1896_v55  ;;  %v1900_v28 = vrot.slane %v1866_v23, 3  ;;  %v1738_v54 = vsel %vm1735_vm2, %v1736_v44, %v1737_v45 }
 0x58e   :  { %1916 = vmatprep.subr.mxu0 %v3477_v61  ;;  %1623 = vmatmul.mubr.f32.gmra.mxu1 %v1544_v56  ;;  %v1742_v16 = vrot.slane %v1710_v52, 2 }
 0x58f   :  { %1757 = vmatpush1.msra.mxu1 %v3761_v62  ;;  %1917 = vmatpush1.msra.mxu0 %v3511_v2  ;;  %v3787_v2 = vld [vmem:[%s4042_s7 + $0x178] sm:$0xff]  ;;  %v1901_v48 = vsel %vm1891_vm3, %v1896_v55, %v1900_v28  ;;  %v1899_v55 = vsel %vm1891_vm3, %v1893_v24, %v1898_v47 }
 0x590   :  { %1758 = vmatprep.subr.mxu1 %v3477_v61  ;;  %2271 = vmatprep.mubr.msk.f32.mxu1 %vm1422_vm4, %v1741_v63  ;;  %v1840_v63 = vld [vmem:[#allocation3 + $0x28] sm:$0xfc] }
 0x591   :  { %1918 = vmatprep.subr.mxu0 %v3477_v61  ;;  %1759 = vmatpush1.msra.mxu1 %v3770_v17  ;;  %v1990_v25 = vrot.slane %v1840_v63, 2 }
 0x592   :  { %1919 = vmatpush1.msra.mxu0 %v3525_v6  ;;  %2292 = vmatprep.mubr.msk.f32.mxu0 %vm1422_vm4, %v1897_v19  ;;  %v3805_v6 = vld [vmem:[%s4042_s7 + $0x168] sm:$0xff]  ;;  %v1991_v19 = vrot.slane %v3750_v51, 2  ;;  %v2273_v51 = vld [vmem:[%s4043_s8] ss:$0 sm:$0xff] }
 0x593   :  { %1760 = vmatprep.subr.mxu1 %v3477_v61  ;;  %1920 = vmatprep.subr.mxu0 %v3477_v61 }
 0x594   :  { %1761 = vmatpush1.msra.mxu1 %v3787_v2  ;;  %1921 = vmatpush1.msra.mxu0 %v3539_v11  ;;  %v3814_v11 = vld [vmem:[%s4042_s7 + $0x160] sm:$0xff] }
 0x595   :  { %1762 = vmatprep.subr.mxu1 %v3477_v61  ;;  %1922 = vmatprep.subr.mxu0 %v3477_v61 }
 0x596   :  { %1763 = vmatpush1.msra.mxu1 %v3796_v20  ;;  %1923 = vmatpush1.msra.mxu0 %v3553_v10  ;;  %v3823_v10 = vld [vmem:[%s4042_s7 + $0x158] sm:$0xff] }
 0x597   :  { %1764 = vmatprep.subr.mxu1 %v3477_v61  ;;  %1924 = vmatprep.subr.mxu0 %v3477_v61 }
 0x598   :  { %1765 = vmatpush1.msra.mxu1 %v3805_v6  ;;  %1925 = vmatpush1.msra.mxu0 %v3567_v14  ;;  %v3832_v14 = vld [vmem:[%s4042_s7 + $0x150] sm:$0xff] }
 0x599   :  { %1766 = vmatprep.subr.mxu1 %v3477_v61  ;;  %1926 = vmatprep.subr.mxu0 %v3477_v61 }
 0x59a   :  { %1767 = vmatpush1.msra.mxu1 %v3814_v11  ;;  %1927 = vmatpush1.msra.mxu0 %v3581_v33  ;;  %v3841_v33 = vld [vmem:[%s4042_s7 + $0x148] sm:$0xff] }
 0x59b   :  { %1768 = vmatprep.subr.mxu1 %v3477_v61  ;;  %1928 = vmatprep.subr.mxu0 %v3477_v61 }
 0x59c   :  { %1769 = vmatpush1.msra.mxu1 %v3823_v10  ;;  %1929 = vmatpush1.msra.mxu0 %v3595_v35  ;;  %v3850_v35 = vld [vmem:[%s4042_s7 + $0x140] sm:$0xff] }
 0x59d   :  { %1770 = vmatprep.subr.mxu1 %v3477_v61  ;;  %1930 = vmatprep.subr.mxu0 %v3477_v61 }
 0x59e   :  { %1771 = vmatpush1.msra.mxu1 %v3832_v14  ;;  %1931 = vmatpush1.msra.mxu0 %v3609_v37  ;;  %v3859_v37 = vld [vmem:[%s4042_s7 + $0x138] sm:$0xff] }
 0x59f   :  { %1772 = vmatprep.subr.mxu1 %v3477_v61  ;;  %1932 = vmatprep.subr.mxu0 %v3477_v61 }
 0x5a0   :  { %1773 = vmatpush1.msra.mxu1 %v3841_v33  ;;  %1933 = vmatpush1.msra.mxu0 %v3642_v7  ;;  %v3868_v7 = vld [vmem:[%s4042_s7 + $0x130] sm:$0xff] }
 0x5a1   :  { %1774 = vmatprep.subr.mxu1 %v3477_v61  ;;  %1934 = vmatprep.subr.mxu0 %v3477_v61 }
 0x5a2   :  { %1775 = vmatpush1.msra.mxu1 %v3850_v35  ;;  %1935 = vmatpush1.msra.mxu0 %v3652_v5  ;;  %v3879_v5 = vld [vmem:[%s4042_s7 + $0x128] sm:$0xff] }
 0x5a3   :  { %1776 = vmatprep.subr.mxu1 %v3477_v61  ;;  %1936 = vmatprep.subr.mxu0 %v3477_v61 }
 0x5a4   :  { %1777 = vmatpush1.msra.mxu1 %v3859_v37  ;;  %1937 = vmatpush1.msra.mxu0 %v3670_v18  ;;  %v3889_v18 = vld [vmem:[%s4042_s7 + $0x120] sm:$0xff] }
 0x5a5   :  { %1778 = vmatprep.subr.mxu1 %v3477_v61  ;;  %1938 = vmatprep.subr.mxu0 %v3477_v61 }
 0x5a6   :  { %1779 = vmatpush1.msra.mxu1 %v3868_v7  ;;  %1939 = vmatpush1.msra.mxu0 %v3680_v40  ;;  %v3898_v40 = vld [vmem:[%s4042_s7 + $0x1a8] sm:$0xff] }
 0x5a7   :  { %1780 = vmatprep.subr.mxu1 %v3477_v61  ;;  %1968 = vmatprep.subr.mxu0 %v3477_v61 }
 0x5a8   :  { %1781 = vmatpush1.msra.mxu1 %v3879_v5  ;;  %1969 = vmatpush2.msra.mxu0 %v3699_v43  ;;  %v1711_v43 = vld [vmem:[#allocation3 + $0x28] sm:$0x3] }
 0x5a9   :  { %1782 = vmatprep.subr.mxu1 %v3477_v61  ;;  %1970 = vmatprep.subr.mxu0 %v3477_v61  ;;  %v1744_v59 = vrot.slane %v1711_v43, 2 }
 0x5aa   :  { %1783 = vmatpush1.msra.mxu1 %v3889_v18  ;;  %1971 = vmatpush2.msra.mxu0 %v3705_v46  ;;  %v3913_v46 = vld [vmem:[%s4042_s7 + $0x1a0] sm:$0xff] }
 0x5ab   :  { %1812 = vmatprep.subr.mxu1 %v3477_v61  ;;  %1973 = vmatmul.mubr.f32.vlgmr.msra.gmra.mxu0 %v1894_v42  ;;  %v1745_v56 = vsel %vm1735_vm2, %v1740_v53, %v1744_v59  ;;  %v1992_v53 = vsel %vm1735_vm2, %v1990_v25, %v1991_v19 }
 0x5ac   :  { %2121 = vmatprep.subr.mxu0 %v3477_v61  ;;  %1813 = vmatpush2.msra.mxu1 %v3898_v40 }
 0x5ad   :  { %2293 = vmatprep.mubr.msk.f32.mxu0 %vm1422_vm4, %v1901_v48  ;;  %2122 = vmatpush1.msra.mxu0 %v3737_v32  ;;  %v2108_v32 = vrot.slane %v2079_v26, 4 }
 0x5ae   :  { %1814 = vmatprep.subr.mxu1 %v3477_v61  ;;  %2123 = vmatprep.subr.mxu0 %v3477_v61 }
 0x5af   :  { %1815 = vmatpush2.msra.mxu1 %v3913_v46  ;;  %2124 = vmatpush1.msra.mxu0 %v3746_v49  ;;  %v2110_v49 = vsel %vm2104_vm5, %v2108_v32, %v2109_v50 }
 0x5b0   :  { %1817 = vmatmul.mubr.f32.vlgmr.msra.gmra.mxu1 %v1738_v54  ;;  %1978 = vmatmul.mubr.f32.gmra.mxu0 %v1899_v55 }
 0x5b1   :  { %2003 = vmatprep.subr.mxu1 %v3477_v61  ;;  %2125 = vmatprep.subr.mxu0 %v3477_v61 }
 0x5b2   :  { %2272 = vmatprep.mubr.msk.f32.mxu1 %vm1422_vm4, %v1745_v56  ;;  %2004 = vmatpush1.msra.mxu1 %v3444_v57  ;;  %v1743_v57 = vsel %vm1735_vm2, %v1737_v45, %v1742_v16 }
 0x5b3   :  { %2126 = vmatpush1.msra.mxu0 %v3761_v62  ;;  %2314 = vmatprep.mubr.msk.f32.mxu0 %vm1422_vm4, %v2110_v49 }
 0x5b4   :  { %2005 = vmatprep.subr.mxu1 %v3477_v61  ;;  %2127 = vmatprep.subr.mxu0 %v3477_v61 }
 0x5b5   :  { %2006 = vmatpush1.msra.mxu1 %v3449_v58  ;;  %2128 = vmatpush1.msra.mxu0 %v3770_v17  ;;  %v2081_v58 = vld [vmem:[#allocation3 + $0x48] sm:$0xf] }
 0x5b6   :  { %1822 = vmatmul.mubr.f32.gmra.mxu1 %v1743_v57  ;;  %2007 = vmatprep.subr.mxu1 %v3477_v61 }
 0x5b7   :  { %2129 = vmatprep.subr.mxu0 %v3477_v61  ;;  %2008 = vmatpush1.msra.mxu1 %v3475_v60  ;;  %v2078_v60 = vld [vmem:[#allocation3 + $0x20] sm:$0xf0] }
 0x5b8   :  { %2294 = vmatprep.mubr.msk.f32.mxu1 %vm1422_vm4, %v1992_v53  ;;  %2130 = vmatpush1.msra.mxu0 %v3787_v2 }
 0x5b9   :  { %2009 = vmatprep.subr.mxu1 %v3477_v61  ;;  %2131 = vmatprep.subr.mxu0 %v3477_v61 }
 0x5ba   :  { %2010 = vmatpush1.msra.mxu1 %v3491_v0  ;;  %2132 = vmatpush1.msra.mxu0 %v3796_v20  ;;  %v2106_v0 = vrot.slane %v3870_v21, 4 }
 0x5bb   :  { %2011 = vmatprep.subr.mxu1 %v3477_v61  ;;  %2133 = vmatprep.subr.mxu0 %v3477_v61 }
 0x5bc   :  { %2012 = vmatpush1.msra.mxu1 %v3505_v1  ;;  %2134 = vmatpush1.msra.mxu0 %v3805_v6  ;;  %v2113_v1 = vrot.slane %v2081_v58, 4 }
 0x5bd   :  { %2013 = vmatprep.subr.mxu1 %v3477_v61  ;;  %2135 = vmatprep.subr.mxu0 %v3477_v61 }
 0x5be   :  { %2014 = vmatpush1.msra.mxu1 %v3519_v4  ;;  %2136 = vmatpush1.msra.mxu0 %v3814_v11  ;;  %v2080_v4 = vld [vmem:[#allocation3 + $0x40] sm:$0xf] }
 0x5bf   :  { %2015 = vmatprep.subr.mxu1 %v3477_v61  ;;  %2137 = vmatprep.subr.mxu0 %v3477_v61 }
 0x5c0   :  { %2016 = vmatpush1.msra.mxu1 %v3533_v9  ;;  %2138 = vmatpush1.msra.mxu0 %v3823_v10  ;;  %v2105_v9 = vrot.slane %v2078_v60, 4 }
 0x5c1   :  { %2017 = vmatprep.subr.mxu1 %v3477_v61  ;;  %2139 = vmatprep.subr.mxu0 %v3477_v61 }
 0x5c2   :  { %2018 = vmatpush1.msra.mxu1 %v3547_v13  ;;  %2140 = vmatpush1.msra.mxu0 %v3832_v14  ;;  %v1844_v13 = vld [vmem:[#allocation3 + $0x48] sm:$0x3] }
 0x5c3   :  { %2019 = vmatprep.subr.mxu1 %v3477_v61  ;;  %2141 = vmatprep.subr.mxu0 %v3477_v61 }
 0x5c4   :  { %2020 = vmatpush1.msra.mxu1 %v3561_v12  ;;  %2142 = vmatpush1.msra.mxu0 %v3841_v33  ;;  %v1839_v12 = vld [vmem:[#allocation3 + $0x20] sm:$0xfc] }
 0x5c5   :  { %2021 = vmatprep.subr.mxu1 %v3477_v61  ;;  %2143 = vmatprep.subr.mxu0 %v3477_v61 }
 0x5c6   :  { %2022 = vmatpush1.msra.mxu1 %v3575_v15  ;;  %2144 = vmatpush1.msra.mxu0 %v3850_v35  ;;  %v2107_v15 = vsel %vm2104_vm5, %v2105_v9, %v2106_v0 }
 0x5c7   :  { %2023 = vmatprep.subr.mxu1 %v3477_v61  ;;  %2145 = vmatprep.subr.mxu0 %v3477_v61 }
 0x5c8   :  { %2024 = vmatpush1.msra.mxu1 %v3589_v34  ;;  %2146 = vmatpush1.msra.mxu0 %v3859_v37  ;;  %v1988_v34 = vrot.slane %v3870_v21, 2 }
 0x5c9   :  { %2025 = vmatprep.subr.mxu1 %v3477_v61  ;;  %2147 = vmatprep.subr.mxu0 %v3477_v61 }
 0x5ca   :  { %2026 = vmatpush1.msra.mxu1 %v3603_v36  ;;  %2148 = vmatpush1.msra.mxu0 %v3868_v7  ;;  %v2111_v36 = vrot.slane %v2080_v4, 4 }
 0x5cb   :  { %2027 = vmatprep.subr.mxu1 %v3477_v61  ;;  %2149 = vmatprep.subr.mxu0 %v3477_v61 }
 0x5cc   :  { %2028 = vmatpush1.msra.mxu1 %v3617_v38  ;;  %2150 = vmatpush1.msra.mxu0 %v3879_v5  ;;  %v2114_v38 = vsel %vm2104_vm5, %v2109_v50, %v2113_v1  ;;  %v2112_v17 = vsel %vm2104_vm5, %v2106_v0, %v2111_v36 }
 0x5cd   :  { %2029 = vmatprep.subr.mxu1 %v3477_v61  ;;  %2151 = vmatprep.subr.mxu0 %v3477_v61 }
 0x5ce   :  { %2030 = vmatpush1.msra.mxu1 %v3626_v39  ;;  %2152 = vmatpush1.msra.mxu0 %v3889_v18  ;;  %v1995_v39 = vrot.slane %v1844_v13, 2 }
 0x5cf   :  { %2031 = vmatprep.subr.mxu1 %v3477_v61  ;;  %2181 = vmatprep.subr.mxu0 %v3477_v61 }
 0x5d0   :  { %2032 = vmatpush1.msra.mxu1 %v3647_v3  ;;  %2182 = vmatpush2.msra.mxu0 %v3898_v40  ;;  %v1843_v3 = vld [vmem:[#allocation3 + $0x40] sm:$0x3]  ;;  %v1996_v20 = vsel %vm1735_vm2, %v1991_v19, %v1995_v39 }
 0x5d1   :  { %2033 = vmatprep.subr.mxu1 %v3477_v61  ;;  %2183 = vmatprep.subr.mxu0 %v3477_v61  ;;  %v1993_v2 = vrot.slane %v1843_v3, 2 }
 0x5d2   :  { %2034 = vmatpush1.msra.mxu1 %v3659_v8  ;;  %2184 = vmatpush2.msra.mxu0 %v3913_v46  ;;  %v1987_v8 = vrot.slane %v1839_v12, 2 }
 0x5d3   :  { %2063 = vmatprep.subr.mxu1 %v3477_v61  ;;  %2186 = vmatmul.mubr.f32.vlgmr.msra.gmra.mxu0 %v2107_v15 }
 0x5d4   :  { %2064 = vmatpush2.msra.mxu1 %v3675_v31  ;;  %2315 = vmatprep.mubr.msk.f32.mxu0 %vm1422_vm4, %v2114_v38  ;;  %v1989_v62 = vsel %vm1735_vm2, %v1987_v8, %v1988_v34  ;;  %v1994_v31 = vsel %vm1735_vm2, %v1988_v34, %v1993_v2 }
 0x5d5   :  { %2065 = vmatprep.subr.mxu1 %v3477_v61 }
 0x5d6   :  { %2066 = vmatpush2.msra.mxu1 %v3687_v41 }
 0x5d7   :  { %2068 = vmatmul.mubr.f32.vlgmr.msra.gmra.mxu1 %v1989_v62  ;;  %2191 = vmatmul.mubr.f32.gmra.mxu0 %v2112_v17 }
 0x5d8   :  { %2295 = vmatprep.mubr.msk.f32.mxu1 %vm1422_vm4, %v1996_v20 }
 0x5db   :  { %2073 = vmatmul.mubr.f32.gmra.mxu1 %v1994_v31 }
 0x644   :  { %v1699_v6 = vpop.f32.mrf.mxu0 }
 0x646   :  { %v1701_v61 = vpop.f32.mrf.mxu0 }
 0x649   :  { %v1619_v11 = vpop.f32.mrf.mxu1  ;;  %v1704_v41 = vpop.f32.mrf.mxu0 }
 0x64a   :  { %v1700_v21 = vadd.f32 %v1699_v6, %v1619_v11 }
 0x64b   :  { %v1621_v10 = vpop.f32.mrf.mxu1  ;;  %v1706_v14 = vpop.f32.mrf.mxu0 }
 0x64e   :  { %v1624_v33 = vpop.f32.mrf.mxu1 }
 0x64f   :  { %v1705_v28 = vadd.f32 %v1704_v41, %v1624_v33 }
 0x650   :  { %v1626_v35 = vpop.f32.mrf.mxu1 }
 0x66b   :  { %v1974_v37 = vpop.f32.mrf.mxu0 }
 0x66d   :  { %v1976_v7 = vpop.f32.mrf.mxu0 }
 0x670   :  { %v1818_v5 = vpop.f32.mrf.mxu1  ;;  %v1979_v22 = vpop.f32.mrf.mxu0 }
 0x671   :  { %v1827_v23 = vadd.f32 %v1818_v5, %v1700_v21 }
 0x672   :  { %v1820_v24 = vpop.f32.mrf.mxu1  ;;  %v1981_v18 = vpop.f32.mrf.mxu0 }
 0x673   :  { %v1835_v27 = vadd.f32 %v2273_v51, %v1827_v23 }
 0x675   :  { %1837 = vst [vmem:[%s4044_s9] sm:$0xff] %v1835_v27 }
 0x676   :  { %v1823_v29 = vpop.f32.mrf.mxu1 }
 0x677   :  { %v1828_v30 = vadd.f32 %v1823_v29, %v1705_v28 }
 0x678   :  { %v1825_v40 = vpop.f32.mrf.mxu1 }
 0x679   :  { %v1836_v42 = vadd.f32 %v2273_v51, %v1828_v30 }
 0x67b   :  { %1838 = vst [vmem:[%s4044_s9 + $0x8] sm:$0xff] %v1836_v42 }
 0x693   :  { %v2187_v43 = vpop.f32.mrf.mxu0 }
 0x695   :  { %v2189_v44 = vpop.f32.mrf.mxu0 }
 0x697   :  { %v2069_v45 = vpop.f32.mrf.mxu1  ;;  %v2192_v47 = vpop.f32.mrf.mxu0 }
 0x698   :  { %v2070_v48 = vadd.f32 %v2069_v45, %v1974_v37 }
 0x699   :  { %v2071_v46 = vpop.f32.mrf.mxu1  ;;  %v2194_v59 = vpop.f32.mrf.mxu0 }
 0x69a   :  { %v2196_v26 = vadd.f32 %v2187_v43, %v2070_v48 }
 0x69b   :  { %v2074_v50 = vpop.f32.mrf.mxu1 }
 0x69c   :  { %v2198_v52 = vadd.f32 %v2273_v51, %v2196_v26  ;;  %v2075_v54 = vadd.f32 %v2074_v50, %v1979_v22 }
 0x69d   :  { %v2076_v55 = vpop.f32.mrf.mxu1 }
 0x69e   :  { %2200 = vst [vmem:[%s4044_s9 + $0x10] sm:$0xff] %v2198_v52  ;;  %v2197_v32 = vadd.f32 %v2192_v47, %v2075_v54 }
 0x6a0   :  { %v2199_v56 = vadd.f32 %v2273_v51, %v2197_v32 }
 0x6a2   :  { %2201 = vst [vmem:[%s4044_s9 + $0x18] sm:$0xff] %v2199_v56 }
 0x6a3   :  { %2206 = vsyncpa [#allocation5], 1 }

// kernel: sim_predictor_forward.2
= control target key start
LH: loop header
LB: loop body
LE: loop exit
PB: predicated region body
PF: predicated region fallthrough
CT: control target
= control target key end

     0   :  { %15 = vsyncpa [#allocation7], 0  ;;  %s3406_s0 = inlined_call_operand.vmem [shape: s32[2], index: 0, kind: input, shape index: {}]   ;;  %s3407_s1 = inlined_call_operand.vmem [shape: f32[16,16], index: 1, kind: input, shape index: {}]   ;;  %s3408_s2 = inlined_call_operand.vmem [shape: f32[2,16,64], index: 2, kind: input, shape index: {}]   ;;  %s3409_s3 = inlined_call_operand.vmem [shape: f32[16,128], index: 3, kind: input, shape index: {}]   ;;  %s3410_s4 = inlined_call_operand.vmem [shape: f32[2,1,64], index: 4, kind: input, shape index: {}]   ;;  %s3411_s5 = inlined_call_operand.vmem [shape: f32[2,32,64], index: 5, kind: input, shape index: {}]   ;;  %s3412_s6 = inlined_call_operand.vmem [shape: f32[16,128], index: 6, kind: input, shape index: {}]   ;;  %s3413_s7 = inlined_call_operand.vmem [shape: f32[2,1,64], index: 7, kind: input, shape index: {}]   ;;  %s3414_s8 = inlined_call_operand.vmem [shape: f32[32,8], index: 8, kind: input, shape index: {}]   ;;  %s3415_s9 = inlined_call_operand.vmem [shape: f32[1,8], index: 9, kind: input, shape index: {}]   ;;  %s3416_s10 = inlined_call_operand.hbm [shape: f32[2,8], index: 10, kind: output, shape index: {}]  }
   0x1   :  { %16 = vsyncpa [#allocation6], 0  ;;  %s23_s15 = sshll.u32 %s3406_s0, 4  ;;  %s24_s15 = int_to_ptr.vmem [resolvable:$true] %s23_s15 }
   0x2   :  { %s2821_s16 = scalar_lea.vmem %s24_s15, 16  ;;  %p2826_p1 = scmp.lt.s32.totalorder %s24_s15, %s24_s15 }
   0x3   :  { %p2822_p0 = scmp.ne.s32.totalorder %s24_s15, %s2821_s16  ;;  %p2827_p2 = scmp.lt.s32.totalorder %s2821_s16, %s2821_s16 }
   0x5   :  { %p2828_p3 = por %p2827_p2, %p2826_p1 }
   0x7   :  { %p2829_p4 = pnand %p2828_p3, %p2822_p0 }
   0x9   :  { %2832 = shalt.err (!%p2829_p4)
}
   0xa   :  { %s2857_s17 = smov [#allocation5]  }
   0xb   :  { %26 = dma.vmem_to_smem %s24_s15, 16, %s2857_s17, [#allocation7]  }
   0xc   :  { %2853 = dma.done.wait [#allocation7], 16  }
   0xd   :  { %2854 = vsyncadd [#allocation7], 4294967280 }
   0xe   :  { %48 = sfence }
   0xf   :  { %v2927_v0 = vld [vmem:[%s3409_s3 + $0x8] sm:$0xff]  ;;  %v2858_v2 = vmov 0.0   ;;  %v2936_v3 = vld [vmem:[%s3409_s3] sm:$0xff]  ;;  %vm2859_vm0 = vmmov 0   ;;  %vm60_vm1 = vcmask 130048   ;;  %v2384_v6 = vld [vmem:[%s3408_s2 + $0x18] sm:$0xff]  ;;  %v250_v21 = vlaneseq }
  0x10   :  { %v52_v1 = vld [vmem:[%s3408_s2 + $0x8] sm:$0xff]  ;;  %2539 = vmatprep.subr.mxu0 %v2858_v2  ;;  %2543 = vmatprep.mubr.msk.f32.mxu0 %vm2859_vm0, %v2858_v2  ;;  %v51_v4 = vld [vmem:[%s3408_s2] sm:$0xff]  ;;  %v2383_v8 = vld [vmem:[%s3408_s2 + $0x10] sm:$0xff]  ;;  %s2860_s12 = smov 64   ;;  %vm142_vm2 = vcmask 517120   ;;  %vm144_vm3 = vcmask 519170  }
  0x11   :  { %2540 = vmatpush3.msra.mxu0 %v2927_v0  ;;  %2525 = vmatprep.subr.mxu1 %v52_v1  ;;  %v49_v5 = vld [vmem:[%s3407_s1] sm:$0xff]  ;;  %v50_v7 = vld [vmem:[%s3407_s1 + $0x8] sm:$0xff]  ;;  %vm146_vm4 = vcmask 521220   ;;  %vm148_vm5 = vcmask 523270   ;;  %v3000_v22 = vshrl.u32 %v250_v21, 7  ;;  %s2862_s15 = smov 16  }
  0x12   :  { %2541 = vmatprep.subr.mxu0 %v2858_v2  ;;  %2526 = vmatpush3.msra.mxu1 %v52_v1  ;;  %v2380_v10 = vld [vmem:[%s3410_s4] ss:$0 sm:$0xff]  ;;  %v2386_v15 = vld [vmem:[%s3410_s4 + $0x1] ss:$0 sm:$0xff]  ;;  %s2861_s4 = smov 96   ;;  %s2863_s16 = smov 32  }
  0x13   :  { %2542 = vmatpush3.msra.mxu0 %v2936_v3  ;;  %2527 = vmatprep.subr.mxu1 %v51_v4  ;;  %vm252_vm6 = vcmp.lt.s32.totalorder %v3000_v22, 2  ;;  %s2864_s17 = smov 80   ;;  %vm361_vm7 = vcmask 123904   ;;  %vm366_vm8 = vcmask 257154   ;;  %vm1165_vm9 = vcmask 261120   ;;  %s2247_s23 = sld [smem:[#allocation5]] }
  0x14   :  { %2544 = vmatmul.mubr.f32.vlgmr.msra.gmra.mxu0 %v2858_v2  ;;  %2528 = vmatpush3.msra.mxu1 %v51_v4  ;;  %vm2269_vm10 = vcmask 1040384   ;;  %s2865_s30 = smov [#allocation8]   ;;  %vm2358_vm11 = vcmask 58368  }
  0x15   :  { %2529 = vmatprep.mubr.msk.f32.mxu1 %vm60_vm1, %v49_v5  ;;  %2532 = vmatprep.subr.mxu1 %v2384_v6  ;;  %s2366_s11 = sshll.u32 %s2865_s30, 4  ;;  %s2367_s11 = int_to_ptr.vmem [resolvable:$true] %s2366_s11 }
  0x16   :  { %2530 = vmatmul.mubr.msk.f32.vlgmr.msra.gmra.mxu1 %vm60_vm1, %v50_v7  ;;  %2553 = vmatprep.subr.mxu0 %v2858_v2  ;;  %p2838_p10 = scmp.lt.s32.totalorder %s2367_s11, %s2367_s11 }
  0x17   :  { %2533 = vmatpush3.msra.mxu1 %v2384_v6  ;;  %2536 = vmatprep.mubr.msk.f32.mxu1 %vm60_vm1, %v49_v5 }
  0x18   :  { %2534 = vmatprep.subr.mxu1 %v2383_v8  ;;  %2554 = vmatpush3.msra.mxu0 %v2927_v0 }
  0x19   :  { %2535 = vmatpush3.msra.mxu1 %v2383_v8  ;;  %2555 = vmatprep.subr.mxu0 %v2858_v2  ;;  %p2248_p6 = scmp.gt.s32.totalorder %s2247_s23, 1  ;;  %p2430_p8 = scmp.lt.s32.totalorder %s2247_s23, 8 }
  0x1a   :  { %2537 = vmatmul.mubr.msk.f32.vlgmr.msra.gmra.mxu1 %vm60_vm1, %v50_v7  ;;  %2546 = vmatprep.subr.mxu1 %v2858_v2 }
  0x1b   :  { %2547 = vmatpush3.msra.mxu1 %v2927_v0  ;;  %2550 = vmatprep.mubr.msk.f32.mxu1 %vm2859_vm0, %v2858_v2  ;;  %s3418_s23 = smov (!%p2248_p6, %s2247_s23), 1 }
  0x1c   :  { %2548 = vmatprep.subr.mxu1 %v2858_v2  ;;  %2556 = vmatpush3.msra.mxu0 %v2936_v3  ;;  %s3422_s23 = smov (!%p2430_p8, %s3418_s23), 8 }
  0x1d   :  { %2549 = vmatpush3.msra.mxu1 %v2936_v3  ;;  %2557 = vmatprep.mubr.msk.f32.mxu0 %vm2859_vm0, %v2858_v2  ;;  %s2435_s24 = sadd.s32 4294967295, %s3422_s23 }
  0x1e   :  { %2560 = vmatprep.subr.mxu1 %v2858_v2  ;;  %2567 = vmatprep.subr.mxu0 %v2858_v2  ;;  %s2436_s26 = sshll.u32 %s2435_s24, 1 }
  0x1f   :  { %s2254_s27 = scalar_lea.vmem [#allocation3], %s2436_s26 }
  0xd4   :  { %v322_v9 = vpop.f32.mrf.mxu0 }
  0xd5   :  { %327 = vrot.lane.b32.xlu0 %v322_v9, %s2860_s12 }
  0xd6   :  { %v2545_v11 = vpop.f32.mrf.mxu0  ;;  %v2531_v12 = vpop.f32.mrf.mxu1 }
  0xd7   :  { %v139_v13 = vadd.f32 %v2531_v12, %v2380_v10 }
  0xd8   :  { %v133_v14 = vpop.f32.mrf.mxu1 }
  0xd9   :  { %150 = vst.msk [vmem:[#allocation4 + $0x10] sm:$0x3] %vm142_vm2, %v139_v13  ;;  %v134_v16 = vadd.f32 %v2380_v10, %v133_v14 }
  0xda   :  { %151 = vst.msk [vmem:[#allocation4 + $0x12] sm:$0xc] %vm144_vm3, %v139_v13  ;;  %v2538_v17 = vpop.f32.mrf.mxu1 }
  0xdb   :  { %152 = vst.msk [vmem:[#allocation4 + $0x14] sm:$0x30] %vm146_vm4, %v139_v13  ;;  %147 = vst.msk [vmem:[#allocation4 + $0x4] sm:$0x30] %vm146_vm4, %v134_v16  ;;  %v237_v18 = vadd.f32 %v2538_v17, %v2386_v15 }
  0xdc   :  { %153 = vst.msk [vmem:[#allocation4 + $0x16] sm:$0xc0] %vm148_vm5, %v139_v13  ;;  %149 = vst.msk [vmem:[#allocation4 + $0x6] sm:$0xc0] %vm148_vm5, %v134_v16  ;;  %v231_v19 = vpop.f32.mrf.mxu1 }
  0xdd   :  { %143 = vst.msk [vmem:[#allocation4] sm:$0x3] %vm142_vm2, %v134_v16  ;;  %243 = vst.msk [vmem:[#allocation4 + $0xe] sm:$0x3] %vm142_vm2, %v237_v18  ;;  %v232_v20 = vadd.f32 %v2386_v15, %v231_v19 }
  0xde   :  { %145 = vst.msk [vmem:[#allocation4 + $0x2] sm:$0xc] %vm144_vm3, %v134_v16  ;;  %242 = vst.msk [vmem:[#allocation4 + $0x8] sm:$0xc] %vm144_vm3, %v237_v18 }
  0xdf   :  { %240 = vst.msk [vmem:[#allocation4 - $0x4] sm:$0xc0] %vm148_vm5, %v237_v18  ;;  %244 = vst.msk [vmem:[#allocation4 + $0xc] sm:$0xc0] %vm148_vm5, %v232_v20 }
  0xe0   :  { %241 = vst.msk [vmem:[#allocation4 + $0x2] sm:$0x30] %vm146_vm4, %v237_v18  ;;  %245 = vst.msk [vmem:[#allocation4 + $0x12] sm:$0x30] %vm146_vm4, %v232_v20 }
  0xe1   :  { %246 = vst.msk [vmem:[#allocation4 + $0x18] sm:$0xc] %vm144_vm3, %v232_v20 }
  0xe2   :  { %247 = vst.msk [vmem:[#allocation4 + $0x1e] sm:$0x3] %vm142_vm2, %v232_v20 }
  0xe5   :  { %v557_v1 = vld [vmem:[#allocation4 + $0x8] sm:$0xf] }
  0xe6   :  { %v331_v25 = vld [vmem:[#allocation4] sm:$0xf] }
  0xe7   :  { %v445_v44 = vld [vmem:[#allocation4 + $0x4] sm:$0xf] }
 0x147   :  { %v328_v23 = vpop.permute.xlu0 %327 }
 0x148   :  { %v330_v24 = vsel %vm252_vm6, %v322_v9, %v328_v23 }
 0x149   :  { %v332_v26 = vadd.f32 %v331_v25, %v330_v24  ;;  %v669_v24 = vld [vmem:[#allocation4 + $0xc] sm:$0xf] }
 0x14b   :  { %2693 = vtanh.f32 %v332_v26  ;;  %v2389_v28 = vmul.f32 -1.442695, %v332_v26 }
 0x14d   :  { %2695 = vpow2.f32 %v2389_v28 }
 0x158   :  { %v2694_v27 = vpop.eup %2693 }
 0x159   :  { %342 = vrot.lane.b32.xlu0 %v2694_v27, %s2861_s4 }
 0x15a   :  { %v2696_v29 = vpop.eup %2695 }
 0x15b   :  { %v336_v30 = vadd.f32 1.0, %v2696_v29 }
 0x15d   :  { %2697 = vrcp.f32 %v336_v30 }
 0x16a   :  { %v2698_v31 = vpop.eup %2697 }
 0x16b   :  { %v340_v34 = vmul.f32 0.0, %v2698_v31 }
 0x1cb   :  { %v343_v32 = vpop.permute.xlu0 %342 }
 0x1cc   :  { %v345_v33 = vmul.f32 %v2698_v31, %v343_v32 }
 0x1ce   :  { %347 = vrot.lane.b32.xlu1 %v345_v33, %s2862_s15 }
 0x240   :  { %v348_v35 = vpop.permute.xlu1 %347 }
 0x241   :  { %v350_v36 = vadd.f32 %v348_v35, %v340_v34 }
 0x243   :  { %2699 = vtanh.f32 %v350_v36 }
 0x250   :  { %v2700_v37 = vpop.eup %2699 }
 0x251   :  { %353 = vrot.lane.b32.xlu1 %v2700_v37, %s2863_s16 }
 0x2c3   :  { %v354_v38 = vpop.permute.xlu1 %353 }
 0x2c4   :  { %v3008_v39 = vmul.f32 %v2698_v31, %v354_v38 }
 0x2c6   :  { %358 = vrot.lane.b32.xlu0 %v3008_v39, %s2864_s17 }
 0x338   :  { %v359_v40 = vpop.permute.xlu0 %358 }
 0x339   :  { %362 = vst.msk [vmem:[#allocation2] sm:$0x3] %vm361_vm7, %v359_v40  ;;  %2551 = vmatmul.mubr.msk.f32.vlgmr.msra.gmra.mxu1 %vm60_vm1, %v359_v40 }
 0x33a   :  { %2561 = vmatpush3.msra.mxu1 %v2927_v0  ;;  %2564 = vmatprep.mubr.msk.f32.mxu1 %vm2859_vm0, %v2858_v2 }
 0x33b   :  { %2562 = vmatprep.subr.mxu1 %v2858_v2 }
 0x33c   :  { %2563 = vmatpush3.msra.mxu1 %v2936_v3 }
 0x33d   :  { %2574 = vmatprep.subr.mxu1 %v2858_v2 }
 0x3f9   :  { %v436_v41 = vpop.f32.mrf.mxu1 }
 0x3fa   :  { %441 = vrot.lane.b32.xlu1 %v436_v41, %s2860_s12 }
 0x3fb   :  { %v2552_v42 = vpop.f32.mrf.mxu1 }
 0x46c   :  { %v442_v43 = vpop.permute.xlu1 %441 }
 0x46d   :  { %v444_v45 = vsel %vm252_vm6, %v436_v41, %v442_v43 }
 0x46e   :  { %v446_v46 = vadd.f32 %v445_v44, %v444_v45  ;;  %v781_v45 = vld [vmem:[#allocation4 + $0x10] sm:$0xf] }
 0x470   :  { %2701 = vtanh.f32 %v446_v46  ;;  %v2391_v48 = vmul.f32 -1.442695, %v446_v46 }
 0x472   :  { %2703 = vpow2.f32 %v2391_v48 }
 0x47d   :  { %v2702_v47 = vpop.eup %2701 }
 0x47e   :  { %456 = vrot.lane.b32.xlu0 %v2702_v47, %s2861_s4 }
 0x47f   :  { %v2704_v49 = vpop.eup %2703 }
 0x480   :  { %v450_v50 = vadd.f32 1.0, %v2704_v49 }
 0x482   :  { %2705 = vrcp.f32 %v450_v50 }
 0x48f   :  { %v2706_v51 = vpop.eup %2705 }
 0x490   :  { %v454_v54 = vmul.f32 %v2706_v51, %v350_v36 }
 0x4f0   :  { %v457_v52 = vpop.permute.xlu0 %456 }
 0x4f1   :  { %v459_v53 = vmul.f32 %v2706_v51, %v457_v52 }
 0x4f3   :  { %461 = vrot.lane.b32.xlu1 %v459_v53, %s2862_s15 }
 0x565   :  { %v462_v55 = vpop.permute.xlu1 %461 }
 0x566   :  { %v464_v56 = vadd.f32 %v462_v55, %v454_v54 }
 0x568   :  { %2707 = vtanh.f32 %v464_v56 }
 0x575   :  { %v2708_v57 = vpop.eup %2707 }
 0x576   :  { %467 = vrot.lane.b32.xlu0 %v2708_v57, %s2863_s16 }
 0x5e8   :  { %v468_v58 = vpop.permute.xlu0 %467 }
 0x5e9   :  { %v3026_v59 = vmul.f32 %v2706_v51, %v468_v58 }
 0x5eb   :  { %472 = vrot.lane.b32.xlu1 %v3026_v59, %s2864_s17 }
 0x65d   :  { %v473_v60 = vpop.permute.xlu1 %472 }
 0x65e   :  { %475 = vst.msk [vmem:[#allocation2 + $0x2] sm:$0x3] %vm361_vm7, %v473_v60  ;;  %2558 = vmatmul.mubr.msk.f32.vlgmr.msra.gmra.mxu0 %vm60_vm1, %v473_v60 }
 0x65f   :  { %2568 = vmatpush3.msra.mxu0 %v2927_v0  ;;  %2571 = vmatprep.mubr.msk.f32.mxu0 %vm2859_vm0, %v2858_v2 }
 0x660   :  { %2569 = vmatprep.subr.mxu0 %v2858_v2 }
 0x661   :  { %2570 = vmatpush3.msra.mxu0 %v2936_v3 }
 0x662   :  { %2581 = vmatprep.subr.mxu0 %v2858_v2 }
 0x71e   :  { %v548_v61 = vpop.f32.mrf.mxu0 }
 0x71f   :  { %553 = vrot.lane.b32.xlu0 %v548_v61, %s2860_s12 }
 0x720   :  { %v2559_v62 = vpop.f32.mrf.mxu0 }
 0x791   :  { %v554_v63 = vpop.permute.xlu0 %553 }
 0x792   :  { %v556_v4 = vsel %vm252_vm6, %v548_v61, %v554_v63 }
 0x793   :  { %v558_v5 = vadd.f32 %v557_v1, %v556_v4 }
 0x795   :  { %2709 = vtanh.f32 %v558_v5  ;;  %v2393_v7 = vmul.f32 -1.442695, %v558_v5  ;;  %v893_v5 = vld [vmem:[#allocation4 + $0x14] sm:$0xf] }
 0x797   :  { %2711 = vpow2.f32 %v2393_v7 }
 0x7a2   :  { %v2710_v6 = vpop.eup %2709 }
 0x7a3   :  { %568 = vrot.lane.b32.xlu1 %v2710_v6, %s2861_s4 }
 0x7a4   :  { %v2712_v8 = vpop.eup %2711 }
 0x7a5   :  { %v562_v9 = vadd.f32 1.0, %v2712_v8 }
 0x7a7   :  { %2713 = vrcp.f32 %v562_v9 }
 0x7b4   :  { %v2714_v10 = vpop.eup %2713 }
 0x7b5   :  { %v566_v13 = vmul.f32 %v2714_v10, %v464_v56 }
 0x815   :  { %v569_v11 = vpop.permute.xlu1 %568 }
 0x816   :  { %v571_v12 = vmul.f32 %v2714_v10, %v569_v11 }
 0x818   :  { %573 = vrot.lane.b32.xlu0 %v571_v12, %s2862_s15 }
 0x88a   :  { %v574_v14 = vpop.permute.xlu0 %573 }
 0x88b   :  { %v576_v15 = vadd.f32 %v574_v14, %v566_v13 }
 0x88d   :  { %2715 = vtanh.f32 %v576_v15 }
 0x89a   :  { %v2716_v16 = vpop.eup %2715 }
 0x89b   :  { %579 = vrot.lane.b32.xlu1 %v2716_v16, %s2863_s16 }
 0x90d   :  { %v580_v17 = vpop.permute.xlu1 %579 }
 0x90e   :  { %v3044_v18 = vmul.f32 %v2714_v10, %v580_v17 }
 0x910   :  { %584 = vrot.lane.b32.xlu0 %v3044_v18, %s2864_s17 }
 0x982   :  { %v585_v19 = vpop.permute.xlu0 %584 }
 0x983   :  { %587 = vst.msk [vmem:[#allocation2 + $0x4] sm:$0x3] %vm361_vm7, %v585_v19  ;;  %2565 = vmatmul.mubr.msk.f32.vlgmr.msra.gmra.mxu1 %vm60_vm1, %v585_v19 }
 0x984   :  { %2575 = vmatpush3.msra.mxu1 %v2927_v0  ;;  %2578 = vmatprep.mubr.msk.f32.mxu1 %vm2859_vm0, %v2858_v2 }
 0x985   :  { %2576 = vmatprep.subr.mxu1 %v2858_v2 }
 0x986   :  { %2577 = vmatpush3.msra.mxu1 %v2936_v3 }
 0x987   :  { %2588 = vmatprep.subr.mxu1 %v2858_v2 }
 0xa43   :  { %v660_v20 = vpop.f32.mrf.mxu1 }
 0xa44   :  { %665 = vrot.lane.b32.xlu1 %v660_v20, %s2860_s12 }
 0xa45   :  { %v2566_v21 = vpop.f32.mrf.mxu1 }
 0xab6   :  { %v666_v23 = vpop.permute.xlu1 %665 }
 0xab7   :  { %v668_v25 = vsel %vm252_vm6, %v660_v20, %v666_v23 }
 0xab8   :  { %v670_v26 = vadd.f32 %v669_v24, %v668_v25  ;;  %v1005_v25 = vld [vmem:[#allocation4 + $0x18] sm:$0xf] }
 0xaba   :  { %2717 = vtanh.f32 %v670_v26  ;;  %v2395_v28 = vmul.f32 -1.442695, %v670_v26 }
 0xabc   :  { %2719 = vpow2.f32 %v2395_v28 }
 0xac7   :  { %v2718_v27 = vpop.eup %2717 }
 0xac8   :  { %680 = vrot.lane.b32.xlu0 %v2718_v27, %s2861_s4 }
 0xac9   :  { %v2720_v29 = vpop.eup %2719 }
 0xaca   :  { %v674_v30 = vadd.f32 1.0, %v2720_v29 }
 0xacc   :  { %2721 = vrcp.f32 %v674_v30 }
 0xad9   :  { %v2722_v31 = vpop.eup %2721 }
 0xada   :  { %v678_v34 = vmul.f32 %v2722_v31, %v576_v15 }
 0xb3a   :  { %v681_v32 = vpop.permute.xlu0 %680 }
 0xb3b   :  { %v683_v33 = vmul.f32 %v2722_v31, %v681_v32 }
 0xb3d   :  { %685 = vrot.lane.b32.xlu1 %v683_v33, %s2862_s15 }
 0xbaf   :  { %v686_v35 = vpop.permute.xlu1 %685 }
 0xbb0   :  { %v688_v36 = vadd.f32 %v686_v35, %v678_v34 }
 0xbb2   :  { %2723 = vtanh.f32 %v688_v36 }
 0xbbf   :  { %v2724_v37 = vpop.eup %2723 }
 0xbc0   :  { %691 = vrot.lane.b32.xlu0 %v2724_v37, %s2863_s16 }
 0xc32   :  { %v692_v38 = vpop.permute.xlu0 %691 }
 0xc33   :  { %v3062_v40 = vmul.f32 %v2722_v31, %v692_v38 }
 0xc35   :  { %696 = vrot.lane.b32.xlu1 %v3062_v40, %s2864_s17 }
 0xca7   :  { %v697_v41 = vpop.permute.xlu1 %696 }
 0xca8   :  { %699 = vst.msk [vmem:[#allocation2 + $0x6] sm:$0x3] %vm361_vm7, %v697_v41  ;;  %2572 = vmatmul.mubr.msk.f32.vlgmr.msra.gmra.mxu0 %vm60_vm1, %v697_v41 }
 0xca9   :  { %2582 = vmatpush3.msra.mxu0 %v2927_v0  ;;  %2585 = vmatprep.mubr.msk.f32.mxu0 %vm2859_vm0, %v2858_v2 }
 0xcaa   :  { %2583 = vmatprep.subr.mxu0 %v2858_v2 }
 0xcab   :  { %2584 = vmatpush3.msra.mxu0 %v2936_v3 }
 0xd68   :  { %v772_v42 = vpop.f32.mrf.mxu0 }
 0xd69   :  { %777 = vrot.lane.b32.xlu0 %v772_v42, %s2860_s12 }
 0xd6a   :  { %v2573_v43 = vpop.f32.mrf.mxu0 }
 0xddb   :  { %v778_v44 = vpop.permute.xlu0 %777 }
 0xddc   :  { %v780_v46 = vsel %vm252_vm6, %v772_v42, %v778_v44 }
 0xddd   :  { %v782_v47 = vadd.f32 %v781_v45, %v780_v46 }
 0xddf   :  { %2725 = vtanh.f32 %v782_v47  ;;  %v2397_v49 = vmul.f32 -1.442695, %v782_v47  ;;  %v1117_v47 = vld [vmem:[#allocation4 + $0x1c] sm:$0xf] }
 0xde1   :  { %2727 = vpow2.f32 %v2397_v49 }
 0xdec   :  { %v2726_v48 = vpop.eup %2725 }
 0xded   :  { %792 = vrot.lane.b32.xlu1 %v2726_v48, %s2861_s4 }
 0xdee   :  { %v2728_v50 = vpop.eup %2727 }
 0xdef   :  { %v786_v51 = vadd.f32 1.0, %v2728_v50 }
 0xdf1   :  { %2729 = vrcp.f32 %v786_v51 }
 0xdfe   :  { %v2730_v52 = vpop.eup %2729 }
 0xdff   :  { %v790_v55 = vmul.f32 %v2730_v52, %v688_v36 }
 0xe5f   :  { %v793_v53 = vpop.permute.xlu1 %792 }
 0xe60   :  { %v795_v54 = vmul.f32 %v2730_v52, %v793_v53 }
 0xe62   :  { %797 = vrot.lane.b32.xlu0 %v795_v54, %s2862_s15 }
 0xed4   :  { %v798_v56 = vpop.permute.xlu0 %797 }
 0xed5   :  { %v800_v57 = vadd.f32 %v798_v56, %v790_v55 }
 0xed7   :  { %2731 = vtanh.f32 %v800_v57 }
 0xee4   :  { %v2732_v58 = vpop.eup %2731 }
 0xee5   :  { %803 = vrot.lane.b32.xlu1 %v2732_v58, %s2863_s16 }
 0xf57   :  { %v804_v60 = vpop.permute.xlu1 %803 }
 0xf58   :  { %v3079_v61 = vmul.f32 %v2730_v52, %v804_v60 }
 0xf5a   :  { %808 = vrot.lane.b32.xlu0 %v3079_v61, %s2864_s17 }
 0xfcc   :  { %v3083_v62 = vpop.permute.xlu0 %808 }
 0xfcd   :  { %2579 = vmatmul.mubr.msk.f32.vlgmr.msra.gmra.mxu1 %vm60_vm1, %v3083_v62 }
 0xfce   :  { %2589 = vmatpush3.msra.mxu1 %v2927_v0  ;;  %2592 = vmatprep.mubr.msk.f32.mxu1 %vm2859_vm0, %v2858_v2 }
 0xfcf   :  { %2590 = vmatprep.subr.mxu1 %v2858_v2 }
 0xfd0   :  { %2591 = vmatpush3.msra.mxu1 %v2936_v3 }
0x108d   :  { %v884_v63 = vpop.f32.mrf.mxu1 }
0x108e   :  { %889 = vrot.lane.b32.xlu1 %v884_v63, %s2860_s12 }
0x108f   :  { %v2580_v1 = vpop.f32.mrf.mxu1 }
0x1100   :  { %v890_v4 = vpop.permute.xlu1 %889 }
0x1101   :  { %v892_v6 = vsel %vm252_vm6, %v884_v63, %v890_v4  ;;  %v1157_v4 = vld [vmem:[%s3411_s5 + $0x18] sm:$0xff] }
0x1102   :  { %v894_v7 = vadd.f32 %v893_v5, %v892_v6  ;;  %v2410_v5 = vld [vmem:[%s3411_s5 + $0x38] sm:$0xff]  ;;  %v1156_v6 = vld [vmem:[%s3411_s5 + $0x10] sm:$0xff]  ;;  %2595 = vmatprep.subr.mxu0 %v1157_v4 }
0x1103   :  { %2606 = vmatprep.subr.mxu1 %v2410_v5 }
0x1104   :  { %2733 = vtanh.f32 %v894_v7  ;;  %v2399_v0 = vmul.f32 -1.442695, %v894_v7  ;;  %v2408_v7 = vld [vmem:[%s3411_s5 + $0x28] sm:$0xff] }
0x1106   :  { %2735 = vpow2.f32 %v2399_v0  ;;  %v2407_v0 = vld [vmem:[%s3411_s5 + $0x20] sm:$0xff] }
0x1111   :  { %v2734_v8 = vpop.eup %2733 }
0x1112   :  { %904 = vrot.lane.b32.xlu0 %v2734_v8, %s2861_s4  ;;  %v1154_v8 = vld [vmem:[%s3411_s5] sm:$0xff] }
0x1113   :  { %v2736_v9 = vpop.eup %2735 }
0x1114   :  { %v898_v10 = vadd.f32 1.0, %v2736_v9 }
0x1116   :  { %2737 = vrcp.f32 %v898_v10 }
0x1123   :  { %v2738_v3 = vpop.eup %2737 }
0x1124   :  { %v902_v13 = vmul.f32 %v2738_v3, %v800_v57 }
0x1184   :  { %v905_v11 = vpop.permute.xlu0 %904 }
0x1185   :  { %v907_v12 = vmul.f32 %v2738_v3, %v905_v11 }
0x1187   :  { %909 = vrot.lane.b32.xlu1 %v907_v12, %s2862_s15 }
0x11f9   :  { %v910_v14 = vpop.permute.xlu1 %909 }
0x11fa   :  { %v912_v15 = vadd.f32 %v910_v14, %v902_v13 }
0x11fc   :  { %2739 = vtanh.f32 %v912_v15 }
0x1209   :  { %v2740_v16 = vpop.eup %2739 }
0x120a   :  { %915 = vrot.lane.b32.xlu0 %v2740_v16, %s2863_s16 }
0x127c   :  { %v916_v17 = vpop.permute.xlu0 %915 }
0x127d   :  { %v3098_v19 = vmul.f32 %v2738_v3, %v916_v17  ;;  %v3182_v17 = vld [vmem:[%s3412_s6 + $0x8] sm:$0xff] }
0x127f   :  { %920 = vrot.lane.b32.xlu1 %v3098_v19, %s2864_s17 }
0x12f1   :  { %v3102_v20 = vpop.permute.xlu1 %920 }
0x12f2   :  { %2586 = vmatmul.mubr.msk.f32.vlgmr.msra.gmra.mxu0 %vm60_vm1, %v3102_v20 }
0x12f3   :  { %2596 = vmatpush3.msra.mxu0 %v1157_v4 }
0x12f4   :  { %2597 = vmatprep.subr.mxu0 %v1156_v6 }
0x12f5   :  { %2598 = vmatpush3.msra.mxu0 %v1156_v6 }
0x13b2   :  { %v996_v21 = vpop.f32.mrf.mxu0 }
0x13b3   :  { %1001 = vrot.lane.b32.xlu0 %v996_v21, %s2860_s12 }
0x13b4   :  { %v2587_v23 = vpop.f32.mrf.mxu0 }
0x1425   :  { %v1002_v24 = vpop.permute.xlu0 %1001 }
0x1426   :  { %v1004_v26 = vsel %vm252_vm6, %v996_v21, %v1002_v24 }
0x1427   :  { %v1006_v27 = vadd.f32 %v1005_v25, %v1004_v26 }
0x1429   :  { %2741 = vtanh.f32 %v1006_v27  ;;  %v2401_v29 = vmul.f32 -1.442695, %v1006_v27 }
0x142b   :  { %2743 = vpow2.f32 %v2401_v29 }
0x1436   :  { %v2742_v28 = vpop.eup %2741 }
0x1437   :  { %1016 = vrot.lane.b32.xlu1 %v2742_v28, %s2861_s4 }
0x1438   :  { %v2744_v30 = vpop.eup %2743 }
0x1439   :  { %v1010_v31 = vadd.f32 1.0, %v2744_v30 }
0x143b   :  { %2745 = vrcp.f32 %v1010_v31 }
0x1448   :  { %v2746_v32 = vpop.eup %2745 }
0x1449   :  { %v1014_v35 = vmul.f32 %v2746_v32, %v912_v15 }
0x14a9   :  { %v1017_v33 = vpop.permute.xlu1 %1016 }
0x14aa   :  { %v1019_v34 = vmul.f32 %v2746_v32, %v1017_v33 }
0x14ac   :  { %1021 = vrot.lane.b32.xlu0 %v1019_v34, %s2862_s15 }
0x151e   :  { %v1022_v36 = vpop.permute.xlu0 %1021 }
0x151f   :  { %v1024_v37 = vadd.f32 %v1022_v36, %v1014_v35 }
0x1521   :  { %2747 = vtanh.f32 %v1024_v37 }
0x152e   :  { %v2748_v38 = vpop.eup %2747 }
0x152f   :  { %1027 = vrot.lane.b32.xlu1 %v2748_v38, %s2863_s16 }
0x15a1   :  { %v1028_v41 = vpop.permute.xlu1 %1027 }
0x15a2   :  { %v1030_v42 = vmul.f32 %v2746_v32, %v1028_v41 }
0x15a4   :  { %1032 = vrot.lane.b32.xlu0 %v1030_v42, %s2864_s17 }
0x1616   :  { %v3113_v43 = vpop.permute.xlu0 %1032 }
0x1617   :  { %2593 = vmatmul.mubr.msk.f32.vlgmr.msra.gmra.mxu1 %vm60_vm1, %v3113_v43 }
0x1618   :  { %2607 = vmatpush3.msra.mxu1 %v2410_v5 }
0x16d7   :  { %v1108_v44 = vpop.f32.mrf.mxu1 }
0x16d8   :  { %1113 = vrot.lane.b32.xlu1 %v1108_v44, %s2860_s12 }
0x16d9   :  { %v2594_v45 = vpop.f32.mrf.mxu1 }
0x174a   :  { %v1114_v46 = vpop.permute.xlu1 %1113 }
0x174b   :  { %v1116_v48 = vsel %vm252_vm6, %v1108_v44, %v1114_v46 }
0x174c   :  { %v1118_v49 = vadd.f32 %v1117_v47, %v1116_v48 }
0x174e   :  { %2749 = vtanh.f32 %v1118_v49  ;;  %v2403_v51 = vmul.f32 -1.442695, %v1118_v49 }
0x1750   :  { %2751 = vpow2.f32 %v2403_v51 }
0x175b   :  { %v2750_v50 = vpop.eup %2749 }
0x175c   :  { %1128 = vrot.lane.b32.xlu0 %v2750_v50, %s2861_s4 }
0x175d   :  { %v2752_v52 = vpop.eup %2751 }
0x175e   :  { %v1122_v53 = vadd.f32 1.0, %v2752_v52 }
0x1760   :  { %2753 = vrcp.f32 %v1122_v53 }
0x176d   :  { %v2754_v54 = vpop.eup %2753 }
0x176e   :  { %v1126_v57 = vmul.f32 %v2754_v54, %v1024_v37 }
0x17ce   :  { %v1129_v55 = vpop.permute.xlu0 %1128 }
0x17cf   :  { %v1131_v56 = vmul.f32 %v2754_v54, %v1129_v55 }
0x17d1   :  { %1133 = vrot.lane.b32.xlu1 %v1131_v56, %s2862_s15 }
0x17d5   :  { %363 = vrot.lane.b32.xlu1 %v3008_v39, %s2861_s4 }
0x17d9   :  { %588 = vrot.lane.b32.xlu1 %v3044_v18, %s2861_s4 }
0x17dd   :  { %812 = vrot.lane.b32.xlu1 %v3079_v61, %s2861_s4 }
0x17e1   :  { %1036 = vrot.lane.b32.xlu1 %v1030_v42, %s2861_s4 }
0x1843   :  { %v1134_v58 = vpop.permute.xlu1 %1133 }
0x1844   :  { %v1136_v60 = vadd.f32 %v1134_v58, %v1126_v57 }
0x1846   :  { %2755 = vtanh.f32 %v1136_v60 }
0x1847   :  { %v364_v63 = vpop.permute.xlu1 %363 }
0x1848   :  { %367 = vst.msk [vmem:[#allocation2 + $0xc] sm:$0xc] %vm366_vm8, %v364_v63 }
0x184b   :  { %v589_v1 = vpop.permute.xlu1 %588 }
0x184c   :  { %591 = vst.msk [vmem:[#allocation2 + $0x8] sm:$0xc] %vm366_vm8, %v589_v1 }
0x184d   :  { %923 = vst.msk [vmem:[#allocation2 + $0xa] sm:$0x3] %vm361_vm7, %v3102_v20  ;;  %v2412_v20 = vld [vmem:[%s3413_s7 + $0x1] ss:$0 sm:$0xff] }
0x184f   :  { %v813_v39 = vpop.permute.xlu1 %812 }
0x1850   :  { %815 = vst.msk [vmem:[#allocation2 + $0x4] sm:$0xc] %vm366_vm8, %v813_v39 }
0x1853   :  { %v2756_v18 = vpop.eup %2755  ;;  %v1037_v61 = vpop.permute.xlu1 %1036 }
0x1854   :  { %1039 = vst.msk [vmem:[#allocation2] sm:$0xc] %vm366_vm8, %v1037_v61  ;;  %1139 = vrot.lane.b32.xlu0 %v2756_v18, %s2863_s16 }
0x1858   :  { %476 = vrot.lane.b32.xlu0 %v3026_v59, %s2861_s4  ;;  %v2409_v59 = vld [vmem:[%s3411_s5 + $0x30] sm:$0xff] }
0x1859   :  { %2608 = vmatprep.subr.mxu1 %v2409_v59 }
0x185a   :  { %2609 = vmatpush3.msra.mxu1 %v2409_v59 }
0x185b   :  { %2610 = vmatprep.subr.mxu1 %v2408_v7 }
0x185c   :  { %700 = vrot.lane.b32.xlu0 %v3062_v40, %s2861_s4  ;;  %v1155_v40 = vld [vmem:[%s3411_s5 + $0x8] sm:$0xff]  ;;  %2611 = vmatpush3.msra.mxu1 %v2408_v7  ;;  %s2833_s5 = scalar_lea.vmem %s2367_s11, 32 }
0x185d   :  { %2599 = vmatprep.subr.mxu0 %v1155_v40  ;;  %2612 = vmatprep.subr.mxu1 %v2407_v0  ;;  %p2834_p9 = scmp.ne.s32.totalorder %s2367_s11, %s2833_s5  ;;  %p2839_p11 = scmp.lt.s32.totalorder %s2833_s5, %s2833_s5 }
0x185e   :  { %2600 = vmatpush3.msra.mxu0 %v1155_v40  ;;  %2613 = vmatpush3.msra.mxu1 %v2407_v0 }
0x185f   :  { %2601 = vmatprep.subr.mxu0 %v1154_v8  ;;  %2624 = vmatprep.subr.mxu1 %v2858_v2  ;;  %p2840_p12 = por %p2839_p11, %p2838_p10 }
0x1860   :  { %924 = vrot.lane.b32.xlu0 %v3098_v19, %s2861_s4  ;;  %2602 = vmatpush3.msra.mxu0 %v1154_v8  ;;  %v2404_v19 = vld [vmem:[%s3413_s7] ss:$0 sm:$0xff] }
0x1861   :  { %2617 = vmatprep.subr.mxu0 %v2858_v2  ;;  %p2841_p13 = pnand %p2840_p12, %p2834_p9 }
0x18c6   :  { %v1140_v9 = vpop.permute.xlu0 %1139 }
0x18c7   :  { %v1142_v10 = vmul.f32 %v2754_v54, %v1140_v9 }
0x18c9   :  { %1144 = vrot.lane.b32.xlu1 %v1142_v10, %s2864_s17  ;;  %1148 = vrot.lane.b32.xlu0 %v1142_v10, %s2861_s4 }
0x18ca   :  { %v477_v3 = vpop.permute.xlu0 %476 }
0x18cb   :  { %479 = vst.msk [vmem:[#allocation2 + $0xa] sm:$0xc] %vm366_vm8, %v477_v3 }
0x18cc   :  { %1035 = vst.msk [vmem:[#allocation2 + $0xc] sm:$0x3] %vm361_vm7, %v3113_v43 }
0x18ce   :  { %v701_v11 = vpop.permute.xlu0 %700 }
0x18cf   :  { %703 = vst.msk [vmem:[#allocation2 + $0x6] sm:$0xc] %vm366_vm8, %v701_v11 }
0x18d0   :  { %811 = vst.msk [vmem:[#allocation2 + $0x8] sm:$0x3] %vm361_vm7, %v3083_v62  ;;  %v3191_v62 = vld [vmem:[%s3412_s6] sm:$0xff] }
0x18d2   :  { %v925_v12 = vpop.permute.xlu0 %924 }
0x18d3   :  { %927 = vst.msk [vmem:[#allocation2 + $0x2] sm:$0xc] %vm366_vm8, %v925_v12 }
0x193b   :  { %v1145_v13 = vpop.permute.xlu1 %1144  ;;  %v1149_v14 = vpop.permute.xlu0 %1148 }
0x193c   :  { %1147 = vst.msk [vmem:[#allocation2 + $0xe] sm:$0x3] %vm361_vm7, %v1145_v13 }
0x193d   :  { %1151 = vst.msk [vmem:[#allocation2 - $0x2] sm:$0xc] %vm366_vm8, %v1149_v14 }
0x1943   :  { %v1153_v16 = vld [vmem:[#allocation2 + $0x8] sm:$0xff] }
0x1944   :  { %v1152_v15 = vld [vmem:[#allocation2] sm:$0xff] }
0x1945   :  { %2603 = vmatprep.mubr.msk.f32.mxu0 %vm1165_vm9, %v1152_v15  ;;  %2614 = vmatprep.mubr.msk.f32.mxu1 %vm1165_vm9, %v1152_v15 }
0x1946   :  { %2604 = vmatmul.mubr.msk.f32.vlgmr.msra.gmra.mxu0 %vm1165_vm9, %v1153_v16  ;;  %2615 = vmatmul.mubr.msk.f32.vlgmr.msra.gmra.mxu1 %vm1165_vm9, %v1153_v16 }
0x1947   :  { %2618 = vmatpush3.msra.mxu0 %v3182_v17  ;;  %2621 = vmatprep.mubr.msk.f32.mxu0 %vm2859_vm0, %v2858_v2 }
0x1948   :  { %2619 = vmatprep.subr.mxu0 %v2858_v2  ;;  %2625 = vmatpush3.msra.mxu1 %v3182_v17 }
0x1949   :  { %2620 = vmatpush3.msra.mxu0 %v3191_v62  ;;  %2626 = vmatprep.subr.mxu1 %v2858_v2 }
0x194a   :  { %2622 = vmatmul.mubr.f32.vlgmr.msra.gmra.mxu0 %v2858_v2  ;;  %2627 = vmatpush3.msra.mxu1 %v3191_v62 }
0x194b   :  { %2628 = vmatprep.mubr.msk.f32.mxu1 %vm2859_vm0, %v2858_v2  ;;  %2631 = vmatprep.subr.mxu0 %v2858_v2 }
0x194c   :  { %2632 = vmatpush3.msra.mxu0 %v3182_v17  ;;  %2635 = vmatprep.mubr.msk.f32.mxu0 %vm2859_vm0, %v2858_v2 }
0x194d   :  { %2633 = vmatprep.subr.mxu0 %v2858_v2  ;;  %2638 = vmatprep.subr.mxu1 %v2858_v2 }
0x194e   :  { %2634 = vmatpush3.msra.mxu0 %v3191_v62 }
0x194f   :  { %2645 = vmatprep.subr.mxu0 %v2858_v2 }
0x1a06   :  { %v2605_v21 = vpop.f32.mrf.mxu0  ;;  %v2616_v23 = vpop.f32.mrf.mxu1 }
0x1a07   :  { %v1244_v24 = vadd.f32 %v2605_v21, %v2404_v19  ;;  %v1340_v25 = vadd.f32 %v2616_v23, %v2412_v20 }
0x1a08   :  { %v1238_v26 = vpop.f32.mrf.mxu0  ;;  %v1334_v27 = vpop.f32.mrf.mxu1 }
0x1a09   :  { %1251 = vst.msk [vmem:[#allocation4 + $0x10] sm:$0x3] %vm142_vm2, %v1244_v24  ;;  %1346 = vst.msk [vmem:[#allocation4 + $0xe] sm:$0x3] %vm142_vm2, %v1340_v25  ;;  %v1239_v28 = vadd.f32 %v2404_v19, %v1238_v26  ;;  %v1335_v29 = vadd.f32 %v2412_v20, %v1334_v27 }
0x1a0a   :  { %1252 = vst.msk [vmem:[#allocation4 + $0x12] sm:$0xc] %vm144_vm3, %v1244_v24  ;;  %1345 = vst.msk [vmem:[#allocation4 + $0x8] sm:$0xc] %vm144_vm3, %v1340_v25  ;;  %v1419_v30 = vpop.f32.mrf.mxu0 }
0x1a0b   :  { %1253 = vst.msk [vmem:[#allocation4 + $0x14] sm:$0x30] %vm146_vm4, %v1244_v24  ;;  %1344 = vst.msk [vmem:[#allocation4 + $0x2] sm:$0x30] %vm146_vm4, %v1340_v25  ;;  %1424 = vrot.lane.b32.xlu0 %v1419_v30, %s2860_s12 }
0x1a0c   :  { %1254 = vst.msk [vmem:[#allocation4 + $0x16] sm:$0xc0] %vm148_vm5, %v1244_v24  ;;  %1343 = vst.msk [vmem:[#allocation4 - $0x4] sm:$0xc0] %vm148_vm5, %v1340_v25  ;;  %v2623_v31 = vpop.f32.mrf.mxu0 }
0x1a0d   :  { %1247 = vst.msk [vmem:[#allocation4] sm:$0x3] %vm142_vm2, %v1239_v28  ;;  %1350 = vst.msk [vmem:[#allocation4 + $0x1e] sm:$0x3] %vm142_vm2, %v1335_v29 }
0x1a0e   :  { %1248 = vst.msk [vmem:[#allocation4 + $0x2] sm:$0xc] %vm144_vm3, %v1239_v28  ;;  %1349 = vst.msk [vmem:[#allocation4 + $0x18] sm:$0xc] %vm144_vm3, %v1335_v29 }
0x1a0f   :  { %1249 = vst.msk [vmem:[#allocation4 + $0x4] sm:$0x30] %vm146_vm4, %v1239_v28  ;;  %1348 = vst.msk [vmem:[#allocation4 + $0x12] sm:$0x30] %vm146_vm4, %v1335_v29 }
0x1a10   :  { %1250 = vst.msk [vmem:[#allocation4 + $0x6] sm:$0xc0] %vm148_vm5, %v1239_v28  ;;  %1347 = vst.msk [vmem:[#allocation4 + $0xc] sm:$0xc0] %vm148_vm5, %v1335_v29 }
0x1a14   :  { %v1428_v34 = vld [vmem:[#allocation4] sm:$0xf] }
0x1a15   :  { %v1540_v55 = vld [vmem:[#allocation4 + $0x4] sm:$0xf] }
0x1a16   :  { %v1652_v3 = vld [vmem:[#allocation4 + $0x8] sm:$0xf] }
0x1a7d   :  { %v1425_v32 = vpop.permute.xlu0 %1424 }
0x1a7e   :  { %v1427_v33 = vsel %vm252_vm6, %v1419_v30, %v1425_v32 }
0x1a7f   :  { %v1429_v35 = vadd.f32 %v1428_v34, %v1427_v33  ;;  %v1764_v33 = vld [vmem:[#allocation4 + $0xc] sm:$0xf] }
0x1a81   :  { %2757 = vtanh.f32 %v1429_v35  ;;  %v2415_v37 = vmul.f32 -1.442695, %v1429_v35 }
0x1a83   :  { %2759 = vpow2.f32 %v2415_v37 }
0x1a8e   :  { %v2758_v36 = vpop.eup %2757 }
0x1a8f   :  { %1439 = vrot.lane.b32.xlu1 %v2758_v36, %s2861_s4 }
0x1a90   :  { %v2760_v38 = vpop.eup %2759 }
0x1a91   :  { %v1433_v41 = vadd.f32 1.0, %v2760_v38 }
0x1a93   :  { %2761 = vrcp.f32 %v1433_v41 }
0x1aa0   :  { %v2762_v42 = vpop.eup %2761 }
0x1aa1   :  { %v1437_v45 = vmul.f32 0.0, %v2762_v42 }
0x1b01   :  { %v1440_v43 = vpop.permute.xlu1 %1439 }
0x1b02   :  { %v1442_v44 = vmul.f32 %v2762_v42, %v1440_v43 }
0x1b04   :  { %1444 = vrot.lane.b32.xlu0 %v1442_v44, %s2862_s15 }
0x1b76   :  { %v1445_v46 = vpop.permute.xlu0 %1444 }
0x1b77   :  { %v1447_v47 = vadd.f32 %v1445_v46, %v1437_v45 }
0x1b79   :  { %2763 = vtanh.f32 %v1447_v47 }
0x1b86   :  { %v2764_v48 = vpop.eup %2763 }
0x1b87   :  { %1450 = vrot.lane.b32.xlu1 %v2764_v48, %s2863_s16 }
0x1bf9   :  { %v1451_v49 = vpop.permute.xlu1 %1450 }
0x1bfa   :  { %v3240_v50 = vmul.f32 %v2762_v42, %v1451_v49 }
0x1bfc   :  { %1455 = vrot.lane.b32.xlu0 %v3240_v50, %s2864_s17 }
0x1c6e   :  { %v1456_v51 = vpop.permute.xlu0 %1455 }
0x1c6f   :  { %1458 = vst.msk [vmem:[#allocation3] sm:$0x3] %vm361_vm7, %v1456_v51  ;;  %2629 = vmatmul.mubr.msk.f32.vlgmr.msra.gmra.mxu1 %vm60_vm1, %v1456_v51 }
0x1c70   :  { %2639 = vmatpush3.msra.mxu1 %v3182_v17  ;;  %2642 = vmatprep.mubr.msk.f32.mxu1 %vm2859_vm0, %v2858_v2 }
0x1c71   :  { %2640 = vmatprep.subr.mxu1 %v2858_v2 }
0x1c72   :  { %2641 = vmatpush3.msra.mxu1 %v3191_v62 }
0x1c73   :  { %2652 = vmatprep.subr.mxu1 %v2858_v2 }
0x1d2f   :  { %v1531_v52 = vpop.f32.mrf.mxu1 }
0x1d30   :  { %1536 = vrot.lane.b32.xlu1 %v1531_v52, %s2860_s12 }
0x1d31   :  { %v2630_v53 = vpop.f32.mrf.mxu1 }
0x1da2   :  { %v1537_v54 = vpop.permute.xlu1 %1536 }
0x1da3   :  { %v1539_v56 = vsel %vm252_vm6, %v1531_v52, %v1537_v54 }
0x1da4   :  { %v1541_v57 = vadd.f32 %v1540_v55, %v1539_v56  ;;  %v1876_v56 = vld [vmem:[#allocation4 + $0x10] sm:$0xf] }
0x1da6   :  { %2765 = vtanh.f32 %v1541_v57  ;;  %v2417_v60 = vmul.f32 -1.442695, %v1541_v57 }
0x1da8   :  { %2767 = vpow2.f32 %v2417_v60 }
0x1db3   :  { %v2766_v58 = vpop.eup %2765 }
0x1db4   :  { %1551 = vrot.lane.b32.xlu0 %v2766_v58, %s2861_s4 }
0x1db5   :  { %v2768_v63 = vpop.eup %2767 }
0x1db6   :  { %v1545_v1 = vadd.f32 1.0, %v2768_v63 }
0x1db8   :  { %2769 = vrcp.f32 %v1545_v1 }
0x1dc5   :  { %v2770_v39 = vpop.eup %2769 }
0x1dc6   :  { %v1549_v4 = vmul.f32 %v2770_v39, %v1447_v47 }
0x1e26   :  { %v1552_v18 = vpop.permute.xlu0 %1551 }
0x1e27   :  { %v1554_v61 = vmul.f32 %v2770_v39, %v1552_v18 }
0x1e29   :  { %1556 = vrot.lane.b32.xlu1 %v1554_v61, %s2862_s15 }
0x1e9b   :  { %v1557_v5 = vpop.permute.xlu1 %1556 }
0x1e9c   :  { %v1559_v6 = vadd.f32 %v1557_v5, %v1549_v4 }
0x1e9e   :  { %2771 = vtanh.f32 %v1559_v6 }
0x1eab   :  { %v2772_v59 = vpop.eup %2771 }
0x1eac   :  { %1562 = vrot.lane.b32.xlu0 %v2772_v59, %s2863_s16 }
0x1f1e   :  { %v1563_v40 = vpop.permute.xlu0 %1562 }
0x1f1f   :  { %v3258_v7 = vmul.f32 %v2770_v39, %v1563_v40 }
0x1f21   :  { %1567 = vrot.lane.b32.xlu1 %v3258_v7, %s2864_s17 }
0x1f93   :  { %v1568_v8 = vpop.permute.xlu1 %1567 }
0x1f94   :  { %1570 = vst.msk [vmem:[#allocation3 + $0x2] sm:$0x3] %vm361_vm7, %v1568_v8  ;;  %2636 = vmatmul.mubr.msk.f32.vlgmr.msra.gmra.mxu0 %vm60_vm1, %v1568_v8 }
0x1f95   :  { %2646 = vmatpush3.msra.mxu0 %v3182_v17  ;;  %2649 = vmatprep.mubr.msk.f32.mxu0 %vm2859_vm0, %v2858_v2 }
0x1f96   :  { %2647 = vmatprep.subr.mxu0 %v2858_v2 }
0x1f97   :  { %2648 = vmatpush3.msra.mxu0 %v3191_v62 }
0x1f98   :  { %2659 = vmatprep.subr.mxu0 %v2858_v2 }
0x2054   :  { %v1643_v0 = vpop.f32.mrf.mxu0 }
0x2055   :  { %1648 = vrot.lane.b32.xlu0 %v1643_v0, %s2860_s12 }
0x2056   :  { %v2637_v9 = vpop.f32.mrf.mxu0 }
0x20c7   :  { %v1649_v10 = vpop.permute.xlu0 %1648 }
0x20c8   :  { %v1651_v11 = vsel %vm252_vm6, %v1643_v0, %v1649_v10 }
0x20c9   :  { %v1653_v12 = vadd.f32 %v1652_v3, %v1651_v11 }
0x20cb   :  { %2773 = vtanh.f32 %v1653_v12  ;;  %v2419_v14 = vmul.f32 -1.442695, %v1653_v12  ;;  %v1988_v12 = vld [vmem:[#allocation4 + $0x14] sm:$0xf] }
0x20cd   :  { %2775 = vpow2.f32 %v2419_v14 }
0x20d8   :  { %v2774_v13 = vpop.eup %2773 }
0x20d9   :  { %1663 = vrot.lane.b32.xlu1 %v2774_v13, %s2861_s4 }
0x20da   :  { %v2776_v15 = vpop.eup %2775 }
0x20db   :  { %v1657_v16 = vadd.f32 1.0, %v2776_v15 }
0x20dd   :  { %2777 = vrcp.f32 %v1657_v16 }
0x20ea   :  { %v2778_v19 = vpop.eup %2777 }
0x20eb   :  { %v1661_v23 = vmul.f32 %v2778_v19, %v1559_v6 }
0x214b   :  { %v1664_v20 = vpop.permute.xlu1 %1663 }
0x214c   :  { %v1666_v21 = vmul.f32 %v2778_v19, %v1664_v20 }
0x214e   :  { %1668 = vrot.lane.b32.xlu0 %v1666_v21, %s2862_s15 }
0x21c0   :  { %v1669_v24 = vpop.permute.xlu0 %1668 }
0x21c1   :  { %v1671_v25 = vadd.f32 %v1669_v24, %v1661_v23 }
0x21c3   :  { %2779 = vtanh.f32 %v1671_v25 }
0x21d0   :  { %v2780_v26 = vpop.eup %2779 }
0x21d1   :  { %1674 = vrot.lane.b32.xlu1 %v2780_v26, %s2863_s16 }
0x2243   :  { %v1675_v27 = vpop.permute.xlu1 %1674 }
0x2244   :  { %v3276_v28 = vmul.f32 %v2778_v19, %v1675_v27 }
0x2246   :  { %1679 = vrot.lane.b32.xlu0 %v3276_v28, %s2864_s17 }
0x22b8   :  { %v1680_v29 = vpop.permute.xlu0 %1679 }
0x22b9   :  { %1682 = vst.msk [vmem:[#allocation3 + $0x4] sm:$0x3] %vm361_vm7, %v1680_v29  ;;  %2643 = vmatmul.mubr.msk.f32.vlgmr.msra.gmra.mxu1 %vm60_vm1, %v1680_v29 }
0x22ba   :  { %2653 = vmatpush3.msra.mxu1 %v3182_v17  ;;  %2656 = vmatprep.mubr.msk.f32.mxu1 %vm2859_vm0, %v2858_v2 }
0x22bb   :  { %2654 = vmatprep.subr.mxu1 %v2858_v2 }
0x22bc   :  { %2655 = vmatpush3.msra.mxu1 %v3191_v62 }
0x22bd   :  { %2666 = vmatprep.subr.mxu1 %v2858_v2 }
0x2379   :  { %v1755_v30 = vpop.f32.mrf.mxu1 }
0x237a   :  { %1760 = vrot.lane.b32.xlu1 %v1755_v30, %s2860_s12 }
0x237b   :  { %v2644_v31 = vpop.f32.mrf.mxu1 }
0x23ec   :  { %v1761_v32 = vpop.permute.xlu1 %1760 }
0x23ed   :  { %v1763_v34 = vsel %vm252_vm6, %v1755_v30, %v1761_v32 }
0x23ee   :  { %v1765_v35 = vadd.f32 %v1764_v33, %v1763_v34  ;;  %v2100_v34 = vld [vmem:[#allocation4 + $0x18] sm:$0xf] }
0x23f0   :  { %2781 = vtanh.f32 %v1765_v35  ;;  %v2421_v37 = vmul.f32 -1.442695, %v1765_v35 }
0x23f2   :  { %2783 = vpow2.f32 %v2421_v37 }
0x23fd   :  { %v2782_v36 = vpop.eup %2781 }
0x23fe   :  { %1775 = vrot.lane.b32.xlu0 %v2782_v36, %s2861_s4 }
0x23ff   :  { %v2784_v38 = vpop.eup %2783 }
0x2400   :  { %v1769_v41 = vadd.f32 1.0, %v2784_v38 }
0x2402   :  { %2785 = vrcp.f32 %v1769_v41 }
0x240f   :  { %v2786_v42 = vpop.eup %2785 }
0x2410   :  { %v1773_v45 = vmul.f32 %v2786_v42, %v1671_v25 }
0x2470   :  { %v1776_v43 = vpop.permute.xlu0 %1775 }
0x2471   :  { %v1778_v44 = vmul.f32 %v2786_v42, %v1776_v43 }
0x2473   :  { %1780 = vrot.lane.b32.xlu1 %v1778_v44, %s2862_s15 }
0x24e5   :  { %v1781_v46 = vpop.permute.xlu1 %1780 }
0x24e6   :  { %v1783_v47 = vadd.f32 %v1781_v46, %v1773_v45 }
0x24e8   :  { %2787 = vtanh.f32 %v1783_v47 }
0x24f5   :  { %v2788_v48 = vpop.eup %2787 }
0x24f6   :  { %1786 = vrot.lane.b32.xlu0 %v2788_v48, %s2863_s16 }
0x2568   :  { %v1787_v49 = vpop.permute.xlu0 %1786 }
0x2569   :  { %v3294_v51 = vmul.f32 %v2786_v42, %v1787_v49 }
0x256b   :  { %1791 = vrot.lane.b32.xlu1 %v3294_v51, %s2864_s17 }
0x25dd   :  { %v1792_v52 = vpop.permute.xlu1 %1791 }
0x25de   :  { %1794 = vst.msk [vmem:[#allocation3 + $0x6] sm:$0x3] %vm361_vm7, %v1792_v52  ;;  %2650 = vmatmul.mubr.msk.f32.vlgmr.msra.gmra.mxu0 %vm60_vm1, %v1792_v52 }
0x25df   :  { %2660 = vmatpush3.msra.mxu0 %v3182_v17  ;;  %2663 = vmatprep.mubr.msk.f32.mxu0 %vm2859_vm0, %v2858_v2 }
0x25e0   :  { %2661 = vmatprep.subr.mxu0 %v2858_v2 }
0x25e1   :  { %2662 = vmatpush3.msra.mxu0 %v3191_v62 }
0x25e2   :  { %2673 = vmatprep.subr.mxu0 %v2858_v2 }
0x269e   :  { %v1867_v53 = vpop.f32.mrf.mxu0 }
0x269f   :  { %1872 = vrot.lane.b32.xlu0 %v1867_v53, %s2860_s12 }
0x26a0   :  { %v2651_v54 = vpop.f32.mrf.mxu0 }
0x2711   :  { %v1873_v55 = vpop.permute.xlu0 %1872 }
0x2712   :  { %v1875_v57 = vsel %vm252_vm6, %v1867_v53, %v1873_v55 }
0x2713   :  { %v1877_v58 = vadd.f32 %v1876_v56, %v1875_v57 }
0x2715   :  { %2789 = vtanh.f32 %v1877_v58  ;;  %v2423_v63 = vmul.f32 -1.442695, %v1877_v58  ;;  %v2212_v58 = vld [vmem:[#allocation4 + $0x1c] sm:$0xf] }
0x2717   :  { %2791 = vpow2.f32 %v2423_v63 }
0x2722   :  { %v2790_v60 = vpop.eup %2789 }
0x2723   :  { %1887 = vrot.lane.b32.xlu1 %v2790_v60, %s2861_s4 }
0x2724   :  { %v2792_v1 = vpop.eup %2791 }
0x2725   :  { %v1881_v39 = vadd.f32 1.0, %v2792_v1 }
0x2727   :  { %2793 = vrcp.f32 %v1881_v39 }
0x2734   :  { %v2794_v18 = vpop.eup %2793 }
0x2735   :  { %v1885_v5 = vmul.f32 %v2794_v18, %v1783_v47 }
0x2795   :  { %v1888_v61 = vpop.permute.xlu1 %1887 }
0x2796   :  { %v1890_v4 = vmul.f32 %v2794_v18, %v1888_v61 }
0x2798   :  { %1892 = vrot.lane.b32.xlu0 %v1890_v4, %s2862_s15 }
0x280a   :  { %v1893_v6 = vpop.permute.xlu0 %1892 }
0x280b   :  { %v1895_v59 = vadd.f32 %v1893_v6, %v1885_v5 }
0x280d   :  { %2795 = vtanh.f32 %v1895_v59 }
0x281a   :  { %v2796_v40 = vpop.eup %2795 }
0x281b   :  { %1898 = vrot.lane.b32.xlu1 %v2796_v40, %s2863_s16 }
0x288d   :  { %v1899_v8 = vpop.permute.xlu1 %1898 }
0x288e   :  { %v3312_v0 = vmul.f32 %v2794_v18, %v1899_v8 }
0x2890   :  { %1903 = vrot.lane.b32.xlu0 %v3312_v0, %s2864_s17 }
0x2902   :  { %v3316_v9 = vpop.permute.xlu0 %1903 }
0x2903   :  { %2657 = vmatmul.mubr.msk.f32.vlgmr.msra.gmra.mxu1 %vm60_vm1, %v3316_v9 }
0x2904   :  { %2667 = vmatpush3.msra.mxu1 %v3182_v17  ;;  %2670 = vmatprep.mubr.msk.f32.mxu1 %vm2859_vm0, %v2858_v2 }
0x2905   :  { %2668 = vmatprep.subr.mxu1 %v2858_v2 }
0x2906   :  { %2669 = vmatpush3.msra.mxu1 %v3191_v62 }
0x29c3   :  { %v1979_v10 = vpop.f32.mrf.mxu1 }
0x29c4   :  { %1984 = vrot.lane.b32.xlu1 %v1979_v10, %s2860_s12 }
0x29c5   :  { %v2658_v3 = vpop.f32.mrf.mxu1 }
0x29c6   :  { %v2277_v3 = vld [vmem:[%s3414_s8 + $0x18] sm:$0xff] }
0x2a36   :  { %v1985_v11 = vpop.permute.xlu1 %1984 }
0x2a37   :  { %v1987_v13 = vsel %vm252_vm6, %v1979_v10, %v1985_v11  ;;  %v2276_v11 = vld [vmem:[%s3414_s8 + $0x10] sm:$0xff] }
0x2a38   :  { %v1989_v14 = vadd.f32 %v1988_v12, %v1987_v13 }
0x2a3a   :  { %2797 = vtanh.f32 %v1989_v14  ;;  %v2425_v17 = vmul.f32 -1.442695, %v1989_v14 }
0x2a3c   :  { %2799 = vpow2.f32 %v2425_v17 }
0x2a47   :  { %v2798_v15 = vpop.eup %2797 }
0x2a48   :  { %1999 = vrot.lane.b32.xlu0 %v2798_v15, %s2861_s4 }
0x2a49   :  { %v2800_v16 = vpop.eup %2799 }
0x2a4a   :  { %v1993_v19 = vadd.f32 1.0, %v2800_v16 }
0x2a4c   :  { %2801 = vrcp.f32 %v1993_v19 }
0x2a59   :  { %v2802_v62 = vpop.eup %2801 }
0x2a5a   :  { %v1997_v23 = vmul.f32 %v2802_v62, %v1895_v59 }
0x2aba   :  { %v2000_v20 = vpop.permute.xlu0 %1999 }
0x2abb   :  { %v2002_v21 = vmul.f32 %v2802_v62, %v2000_v20 }
0x2abd   :  { %2004 = vrot.lane.b32.xlu1 %v2002_v21, %s2862_s15 }
0x2b2f   :  { %v2005_v24 = vpop.permute.xlu1 %2004 }
0x2b30   :  { %v2007_v25 = vadd.f32 %v2005_v24, %v1997_v23 }
0x2b32   :  { %2803 = vtanh.f32 %v2007_v25 }
0x2b3f   :  { %v2804_v26 = vpop.eup %2803 }
0x2b40   :  { %2010 = vrot.lane.b32.xlu0 %v2804_v26, %s2863_s16 }
0x2bb2   :  { %v2011_v27 = vpop.permute.xlu0 %2010 }
0x2bb3   :  { %v3331_v29 = vmul.f32 %v2802_v62, %v2011_v27 }
0x2bb5   :  { %2015 = vrot.lane.b32.xlu1 %v3331_v29, %s2864_s17 }
0x2c27   :  { %v3335_v30 = vpop.permute.xlu1 %2015 }
0x2c28   :  { %2664 = vmatmul.mubr.msk.f32.vlgmr.msra.gmra.mxu0 %vm60_vm1, %v3335_v30 }
0x2c29   :  { %2681 = vmatprep.mubr.msk.f32.mxu0 %vm2859_vm0, %v2858_v2  ;;  %2674 = vmatpush3.msra.mxu0 %v2277_v3 }
0x2c2a   :  { %2675 = vmatprep.subr.mxu0 %v2858_v2 }
0x2c2b   :  { %2676 = vmatpush3.msra.mxu0 %v2276_v11 }
0x2c2c   :  { %2677 = vmatprep.subr.mxu0 %v2858_v2 }
0x2ce8   :  { %v2091_v31 = vpop.f32.mrf.mxu0 }
0x2ce9   :  { %2096 = vrot.lane.b32.xlu0 %v2091_v31, %s2860_s12 }
0x2cea   :  { %v2665_v32 = vpop.f32.mrf.mxu0 }
0x2d5b   :  { %v2097_v33 = vpop.permute.xlu0 %2096 }
0x2d5c   :  { %v2099_v35 = vsel %vm252_vm6, %v2091_v31, %v2097_v33 }
0x2d5d   :  { %v2101_v36 = vadd.f32 %v2100_v34, %v2099_v35 }
0x2d5f   :  { %2805 = vtanh.f32 %v2101_v36  ;;  %v2427_v38 = vmul.f32 -1.442695, %v2101_v36 }
0x2d61   :  { %2807 = vpow2.f32 %v2427_v38 }
0x2d6c   :  { %v2806_v37 = vpop.eup %2805 }
0x2d6d   :  { %2111 = vrot.lane.b32.xlu1 %v2806_v37, %s2861_s4 }
0x2d6e   :  { %v2808_v41 = vpop.eup %2807 }
0x2d6f   :  { %v2105_v42 = vadd.f32 1.0, %v2808_v41 }
0x2d71   :  { %2809 = vrcp.f32 %v2105_v42 }
0x2d7e   :  { %v2810_v43 = vpop.eup %2809 }
0x2d7f   :  { %v2109_v46 = vmul.f32 %v2810_v43, %v2007_v25  ;;  %v2446_v25 = vld [vmem:[%s3415_s9] ss:$0 sm:$0xff] }
0x2ddf   :  { %v2112_v44 = vpop.permute.xlu1 %2111 }
0x2de0   :  { %v2114_v45 = vmul.f32 %v2810_v43, %v2112_v44 }
0x2de2   :  { %2116 = vrot.lane.b32.xlu0 %v2114_v45, %s2862_s15 }
0x2e54   :  { %v2117_v47 = vpop.permute.xlu0 %2116 }
0x2e55   :  { %v2119_v48 = vadd.f32 %v2117_v47, %v2109_v46 }
0x2e57   :  { %2811 = vtanh.f32 %v2119_v48 }
0x2e64   :  { %v2812_v49 = vpop.eup %2811 }
0x2e65   :  { %2122 = vrot.lane.b32.xlu1 %v2812_v49, %s2863_s16 }
0x2ed7   :  { %v2123_v52 = vpop.permute.xlu1 %2122 }
0x2ed8   :  { %v2125_v53 = vmul.f32 %v2810_v43, %v2123_v52 }
0x2eda   :  { %2127 = vrot.lane.b32.xlu0 %v2125_v53, %s2864_s17 }
0x2f4c   :  { %v2128_v54 = vpop.permute.xlu0 %2127 }
0x2f4d   :  { %2671 = vmatmul.mubr.msk.f32.vlgmr.msra.gmra.mxu1 %vm60_vm1, %v2128_v54 }
0x300d   :  { %v2203_v55 = vpop.f32.mrf.mxu1 }
0x300e   :  { %2208 = vrot.lane.b32.xlu1 %v2203_v55, %s2860_s12 }
0x300f   :  { %v2672_v56 = vpop.f32.mrf.mxu1 }
0x3080   :  { %v2209_v57 = vpop.permute.xlu1 %2208 }
0x3081   :  { %v2211_v60 = vsel %vm252_vm6, %v2203_v55, %v2209_v57 }
0x3082   :  { %v2213_v63 = vadd.f32 %v2212_v58, %v2211_v60 }
0x3084   :  { %2813 = vtanh.f32 %v2213_v63  ;;  %v2429_v39 = vmul.f32 -1.442695, %v2213_v63 }
0x3086   :  { %2815 = vpow2.f32 %v2429_v39 }
0x3091   :  { %v2814_v1 = vpop.eup %2813 }
0x3092   :  { %2223 = vrot.lane.b32.xlu0 %v2814_v1, %s2861_s4 }
0x3093   :  { %v2816_v18 = vpop.eup %2815 }
0x3094   :  { %v2217_v61 = vadd.f32 1.0, %v2816_v18 }
0x3096   :  { %2817 = vrcp.f32 %v2217_v61 }
0x30a3   :  { %v2818_v4 = vpop.eup %2817 }
0x30a4   :  { %v2221_v22 = vmul.f32 %v2818_v4, %v2119_v48 }
0x3104   :  { %v2224_v5 = vpop.permute.xlu0 %2223 }
0x3105   :  { %v2226_v6 = vmul.f32 %v2818_v4, %v2224_v5 }
0x3107   :  { %2228 = vrot.lane.b32.xlu1 %v2226_v6, %s2862_s15 }
0x310b   :  { %1459 = vrot.lane.b32.xlu1 %v3240_v50, %s2861_s4 }
0x310f   :  { %1683 = vrot.lane.b32.xlu1 %v3276_v28, %s2861_s4 }
0x3113   :  { %1907 = vrot.lane.b32.xlu1 %v3312_v0, %s2861_s4 }
0x3117   :  { %2131 = vrot.lane.b32.xlu1 %v2125_v53, %s2861_s4 }
0x3179   :  { %v2229_v59 = vpop.permute.xlu1 %2228 }
0x317a   :  { %v2231_v40 = vadd.f32 %v2229_v59, %v2221_v22 }
0x317c   :  { %2819 = vtanh.f32 %v2231_v40 }
0x317d   :  { %v1460_v8 = vpop.permute.xlu1 %1459 }
0x317e   :  { %1462 = vst.msk [vmem:[#allocation3 + $0xc] sm:$0xc] %vm366_vm8, %v1460_v8 }
0x3181   :  { %v1684_v10 = vpop.permute.xlu1 %1683 }
0x3182   :  { %1686 = vst.msk [vmem:[#allocation3 + $0x8] sm:$0xc] %vm366_vm8, %v1684_v10 }
0x3183   :  { %2018 = vst.msk [vmem:[#allocation3 + $0xa] sm:$0x3] %vm361_vm7, %v3335_v30 }
0x3185   :  { %v1908_v50 = vpop.permute.xlu1 %1907 }
0x3186   :  { %1910 = vst.msk [vmem:[#allocation3 + $0x4] sm:$0xc] %vm366_vm8, %v1908_v50 }
0x3189   :  { %v2820_v28 = vpop.eup %2819  ;;  %v2132_v0 = vpop.permute.xlu1 %2131 }
0x318a   :  { %2134 = vst.msk [vmem:[#allocation3] sm:$0xc] %vm366_vm8, %v2132_v0  ;;  %2234 = vrot.lane.b32.xlu0 %v2820_v28, %s2863_s16 }
0x318e   :  { %1571 = vrot.lane.b32.xlu0 %v3258_v7, %s2861_s4  ;;  %v2275_v7 = vld [vmem:[%s3414_s8 + $0x8] sm:$0xff] }
0x318f   :  { %2678 = vmatpush3.msra.mxu0 %v2275_v7 }
0x3190   :  { %2679 = vmatprep.subr.mxu0 %v2858_v2 }
0x3192   :  { %1795 = vrot.lane.b32.xlu0 %v3294_v51, %s2861_s4  ;;  %v2274_v51 = vld [vmem:[%s3414_s8] sm:$0xff]  ;;  %s2437_s8 = sld [smem:[#allocation5 + $0x1]] }
0x3193   :  { %2680 = vmatpush3.msra.mxu0 %v2274_v51 }
0x3196   :  { %2019 = vrot.lane.b32.xlu0 %v3331_v29, %s2861_s4 }
0x3198   :  { %p2257_p5 = scmp.gt.s32.totalorder %s2437_s8, 1  ;;  %p2438_p7 = scmp.lt.s32.totalorder %s2437_s8, 8 }
0x31fc   :  { %v2235_v12 = vpop.permute.xlu0 %2234 }
0x31fd   :  { %v2237_v13 = vmul.f32 %v2818_v4, %v2235_v12 }
0x31ff   :  { %2243 = vrot.lane.b32.xlu1 %v2237_v13, %s2861_s4  ;;  %2239 = vrot.lane.b32.xlu0 %v2237_v13, %s2864_s17  ;;  %s2258_s4 = scalar_select %p2257_p5, %s2437_s8, 1 }
0x3200   :  { %v1572_v14 = vpop.permute.xlu0 %1571 }
0x3201   :  { %1574 = vst.msk [vmem:[#allocation3 + $0xa] sm:$0xc] %vm366_vm8, %v1572_v14  ;;  %s3420_s4 = smov (!%p2438_p7, %s2258_s4), 8 }
0x3202   :  { %2130 = vst.msk [vmem:[#allocation3 + $0xc] sm:$0x3] %vm361_vm7, %v2128_v54  ;;  %s2443_s17 = sadd.s32 4294967295, %s3420_s4 }
0x3203   :  { %s2444_s25 = sshll.u32 %s2443_s17, 1 }
0x3204   :  { %v1796_v15 = vpop.permute.xlu0 %1795  ;;  %s2378_s3 = scalar_lea.vmem [#allocation3], %s2444_s25 }
0x3205   :  { %1798 = vst.msk [vmem:[#allocation3 + $0x6] sm:$0xc] %vm366_vm8, %v1796_v15 }
0x3206   :  { %1906 = vst.msk [vmem:[#allocation3 + $0x8] sm:$0x3] %vm361_vm7, %v3316_v9 }
0x3208   :  { %v2020_v17 = vpop.permute.xlu0 %2019 }
0x3209   :  { %2022 = vst.msk [vmem:[#allocation3 + $0x2] sm:$0xc] %vm366_vm8, %v2020_v17 }
0x3271   :  { %v2244_v2 = vpop.permute.xlu1 %2243  ;;  %v2240_v16 = vpop.permute.xlu0 %2239 }
0x3272   :  { %2246 = vst.msk [vmem:[#allocation3 - $0x2] sm:$0xc] %vm366_vm8, %v2244_v2 }
0x3273   :  { %2242 = vst.msk [vmem:[#allocation3 + $0xe] sm:$0x3] %vm361_vm7, %v2240_v16 }
0x3279   :  { %v2271_v21 = vld [vmem:[#allocation3] sm:$0x3] }
0x327a   :  { %v2445_v9 = vld [vmem:[%s2378_s3 + $0x1] sm:$0x1]  ;;  %v2255_v62 = vld [vmem:[%s2254_s27] sm:$0x1] }
0x327b   :  { %v2267_v19 = vrot.slane %v2445_v9, 7 }
0x327d   :  { %v2270_v20 = vsel %vm2269_vm10, %v2255_v62, %v2267_v19 }
0x327e   :  { %v2272_v23 = vadd.f32 %v2271_v21, %v2270_v20 }
0x3280   :  { %v2273_v24 = vmul.f32 0.5, %v2272_v23 }
0x3282   :  { %2682 = vmatmul.mubr.msk.f32.vlgmr.msra.gmra.mxu0 %vm1165_vm9, %v2273_v24 }
0x3342   :  { %v2354_v26 = vpop.f32.mrf.mxu0 }
0x3343   :  { %v2355_v27 = vadd.f32 %v2446_v25, %v2354_v26 }
0x3344   :  { %v2683_v29 = vpop.f32.mrf.mxu0 }
0x3345   :  { %2359 = vst.msk [vmem:[#allocation8] sm:$0x3] %vm2358_vm11, %v2355_v27 }
0x3346   :  { %2844 = shalt.err (!%p2841_p13)
}
0x3347   :  { %2369 = dma.vmem_to_hbm [thread:$0]  %s2367_s11, 32, %s3416_s10, [#allocation6]  }
0x3348   :  { %2855 = dma.done.wait [#allocation6], 32  }
0x3349   :  { %2856 = vsyncadd [#allocation6], 4294967264 }
0x334a   :  { %2373 = vsyncpa [#allocation6], 1 }
0x334b   :  { %2374 = vsyncpa [#allocation7], 1 }

</bundles_post_ra>
